<compile_context>
chip_gen: v5e
topology: v5e:2x2
jax: 0.10.0
libtpu: 0.0.40
codegen_flags: <defaults>
</compile_context>

<pallas_src>
import jax
import jax.numpy as jnp
import numpy as np
from jax.experimental import pallas as pl
from jax.experimental.pallas import tpu as pltpu


def _im2col_3x3(xhwc):
    """xhwc: (H, W, C) value. Returns the (H*W, 9*C) patch slab for a 3x3 conv
    with padding=1; the halo is built with zero-concats (no scratch, no pad op
    in the wrapper). Column order is (dy, dx, ci), matching w.reshape(9*C, Cout).
    """
    H, W, C = xhwc.shape
    zw = jnp.zeros((H, 1, C), xhwc.dtype)
    xp = jnp.concatenate([zw, xhwc, zw], axis=1)          # (H,   W+2, C)
    zh = jnp.zeros((1, W + 2, C), xhwc.dtype)
    xp = jnp.concatenate([zh, xp, zh], axis=0)            # (H+2, W+2, C)
    cols = [xp[dy:dy + H, dx:dx + W, :].reshape(H * W, C)
            for dy in range(3) for dx in range(3)]
    return jnp.concatenate(cols, axis=-1)                 # (H*W, 9*C)


def conv_residual_block_kernel(x_ref, w1_ref, b1_ref, w2_ref, b2_ref, out_ref):
    # x_ref  : (1, H, W, Cin)   one batch element, NHWC, unpadded
    # w1_ref : (9*Cin, Cout)    filter taps flattened in (dy, dx, ci) order
    # b1_ref : (1, Cout)
    # w2_ref : (9*Cout, Cout)
    # b2_ref : (1, Cout)
    # out_ref: (1, H*W, Cout)
    H, W, Cin = x_ref.shape[1], x_ref.shape[2], x_ref.shape[3]
    Cout = out_ref.shape[2]
    mxu_dtype = w1_ref.dtype            # f32, or bf16 on v6e/v7x

    x = x_ref[0]                                            # (H, W, Cin) f32

    # ---- conv1: one im2col MXU matmul, f32 accumulation ----
    p1 = _im2col_3x3(x).astype(mxu_dtype)                   # (H*W, 9*Cin)
    h = jnp.dot(p1, w1_ref[...], preferred_element_type=jnp.float32)
    h = jnp.maximum(h + b1_ref[...], 0.0)                   # (H*W, Cout) f32

    # ---- conv2: same, padding the intermediate as a value (no VMEM scratch) ----
    p2 = _im2col_3x3(h.reshape(H, W, Cout)).astype(mxu_dtype)
    y = jnp.dot(p2, w2_ref[...], preferred_element_type=jnp.float32) + b2_ref[...]

    # ---- residual add + final ReLU, all f32 on the VPU ----
    out = jnp.maximum(y + x.reshape(H * W, Cin), 0.0)
    out_ref[0] = out.astype(out_ref.dtype)


def conv_residual_block(x_nchw, w1_hwio, b1, w2_hwio, b2, *, mxu_dtype=jnp.float32):
    """x_nchw: (B, C, H, W) f32. Weights HWIO (3,3,Cin,Cout). Returns (B, C, H, W)."""
    B, C, H, W = x_nchw.shape
    Cout = w1_hwio.shape[-1]
    assert C == Cout, "residual add requires channels == channelsOut"
    assert w1_hwio.shape == (3, 3, C, Cout) and w2_hwio.shape == (3, 3, Cout, Cout)

    # Single NCHW -> NHWC transpose (module contract is NCHW; channels must be on
    # the lane/contraction axis).  No jnp.pad pass anymore: halo is in-kernel.
    x_nhwc = jnp.transpose(x_nchw, (0, 2, 3, 1))

    # Flatten filters to (9*Cin, Cout), rows in (dy, dx, ci) order to match the
    # kernel's im2col columns.  Tiny arrays; cast to bf16 here if requested so
    # only the MXU operands are narrow (accumulation / elementwise stay f32).
    w1_flat = w1_hwio.reshape(9 * C, Cout).astype(mxu_dtype)
    w2_flat = w2_hwio.reshape(9 * Cout, Cout).astype(mxu_dtype)
    b1_row = b1.reshape(1, Cout).astype(jnp.float32)
    b2_row = b2.reshape(1, Cout).astype(jnp.float32)

    # Scoped-VMEM limit sized to the real working set (double-buffered I/O blocks
    # + im2col temporaries), capped at 64 MiB so it also fits v7x's budget.
    io_bytes = 2 * (H * W * C + H * W * Cout) * 4
    tmp_bytes = 6 * (H * W) * 9 * max(C, Cout) * 4
    vmem_limit = int(min(64 * 1024 * 1024,
                         max(32 * 1024 * 1024, 2 * (io_bytes + tmp_bytes))))

    out_flat = pl.pallas_call(
        conv_residual_block_kernel,
        out_shape=jax.ShapeDtypeStruct((B, H * W, Cout), jnp.float32),
        grid_spec=pltpu.PrefetchScalarGridSpec(
            num_scalar_prefetch=0,
            grid=(B,),
            in_specs=[
                pl.BlockSpec((1, H, W, C), lambda b: (b, 0, 0, 0)),
                pl.BlockSpec((9 * C, Cout), lambda b: (0, 0)),
                pl.BlockSpec((1, Cout), lambda b: (0, 0)),
                pl.BlockSpec((9 * Cout, Cout), lambda b: (0, 0)),
                pl.BlockSpec((1, Cout), lambda b: (0, 0)),
            ],
            out_specs=pl.BlockSpec((1, H * W, Cout), lambda b: (b, 0, 0)),
        ),
        compiler_params=pltpu.CompilerParams(
            dimension_semantics=("parallel",),
            vmem_limit_bytes=vmem_limit,
        ),
    )(x_nhwc, w1_flat, b1_row, w2_flat, b2_row)

    # (B, H*W, Cout) -> (B, H, W, Cout) is a free contiguous reshape; then one
    # transpose back to the module's NCHW contract.
    return jnp.transpose(out_flat.reshape(B, H, W, Cout), (0, 3, 1, 2))


def reference_forward(x_nchw, w1, b1, w2, b2):
    """Pure-JAX reference matching the PyTorch module semantics."""
    dn = jax.lax.conv_dimension_numbers(x_nchw.shape, w1.shape,
                                        ("NCHW", "HWIO", "NCHW"))
    h = jax.lax.conv_general_dilated(x_nchw, w1, (1, 1), "SAME",
                                     dimension_numbers=dn)
    h = jnp.maximum(h + b1.reshape(1, -1, 1, 1), 0.0)
    y = jax.lax.conv_general_dilated(h, w2, (1, 1), "SAME",
                                     dimension_numbers=dn)
    y = y + b2.reshape(1, -1, 1, 1)
    return jnp.maximum(x_nchw + y, 0.0)


if __name__ == "__main__":
    B, C, H, W = 2, 4, 16, 16
    key = jax.random.PRNGKey(0)
    kx, kw1, kb1, kw2, kb2 = jax.random.split(key, 5)

    x = jax.random.normal(kx, (B, C, H, W), dtype=jnp.float32)
    # Synthetic parameters, shapes matching nn.Conv2d(C, C, 3, padding=1),
    # stored in HWIO layout for the channels-last kernel.
    w1 = jax.random.normal(kw1, (3, 3, C, C), dtype=jnp.float32) * 0.1
    b1 = jax.random.normal(kb1, (C,), dtype=jnp.float32) * 0.1
    w2 = jax.random.normal(kw2, (3, 3, C, C), dtype=jnp.float32) * 0.1
    b2 = jax.random.normal(kb2, (C,), dtype=jnp.float32) * 0.1

    ref = jax.block_until_ready(reference_forward(x, w1, b1, w2, b2))

    # f32 MXU operands (exact path, v5e-safe).
    out_f32 = jax.block_until_ready(conv_residual_block(x, w1, b1, w2, b2))
    np.testing.assert_allclose(np.asarray(out_f32), np.asarray(ref),
                               rtol=2e-5, atol=2e-5)

    # bf16 MXU operands (v6e/v7x-preferred); accumulation + elementwise stay f32.
    out_bf16 = jax.block_until_ready(
        conv_residual_block(x, w1, b1, w2, b2, mxu_dtype=jnp.bfloat16))
    np.testing.assert_allclose(np.asarray(out_bf16), np.asarray(ref),
                               rtol=5e-2, atol=5e-2)

    print("KERNEL_OK")
</pallas_src>

<mosaic_0001>
module attributes {stable_mosaic.version = 11 : i64} {
  func.func @conv_residual_block_kernel(%arg0: i32, %arg1: memref<1x16x16x4xf32, #tpu.memory_space<vmem>>, %arg2: memref<36x4xf32, #tpu.memory_space<vmem>>, %arg3: memref<1x4xf32, #tpu.memory_space<vmem>>, %arg4: memref<36x4xf32, #tpu.memory_space<vmem>>, %arg5: memref<1x4xf32, #tpu.memory_space<vmem>>, %arg6: memref<1x256x4xf32, #tpu.memory_space<vmem>>) attributes {dimension_semantics = [#tpu.dimension_semantics<parallel>], iteration_bounds = array<i64: 2>, scalar_prefetch = 0 : i64, scratch_operands = 0 : i64, tpu.core_type = #tpu.core_type<tc>, window_params = [{transform_indices = @transform_0, window_bounds = array<i64: 1, 16, 16, 4>}, {pipeline_mode = #tpu.pipeline_mode<synchronous>, transform_indices = @transform_1, window_bounds = array<i64: 36, 4>}, {pipeline_mode = #tpu.pipeline_mode<synchronous>, transform_indices = @transform_2, window_bounds = array<i64: 1, 4>}, {pipeline_mode = #tpu.pipeline_mode<synchronous>, transform_indices = @transform_3, window_bounds = array<i64: 36, 4>}, {pipeline_mode = #tpu.pipeline_mode<synchronous>, transform_indices = @transform_4, window_bounds = array<i64: 1, 4>}, {transform_indices = @transform_5, window_bounds = array<i64: 1, 256, 4>}]} {
    %c0 = arith.constant 0 : index
    %c0_0 = arith.constant 0 : index
    %c0_1 = arith.constant 0 : index
    %c0_2 = arith.constant 0 : index
    %0 = vector.load %arg1[%c0, %c0_0, %c0_1, %c0_2] : memref<1x16x16x4xf32, #tpu.memory_space<vmem>>, vector<1x16x16x4xf32>
    %1 = vector.shape_cast %0 : vector<1x16x16x4xf32> to vector<16x16x4xf32>
    %cst = arith.constant 0.000000e+00 : f32
    %2 = vector.broadcast %cst : f32 to vector<16x1x4xf32>
    %3 = tpu.concatenate %2, %1, %2 in 1 : vector<16x1x4xf32>, vector<16x16x4xf32>, vector<16x1x4xf32> -> vector<16x18x4xf32>
    %cst_3 = arith.constant 0.000000e+00 : f32
    %4 = vector.broadcast %cst_3 : f32 to vector<1x18x4xf32>
    %5 = tpu.concatenate %4, %3, %4 in 0 : vector<1x18x4xf32>, vector<16x18x4xf32>, vector<1x18x4xf32> -> vector<18x18x4xf32>
    %6 = vector.extract_strided_slice %5 {offsets = [0, 0, 0], sizes = [16, 16, 4], strides = [1, 1, 1]} : vector<18x18x4xf32> to vector<16x16x4xf32>
    %7 = vector.shape_cast %6 : vector<16x16x4xf32> to vector<256x4xf32>
    %8 = vector.extract_strided_slice %5 {offsets = [0, 1, 0], sizes = [16, 16, 4], strides = [1, 1, 1]} : vector<18x18x4xf32> to vector<16x16x4xf32>
    %9 = vector.shape_cast %8 : vector<16x16x4xf32> to vector<256x4xf32>
    %10 = vector.extract_strided_slice %5 {offsets = [0, 2, 0], sizes = [16, 16, 4], strides = [1, 1, 1]} : vector<18x18x4xf32> to vector<16x16x4xf32>
    %11 = vector.shape_cast %10 : vector<16x16x4xf32> to vector<256x4xf32>
    %12 = vector.extract_strided_slice %5 {offsets = [1, 0, 0], sizes = [16, 16, 4], strides = [1, 1, 1]} : vector<18x18x4xf32> to vector<16x16x4xf32>
    %13 = vector.shape_cast %12 : vector<16x16x4xf32> to vector<256x4xf32>
    %14 = vector.extract_strided_slice %5 {offsets = [1, 1, 0], sizes = [16, 16, 4], strides = [1, 1, 1]} : vector<18x18x4xf32> to vector<16x16x4xf32>
    %15 = vector.shape_cast %14 : vector<16x16x4xf32> to vector<256x4xf32>
    %16 = vector.extract_strided_slice %5 {offsets = [1, 2, 0], sizes = [16, 16, 4], strides = [1, 1, 1]} : vector<18x18x4xf32> to vector<16x16x4xf32>
    %17 = vector.shape_cast %16 : vector<16x16x4xf32> to vector<256x4xf32>
    %18 = vector.extract_strided_slice %5 {offsets = [2, 0, 0], sizes = [16, 16, 4], strides = [1, 1, 1]} : vector<18x18x4xf32> to vector<16x16x4xf32>
    %19 = vector.shape_cast %18 : vector<16x16x4xf32> to vector<256x4xf32>
    %20 = vector.extract_strided_slice %5 {offsets = [2, 1, 0], sizes = [16, 16, 4], strides = [1, 1, 1]} : vector<18x18x4xf32> to vector<16x16x4xf32>
    %21 = vector.shape_cast %20 : vector<16x16x4xf32> to vector<256x4xf32>
    %22 = vector.extract_strided_slice %5 {offsets = [2, 2, 0], sizes = [16, 16, 4], strides = [1, 1, 1]} : vector<18x18x4xf32> to vector<16x16x4xf32>
    %23 = vector.shape_cast %22 : vector<16x16x4xf32> to vector<256x4xf32>
    %24 = tpu.concatenate %7, %9, %11, %13, %15, %17, %19, %21, %23 in 1 : vector<256x4xf32>, vector<256x4xf32>, vector<256x4xf32>, vector<256x4xf32>, vector<256x4xf32>, vector<256x4xf32>, vector<256x4xf32>, vector<256x4xf32>, vector<256x4xf32> -> vector<256x36xf32>
    %c0_4 = arith.constant 0 : index
    %c0_5 = arith.constant 0 : index
    %25 = vector.load %arg2[%c0_4, %c0_5] : memref<36x4xf32, #tpu.memory_space<vmem>>, vector<36x4xf32>
    %cst_6 = arith.constant dense<0.000000e+00> : vector<256x4xf32>
    %26 = tpu.matmul %24, %25, %cst_6 {dimension_numbers = #tpu.dot_dimension_numbers<[1], [0], [0], [1], [0, 0, 1, 1], [], []>} : vector<256x36xf32>, vector<36x4xf32>, vector<256x4xf32> -> vector<256x4xf32>
    %c0_7 = arith.constant 0 : index
    %c0_8 = arith.constant 0 : index
    %27 = vector.load %arg3[%c0_7, %c0_8] : memref<1x4xf32, #tpu.memory_space<vmem>>, vector<1x4xf32>
    %28 = vector.broadcast %27 : vector<1x4xf32> to vector<256x4xf32>
    %29 = arith.addf %26, %28 : vector<256x4xf32>
    %cst_9 = arith.constant 0.000000e+00 : f32
    %30 = vector.broadcast %cst_9 : f32 to vector<256x4xf32>
    %31 = arith.maximumf %29, %30 : vector<256x4xf32>
    %32 = vector.shape_cast %31 : vector<256x4xf32> to vector<16x16x4xf32>
    %cst_10 = arith.constant 0.000000e+00 : f32
    %33 = vector.broadcast %cst_10 : f32 to vector<16x1x4xf32>
    %34 = tpu.concatenate %33, %32, %33 in 1 : vector<16x1x4xf32>, vector<16x16x4xf32>, vector<16x1x4xf32> -> vector<16x18x4xf32>
    %cst_11 = arith.constant 0.000000e+00 : f32
    %35 = vector.broadcast %cst_11 : f32 to vector<1x18x4xf32>
    %36 = tpu.concatenate %35, %34, %35 in 0 : vector<1x18x4xf32>, vector<16x18x4xf32>, vector<1x18x4xf32> -> vector<18x18x4xf32>
    %37 = vector.extract_strided_slice %36 {offsets = [0, 0, 0], sizes = [16, 16, 4], strides = [1, 1, 1]} : vector<18x18x4xf32> to vector<16x16x4xf32>
    %38 = vector.shape_cast %37 : vector<16x16x4xf32> to vector<256x4xf32>
    %39 = vector.extract_strided_slice %36 {offsets = [0, 1, 0], sizes = [16, 16, 4], strides = [1, 1, 1]} : vector<18x18x4xf32> to vector<16x16x4xf32>
    %40 = vector.shape_cast %39 : vector<16x16x4xf32> to vector<256x4xf32>
    %41 = vector.extract_strided_slice %36 {offsets = [0, 2, 0], sizes = [16, 16, 4], strides = [1, 1, 1]} : vector<18x18x4xf32> to vector<16x16x4xf32>
    %42 = vector.shape_cast %41 : vector<16x16x4xf32> to vector<256x4xf32>
    %43 = vector.extract_strided_slice %36 {offsets = [1, 0, 0], sizes = [16, 16, 4], strides = [1, 1, 1]} : vector<18x18x4xf32> to vector<16x16x4xf32>
    %44 = vector.shape_cast %43 : vector<16x16x4xf32> to vector<256x4xf32>
    %45 = vector.extract_strided_slice %36 {offsets = [1, 1, 0], sizes = [16, 16, 4], strides = [1, 1, 1]} : vector<18x18x4xf32> to vector<16x16x4xf32>
    %46 = vector.shape_cast %45 : vector<16x16x4xf32> to vector<256x4xf32>
    %47 = vector.extract_strided_slice %36 {offsets = [1, 2, 0], sizes = [16, 16, 4], strides = [1, 1, 1]} : vector<18x18x4xf32> to vector<16x16x4xf32>
    %48 = vector.shape_cast %47 : vector<16x16x4xf32> to vector<256x4xf32>
    %49 = vector.extract_strided_slice %36 {offsets = [2, 0, 0], sizes = [16, 16, 4], strides = [1, 1, 1]} : vector<18x18x4xf32> to vector<16x16x4xf32>
    %50 = vector.shape_cast %49 : vector<16x16x4xf32> to vector<256x4xf32>
    %51 = vector.extract_strided_slice %36 {offsets = [2, 1, 0], sizes = [16, 16, 4], strides = [1, 1, 1]} : vector<18x18x4xf32> to vector<16x16x4xf32>
    %52 = vector.shape_cast %51 : vector<16x16x4xf32> to vector<256x4xf32>
    %53 = vector.extract_strided_slice %36 {offsets = [2, 2, 0], sizes = [16, 16, 4], strides = [1, 1, 1]} : vector<18x18x4xf32> to vector<16x16x4xf32>
    %54 = vector.shape_cast %53 : vector<16x16x4xf32> to vector<256x4xf32>
    %55 = tpu.concatenate %38, %40, %42, %44, %46, %48, %50, %52, %54 in 1 : vector<256x4xf32>, vector<256x4xf32>, vector<256x4xf32>, vector<256x4xf32>, vector<256x4xf32>, vector<256x4xf32>, vector<256x4xf32>, vector<256x4xf32>, vector<256x4xf32> -> vector<256x36xf32>
    %c0_12 = arith.constant 0 : index
    %c0_13 = arith.constant 0 : index
    %56 = vector.load %arg4[%c0_12, %c0_13] : memref<36x4xf32, #tpu.memory_space<vmem>>, vector<36x4xf32>
    %cst_14 = arith.constant dense<0.000000e+00> : vector<256x4xf32>
    %57 = tpu.matmul %55, %56, %cst_14 {dimension_numbers = #tpu.dot_dimension_numbers<[1], [0], [0], [1], [0, 0, 1, 1], [], []>} : vector<256x36xf32>, vector<36x4xf32>, vector<256x4xf32> -> vector<256x4xf32>
    %c0_15 = arith.constant 0 : index
    %c0_16 = arith.constant 0 : index
    %58 = vector.load %arg5[%c0_15, %c0_16] : memref<1x4xf32, #tpu.memory_space<vmem>>, vector<1x4xf32>
    %59 = vector.broadcast %58 : vector<1x4xf32> to vector<256x4xf32>
    %60 = arith.addf %57, %59 : vector<256x4xf32>
    %61 = vector.shape_cast %1 : vector<16x16x4xf32> to vector<256x4xf32>
    %62 = arith.addf %60, %61 : vector<256x4xf32>
    %cst_17 = arith.constant 0.000000e+00 : f32
    %63 = vector.broadcast %cst_17 : f32 to vector<256x4xf32>
    %64 = arith.maximumf %62, %63 : vector<256x4xf32>
    %c0_18 = arith.constant 0 : index
    %c0_19 = arith.constant 0 : index
    %c0_20 = arith.constant 0 : index
    %65 = vector.load %arg6[%c0_18, %c0_19, %c0_20] : memref<1x256x4xf32, #tpu.memory_space<vmem>>, vector<1x256x4xf32>
    %66 = vector.shape_cast %65 : vector<1x256x4xf32> to vector<256x4xf32>
    %67 = vector.shape_cast %64 : vector<256x4xf32> to vector<1x256x4xf32>
    tpu.vector_store %arg6[%c0_18, %c0_19, %c0_20], %67 {strides = array<i32>} : memref<1x256x4xf32, #tpu.memory_space<vmem>>, vector<1x256x4xf32>,
    return
  }
  func.func @transform_0(%arg0: i32) -> (i32, i32, i32, i32) {
    %c0_i32 = arith.constant 0 : i32
    %c0_i32_0 = arith.constant 0 : i32
    %c0_i32_1 = arith.constant 0 : i32
    %c0_i32_2 = arith.constant 0 : i32
    return %arg0, %c0_i32, %c0_i32_0, %c0_i32_1 : i32, i32, i32, i32
  }
  func.func @transform_1(%arg0: i32) -> (i32, i32) {
    %c0_i32 = arith.constant 0 : i32
    %c0_i32_0 = arith.constant 0 : i32
    %c0_i32_1 = arith.constant 0 : i32
    return %c0_i32, %c0_i32_0 : i32, i32
  }
  func.func @transform_2(%arg0: i32) -> (i32, i32) {
    %c0_i32 = arith.constant 0 : i32
    %c0_i32_0 = arith.constant 0 : i32
    %c0_i32_1 = arith.constant 0 : i32
    return %c0_i32, %c0_i32_0 : i32, i32
  }
  func.func @transform_3(%arg0: i32) -> (i32, i32) {
    %c0_i32 = arith.constant 0 : i32
    %c0_i32_0 = arith.constant 0 : i32
    %c0_i32_1 = arith.constant 0 : i32
    return %c0_i32, %c0_i32_0 : i32, i32
  }
  func.func @transform_4(%arg0: i32) -> (i32, i32) {
    %c0_i32 = arith.constant 0 : i32
    %c0_i32_0 = arith.constant 0 : i32
    %c0_i32_1 = arith.constant 0 : i32
    return %c0_i32, %c0_i32_0 : i32, i32
  }
  func.func @transform_5(%arg0: i32) -> (i32, i32, i32) {
    %c0_i32 = arith.constant 0 : i32
    %c0_i32_0 = arith.constant 0 : i32
    %c0_i32_1 = arith.constant 0 : i32
    return %arg0, %c0_i32, %c0_i32_0 : i32, i32, i32
  }
}

</mosaic_0001>

<bundles_post_ra>
// kernel: tpu_custom_call.1
= control target key start
LH: loop header
LB: loop body
LE: loop exit
PB: predicated region body
PF: predicated region fallthrough
CT: control target
= control target key end

     0   :  { %s3786_s18 = smov 0   ;;  %s7720_s0 = inlined_call_operand.vmem [shape: f32[2,16,16,4], index: 0, kind: input, shape index: {}]   ;;  %s7721_s1 = inlined_call_operand.vmem [shape: f32[36,4], index: 1, kind: input, shape index: {}]   ;;  %s7722_s2 = inlined_call_operand.vmem [shape: f32[1,4], index: 2, kind: input, shape index: {}]   ;;  %s7723_s3 = inlined_call_operand.vmem [shape: f32[36,4], index: 3, kind: input, shape index: {}]   ;;  %s7724_s4 = inlined_call_operand.vmem [shape: f32[1,4], index: 4, kind: input, shape index: {}]   ;;  %s7725_s5 = inlined_call_operand.vmem [shape: f32[2,256,4], index: 5, kind: output, shape index: {}]  }
   0x1 LB: > { %s3599_s19 = sadd.s32 4294967295, %s3745_s18   ;;  %p3603_p0 = scmp.ge.s32.totalorder %s3745_s18, 1  ;;  %s3745_s18 = sphi %s3786_s18, %s15_s18  }
   0x2   : > { %p187_p1 = scmp.lt.s32.totalorder %s3745_s18, 3 }
   0x4   : > { %p188_p2 = pnand %p3603_p0, %p187_p1 }
   0x6   : > { %191 = sbr.rel (%p188_p2) target bundleno = 1845 (0x735), region = 40 }
   0xb   : > { %p215_p3 = scmp.lt.s32.totalorder %s3599_s19, 1  ;;  %v7726_v0 = vmov 0.0   ;;  %s3748_s20 = smov 4   ;;  %vm289_vm0 = vcmask 1040384   ;;  %vm448_vm1 = vcmask 1046528   ;;  %vm526_vm2 = vcmask 1045504  }
   0xc   : > { %v3795_v1 = vrot.slane %v7726_v0, 1  ;;  %s3749_s25 = smov 8   ;;  %s3750_s26 = smov 12   ;;  %vm1737_vm3 = vcmask 1043456   ;;  %vm1369_vm4 = vcmask 31744   ;;  %vm1433_vm5 = vcmask 97280  }
   0xd   : > { %s8827_s19 = smov (!%p215_p3, %s3599_s19), 1  ;;  %s3751_s27 = smov 16   ;;  %vm1401_vm6 = vcmask 64512   ;;  %vm1466_vm7 = vcmask 130048   ;;  %vm1532_vm8 = vcmask 195584   ;;  %vm1499_vm9 = vcmask 162816  }
   0xe   : > { %7954 = vst [vmem:[#allocation2_spill] sm:$0xff] %v3795_v1  ;;  %616 = vrot.lane.b32.xlu0 %v3795_v1, %s3748_s20  ;;  %s3676_s21 = sshll.u32 %s8827_s19, 8  ;;  %s3752_s28 = smov 20   ;;  %vm1565_vm10 = vcmask 228352   ;;  %vm1640_vm11 = vcmask 293888   ;;  %vm1598_vm12 = vcmask 261120  }
   0xf   : > { %s3807_s24 = scalar_lea.vmem %s7720_s0, %s3676_s21  ;;  %s3753_s29 = smov 24  }
  0x10   : > { %v227_v2 = vld [vmem:[%s3807_s24 + $0x10] sm:$0xff]  ;;  %v228_v3 = vld [vmem:[%s3807_s24 + $0x18] sm:$0xff]  ;;  %v225_v4 = vld [vmem:[%s3807_s24] sm:$0xff]  ;;  %s3754_s30 = smov 28   ;;  %s3755_s6 = smov 32  }
  0x11   : > { %v293_v5 = vrot.slane %v227_v2, 7  ;;  %v294_v6 = vrot.slane %v228_v3, 7  ;;  %v226_v7 = vld [vmem:[%s3807_s24 + $0x8] sm:$0xff]  ;;  %v290_v8 = vrot.slane %v225_v4, 7  ;;  %v229_v9 = vld [vmem:[%s3807_s24 + $0x20] sm:$0xff]  ;;  %v231_v28 = vld [vmem:[%s3807_s24 + $0x30] sm:$0xff] }
  0x12   : > { %v230_v10 = vld [vmem:[%s3807_s24 + $0x28] sm:$0xff]  ;;  %v291_v11 = vrot.slane %v226_v7, 7  ;;  %v296_v12 = vrot.slane %v229_v9, 7  ;;  %v232_v29 = vld [vmem:[%s3807_s24 + $0x38] sm:$0xff]  ;;  %v233_v33 = vld [vmem:[%s3807_s24 + $0x40] sm:$0xff]  ;;  %v299_v39 = vrot.slane %v231_v28, 7 }
  0x13   : > { %v297_v13 = vrot.slane %v230_v10, 7  ;;  %v3816_v14 = vsel %vm289_vm0, %v293_v5, %v294_v6  ;;  %v3819_v15 = vsel %vm289_vm0, %v294_v6, 0.0  ;;  %v3822_v16 = vsel %vm289_vm0, 0.0, %v290_v8  ;;  %v234_v34 = vld [vmem:[%s3807_s24 + $0x48] sm:$0xff]  ;;  %v235_v48 = vld [vmem:[%s3807_s24 + $0x50] sm:$0xff]  ;;  %v236_v52 = vld [vmem:[%s3807_s24 + $0x58] sm:$0xff] }
  0x14   : > { %7955 = vst [vmem:[#allocation3_spill] sm:$0xff] %v3822_v16  ;;  %v457_v17 = vrot.slane %v3816_v14, 1  ;;  %v459_v18 = vrot.slane %v3819_v15, 1  ;;  %v3827_v19 = vsel %vm289_vm0, %v290_v8, %v291_v11  ;;  %v3830_v20 = vsel %vm289_vm0, %v291_v11, 0.0  ;;  %v237_v3 = vld [vmem:[%s3807_s24 + $0x60] sm:$0xff]  ;;  %v238_v6 = vld [vmem:[%s3807_s24 + $0x68] sm:$0xff] }
  0x15   : > { %7956 = vst [vmem:[#allocation4_spill] sm:$0xff] %v3827_v19  ;;  %v452_v21 = vrot.slane %v3827_v19, 1  ;;  %v454_v22 = vrot.slane %v3830_v20, 1  ;;  %v451_v23 = vrot.slane %v3822_v16, 1  ;;  %v3836_v24 = vsel %vm289_vm0, %v296_v12, %v297_v13  ;;  %v239_v7 = vld [vmem:[%s3807_s24 + $0x70] sm:$0xff]  ;;  %v240_v8 = vld [vmem:[%s3807_s24 + $0x78] sm:$0xff] }
  0x16   : > { %v3839_v25 = vsel %vm448_vm1, %v457_v17, %v459_v18  ;;  %v3842_v26 = vsel %vm289_vm0, 0.0, %v296_v12  ;;  %v3845_v27 = vsel %vm289_vm0, 0.0, %v293_v5  ;;  %v3858_v32 = vsel %vm289_vm0, %v297_v13, 0.0 }
  0x17   : > { %624 = vrot.lane.b32.xlu2 %v3839_v25, %s3748_s20  ;;  %v3852_v30 = vsel %vm448_vm1, %v452_v21, %v454_v22  ;;  %v3855_v31 = vsel %vm448_vm1, %v451_v23, %v452_v21  ;;  %v461_v35 = vrot.slane %v3842_v26, 1  ;;  %v462_v36 = vrot.slane %v3836_v24, 1 }
  0x18   : > { %620 = vrot.lane.b32.xlu1 %v3852_v30, %s3748_s20  ;;  %618 = vrot.lane.b32.xlu0 %v3855_v31, %s3748_s20  ;;  %v456_v37 = vrot.slane %v3845_v27, 1  ;;  %v464_v38 = vrot.slane %v3858_v32, 1  ;;  %v300_v40 = vrot.slane %v232_v29, 7  ;;  %v302_v41 = vrot.slane %v233_v33, 7 }
  0x19   : > { %v303_v42 = vrot.slane %v234_v34, 7  ;;  %v3871_v43 = vsel %vm448_vm1, %v461_v35, %v462_v36  ;;  %v3887_v49 = vsel %vm289_vm0, 0.0, %v299_v39  ;;  %v305_v55 = vrot.slane %v235_v48, 7 }
  0x1a   : > { %v3874_v44 = vsel %vm448_vm1, %v456_v37, %v457_v17  ;;  %v3877_v45 = vsel %vm448_vm1, %v462_v36, %v464_v38  ;;  %v3880_v46 = vsel %vm289_vm0, %v299_v39, %v300_v40  ;;  %v3883_v47 = vsel %vm289_vm0, %v300_v40, 0.0  ;;  %v241_v37 = vld [vmem:[%s3807_s24 + $0x80] sm:$0xff]  ;;  %v242_v38 = vld [vmem:[%s3807_s24 + $0x88] sm:$0xff] }
  0x1b   : > { %7957 = vst [vmem:[#allocation5_spill] sm:$0xff] %v3880_v46  ;;  %v3890_v50 = vsel %vm289_vm0, %v302_v41, %v303_v42  ;;  %v3893_v51 = vsel %vm289_vm0, 0.0, %v302_v41  ;;  %v467_v53 = vrot.slane %v3880_v46, 1  ;;  %v469_v54 = vrot.slane %v3883_v47, 1 }
  0x1c   : > { %7958 = vst [vmem:[#allocation6_spill] sm:$0xff] %v3890_v50  ;;  %v466_v56 = vrot.slane %v3887_v49, 1  ;;  %v471_v57 = vrot.slane %v3893_v51, 1  ;;  %v472_v58 = vrot.slane %v3890_v50, 1  ;;  %v306_v59 = vrot.slane %v236_v52, 7 }
  0x1d   : > { %7959 = vst [vmem:[#allocation7_spill] sm:$0xff] %v3893_v51  ;;  %v3908_v60 = vsel %vm448_vm1, %v467_v53, %v469_v54  ;;  %v3920_v2 = vsel %vm289_vm0, 0.0, %v305_v55  ;;  %v3924_v4 = vsel %vm289_vm0, %v303_v42, 0.0  ;;  %v308_v11 = vrot.slane %v237_v3, 7 }
  0x1e   : > { %v3911_v61 = vsel %vm448_vm1, %v466_v56, %v467_v53  ;;  %v3914_v62 = vsel %vm448_vm1, %v471_v57, %v472_v58  ;;  %v3917_v63 = vsel %vm289_vm0, %v305_v55, %v306_v59  ;;  %7963 = vst [vmem:[#allocation11_spill] sm:$0xff] %v3920_v2  ;;  %v3927_v5 = vsel %vm289_vm0, %v306_v59, 0.0 }
  0x1f   : > { %626 = vrot.lane.b32.xlu2 %v3871_v43, %s3748_s20  ;;  %7960 = vst [vmem:[#allocation8_spill] sm:$0xff] %v3911_v61  ;;  %v476_v9 = vrot.slane %v3920_v2, 1  ;;  %v477_v10 = vrot.slane %v3917_v63, 1  ;;  %v474_v12 = vrot.slane %v3924_v4, 1  ;;  %v479_v13 = vrot.slane %v3927_v5, 1 }
  0x20   : > { %622 = vrot.lane.b32.xlu1 %v3874_v44, %s3748_s20  ;;  %628 = vrot.lane.b32.xlu0 %v3877_v45, %s3748_s20  ;;  %7961 = vst [vmem:[#allocation9_spill] sm:$0xff] %v3914_v62  ;;  %v309_v17 = vrot.slane %v238_v6, 7  ;;  %v311_v18 = vrot.slane %v239_v7, 7  ;;  %v312_v21 = vrot.slane %v240_v8, 7  ;;  %v3946_v23 = vsel %vm289_vm0, 0.0, %v308_v11  ;;  %v243_v6 = vld [vmem:[%s3807_s24 + $0x90] sm:$0xff] }
  0x21   : > { %7962 = vst [vmem:[#allocation10_spill] sm:$0xff] %v3917_v63  ;;  %v3943_v22 = vsel %vm448_vm1, %v476_v9, %v477_v10  ;;  %v3949_v28 = vsel %vm448_vm1, %v472_v58, %v474_v12  ;;  %v3952_v29 = vsel %vm448_vm1, %v477_v10, %v479_v13  ;;  %v481_v41 = vrot.slane %v3946_v23, 1  ;;  %v244_v7 = vld [vmem:[%s3807_s24 + $0x98] sm:$0xff]  ;;  %v245_v8 = vld [vmem:[%s3807_s24 + $0xa0] sm:$0xff]  ;;  %v246_v9 = vld [vmem:[%s3807_s24 + $0xa8] sm:$0xff] }
  0x22   : > { %7964 = vst [vmem:[#allocation12_spill] sm:$0xff] %v3943_v22  ;;  %v3955_v33 = vsel %vm289_vm0, %v308_v11, %v309_v17  ;;  %v3958_v34 = vsel %vm289_vm0, %v309_v17, 0.0  ;;  %v3961_v35 = vsel %vm289_vm0, %v311_v18, %v312_v21  ;;  %v3964_v36 = vsel %vm289_vm0, 0.0, %v311_v18 }
  0x23   : > { %7965 = vst [vmem:[#allocation13_spill] sm:$0xff] %v3946_v23  ;;  %v482_v39 = vrot.slane %v3955_v33, 1  ;;  %v484_v40 = vrot.slane %v3958_v34, 1  ;;  %v486_v42 = vrot.slane %v3964_v36, 1  ;;  %v487_v48 = vrot.slane %v3961_v35, 1 }
  0x24   : > { %7966 = vst [vmem:[#allocation14_spill] sm:$0xff] %v3949_v28  ;;  %v314_v52 = vrot.slane %v241_v37, 7  ;;  %v315_v53 = vrot.slane %v242_v38, 7  ;;  %v3983_v55 = vsel %vm289_vm0, %v312_v21, 0.0  ;;  %v317_v17 = vrot.slane %v243_v6, 7 }
  0x25   : > { %7967 = vst [vmem:[#allocation15_spill] sm:$0xff] %v3952_v29  ;;  %v3980_v54 = vsel %vm448_vm1, %v482_v39, %v484_v40  ;;  %v3986_v56 = vsel %vm448_vm1, %v481_v41, %v482_v39  ;;  %v3989_v57 = vsel %vm448_vm1, %v486_v42, %v487_v48  ;;  %v489_v12 = vrot.slane %v3983_v55, 1 }
  0x26   : > { %7968 = vst [vmem:[#allocation16_spill] sm:$0xff] %v3955_v33  ;;  %v3992_v58 = vsel %vm289_vm0, %v314_v52, %v315_v53  ;;  %v3995_v59 = vsel %vm289_vm0, 0.0, %v314_v52  ;;  %v3998_v3 = vsel %vm289_vm0, %v315_v53, 0.0  ;;  %v318_v18 = vrot.slane %v244_v7, 7  ;;  %v248_v7 = vld [vmem:[%s3807_s24 + $0xb8] sm:$0xff] }
  0x27   : > { %632 = vrot.lane.b32.xlu2 %v3908_v60, %s3748_s20  ;;  %7969 = vst [vmem:[#allocation17_spill] sm:$0xff] %v3980_v54  ;;  %v491_v10 = vrot.slane %v3995_v59, 1  ;;  %v492_v11 = vrot.slane %v3992_v58, 1  ;;  %v494_v13 = vrot.slane %v3998_v3, 1  ;;  %v320_v21 = vrot.slane %v245_v8, 7 }
  0x28   : > { %630 = vrot.lane.b32.xlu1 %v3911_v61, %s3748_s20  ;;  %634 = vrot.lane.b32.xlu0 %v3914_v62, %s3748_s20  ;;  %7970 = vst [vmem:[#allocation18_spill] sm:$0xff] %v3986_v56  ;;  %v321_v37 = vrot.slane %v246_v9, 7  ;;  %v4018_v39 = vsel %vm448_vm1, %v487_v48, %v489_v12  ;;  %v4024_v41 = vsel %vm289_vm0, %v317_v17, %v318_v18  ;;  %v4027_v42 = vsel %vm289_vm0, %v318_v18, 0.0  ;;  %v247_v48 = vld [vmem:[%s3807_s24 + $0xb0] sm:$0xff] }
  0x29   : > { %7971 = vst [vmem:[#allocation19_spill] sm:$0xff] %v3989_v57  ;;  %v4015_v38 = vsel %vm448_vm1, %v491_v10, %v492_v11  ;;  %v4021_v40 = vsel %vm448_vm1, %v492_v11, %v494_v13  ;;  %v4030_v52 = vsel %vm289_vm0, 0.0, %v317_v17  ;;  %v4036_v6 = vsel %vm289_vm0, 0.0, %v320_v21 }
  0x2a   : > { %7972 = vst [vmem:[#allocation20_spill] sm:$0xff] %v4015_v38  ;;  %v4033_v53 = vsel %vm289_vm0, %v320_v21, %v321_v37  ;;  %v497_v8 = vrot.slane %v4024_v41, 1  ;;  %v499_v9 = vrot.slane %v4027_v42, 1  ;;  %v496_v10 = vrot.slane %v4030_v52, 1 }
  0x2b   : > { %7973 = vst [vmem:[#allocation21_spill] sm:$0xff] %v4018_v39  ;;  %v501_v11 = vrot.slane %v4036_v6, 1  ;;  %v502_v12 = vrot.slane %v4033_v53, 1  ;;  %v323_v13 = vrot.slane %v247_v48, 7  ;;  %v324_v17 = vrot.slane %v248_v7, 7  ;;  %v249_v7 = vld [vmem:[%s3807_s24 + $0xc0] sm:$0xff] }
  0x2c   : > { %7974 = vst [vmem:[#allocation22_spill] sm:$0xff] %v4021_v40  ;;  %v4052_v18 = vsel %vm448_vm1, %v497_v8, %v499_v9  ;;  %v4055_v21 = vsel %vm448_vm1, %v496_v10, %v497_v8  ;;  %v250_v9 = vld [vmem:[%s3807_s24 + $0xc8] sm:$0xff]  ;;  %v251_v8 = vld [vmem:[%s3807_s24 + $0xd0] sm:$0xff]  ;;  %v252_v10 = vld [vmem:[%s3807_s24 + $0xd8] sm:$0xff] }
  0x2d   : > { %7975 = vst [vmem:[#allocation23_spill] sm:$0xff] %v4024_v41  ;;  %v4058_v0 = vsel %vm448_vm1, %v501_v11, %v502_v12  ;;  %v4061_v1 = vsel %vm289_vm0, %v323_v13, %v324_v17  ;;  %v4070_v48 = vsel %vm289_vm0, %v324_v17, 0.0 }
  0x2e   : > { %7976 = vst [vmem:[#allocation24_spill] sm:$0xff] %v4033_v53  ;;  %v509_v17 = vrot.slane %v4070_v48, 1 }
  0x2f   : > { %638 = vrot.lane.b32.xlu2 %v3943_v22, %s3748_s20  ;;  %7977 = vst [vmem:[#allocation25_spill] sm:$0xff] %v4036_v6 }
  0x30   : > { %636 = vrot.lane.b32.xlu1 %v3949_v28, %s3748_s20  ;;  %640 = vrot.lane.b32.xlu0 %v3952_v29, %s3748_s20  ;;  %7978 = vst [vmem:[#allocation26_spill] sm:$0xff] %v4052_v18 }
  0x31   : > { %7979 = vst [vmem:[#allocation27_spill] sm:$0xff] %v4055_v21 }
  0x32   : > { %7980 = vst [vmem:[#allocation28_spill] sm:$0xff] %v4058_v0 }
  0x33   : > { %7981 = vst [vmem:[#allocation29_spill] sm:$0xff] %v4061_v1 }
  0x37   : > { %644 = vrot.lane.b32.xlu2 %v3980_v54, %s3748_s20 }
  0x38   : > { %642 = vrot.lane.b32.xlu1 %v3986_v56, %s3748_s20  ;;  %646 = vrot.lane.b32.xlu0 %v3989_v57, %s3748_s20  ;;  %v329_v57 = vrot.slane %v251_v8, 7  ;;  %v330_v56 = vrot.slane %v252_v10, 7  ;;  %v254_v10 = vld [vmem:[%s3807_s24 + $0xe8] sm:$0xff] }
  0x3a   : > { %v4108_v8 = vsel %vm289_vm0, 0.0, %v329_v57  ;;  %v4139_v61 = vsel %vm289_vm0, %v330_v56, 0.0 }
  0x3b   : > { %7989 = vst [vmem:[#allocation37_spill] sm:$0xff] %v4108_v8 }
  0x3f   : > { %650 = vrot.lane.b32.xlu2 %v4015_v38, %s3748_s20  ;;  %v326_v38 = vrot.slane %v249_v7, 7 }
  0x40   : > { %648 = vrot.lane.b32.xlu1 %v4018_v39, %s3748_s20  ;;  %652 = vrot.lane.b32.xlu0 %v4021_v40, %s3748_s20  ;;  %v4064_v40 = vsel %vm289_vm0, 0.0, %v323_v13  ;;  %v4067_v39 = vsel %vm289_vm0, %v321_v37, 0.0  ;;  %v507_v37 = vrot.slane %v4061_v1, 1 }
  0x41   : > { %7982 = vst [vmem:[#allocation30_spill] sm:$0xff] %v4064_v40  ;;  %v506_v11 = vrot.slane %v4064_v40, 1  ;;  %v504_v13 = vrot.slane %v4067_v39, 1  ;;  %v4102_v7 = vsel %vm289_vm0, 0.0, %v326_v38 }
  0x42   : > { %7987 = vst [vmem:[#allocation35_spill] sm:$0xff] %v4102_v7 }
  0x43   : > { %v4087_v54 = vsel %vm448_vm1, %v506_v11, %v507_v37  ;;  %v511_v11 = vrot.slane %v4102_v7, 1 }
  0x44   : > { %7983 = vst [vmem:[#allocation31_spill] sm:$0xff] %v4087_v54 }
  0x47   : > { %656 = vrot.lane.b32.xlu2 %v4052_v18, %s3748_s20  ;;  %v327_v18 = vrot.slane %v250_v9, 7  ;;  %v4105_v9 = vsel %vm289_vm0, %v329_v57, %v330_v56  ;;  %v516_v57 = vrot.slane %v4108_v8, 1 }
  0x48   : > { %654 = vrot.lane.b32.xlu1 %v4055_v21, %s3748_s20  ;;  %658 = vrot.lane.b32.xlu0 %v4058_v0, %s3748_s20  ;;  %v4090_v21 = vsel %vm448_vm1, %v502_v12, %v504_v13  ;;  %v4093_v0 = vsel %vm448_vm1, %v507_v37, %v509_v17  ;;  %7988 = vst [vmem:[#allocation36_spill] sm:$0xff] %v4105_v9  ;;  %v253_v12 = vld [vmem:[%s3807_s24 + $0xe0] sm:$0xff]  ;;  %v517_v37 = vrot.slane %v4105_v9, 1  ;;  %v333_v17 = vrot.slane %v254_v10, 7 }
  0x49   : > { %7984 = vst [vmem:[#allocation32_spill] sm:$0xff] %v4090_v21  ;;  %v4096_v29 = vsel %vm289_vm0, %v326_v38, %v327_v18  ;;  %v4099_v28 = vsel %vm289_vm0, %v327_v18, 0.0  ;;  %v332_v13 = vrot.slane %v253_v12, 7 }
  0x4a   : > { %7985 = vst [vmem:[#allocation33_spill] sm:$0xff] %v4093_v0  ;;  %v512_v38 = vrot.slane %v4096_v29, 1  ;;  %v514_v18 = vrot.slane %v4099_v28, 1  ;;  %v4142_v12 = vsel %vm289_vm0, %v333_v17, 0.0 }
  0x4b   : > { %7986 = vst [vmem:[#allocation34_spill] sm:$0xff] %v4096_v29  ;;  %v4133_v22 = vsel %vm289_vm0, %v332_v13, %v333_v17  ;;  %v4136_v62 = vsel %vm289_vm0, 0.0, %v332_v13  ;;  %v524_v56 = vrot.slane %v4142_v12, 1  ;;  %v529_v17 = vrot.slane %v3822_v16, 2 }
  0x4c   : > { %7992 = vst [vmem:[#allocation40_spill] sm:$0xff] %v4133_v22  ;;  %v521_v10 = vrot.slane %v4136_v62, 1 }
  0x4d   : > { %7993 = vst [vmem:[#allocation41_spill] sm:$0xff] %v4136_v62 }
  0x4f   : > { %662 = vrot.lane.b32.xlu2 %v4087_v54, %s3748_s20  ;;  %v4124_v54 = vsel %vm448_vm1, %v512_v38, %v514_v18  ;;  %v519_v18 = vrot.slane %v4139_v61, 1 }
  0x50   : > { %660 = vrot.lane.b32.xlu1 %v4090_v21, %s3748_s20  ;;  %664 = vrot.lane.b32.xlu0 %v4093_v0, %s3748_s20  ;;  %v4127_v21 = vsel %vm448_vm1, %v511_v11, %v512_v38  ;;  %v4130_v0 = vsel %vm448_vm1, %v516_v57, %v517_v37  ;;  %v522_v38 = vrot.slane %v4133_v22, 1 }
  0x51   : > { %7990 = vst [vmem:[#allocation38_spill] sm:$0xff] %v4127_v21  ;;  %v4158_v57 = vsel %vm448_vm1, %v517_v37, %v519_v18  ;;  %v532_v37 = vrot.slane %v3830_v20, 2  ;;  %v535_v20 = vrot.slane %v3816_v14, 2 }
  0x52   : > { %7991 = vst [vmem:[#allocation39_spill] sm:$0xff] %v4130_v0  ;;  %v4155_v11 = vsel %vm448_vm1, %v521_v10, %v522_v38  ;;  %v4161_v13 = vsel %vm448_vm1, %v522_v38, %v524_v56  ;;  %v530_v10 = vrot.slane %v3827_v19, 2  ;;  %v7998_v38 = vmov 0.0  }
  0x53   : > { %7994 = vst [vmem:[#allocation42_spill] sm:$0xff] %v4155_v11  ;;  %v4176_v56 = vrot.slane %v7998_v38, 2  ;;  %v534_v38 = vrot.slane %v3845_v27, 2 }
  0x54   : > { %7995 = vst [vmem:[#allocation43_spill] sm:$0xff] %v4158_v57  ;;  %v4173_v18 = vsel %vm526_vm2, %v529_v17, %v530_v10  ;;  %v537_v17 = vrot.slane %v3819_v15, 2  ;;  %v544_v15 = vrot.slane %v3887_v49, 2 }
  0x55   : > { %7996 = vst [vmem:[#allocation44_spill] sm:$0xff] %v4161_v13 }
  0x56   : > { %7997 = vst [vmem:[#allocation45_spill] sm:$0xff] %v4173_v18 }
  0x57   : > { %668 = vrot.lane.b32.xlu2 %v4124_v54, %s3748_s20  ;;  %7999 = vst [vmem:[#allocation46_spill] sm:$0xff] %v4176_v56 }
  0x58   : > { %666 = vrot.lane.b32.xlu1 %v4127_v21, %s3748_s20  ;;  %670 = vrot.lane.b32.xlu0 %v4130_v0, %s3748_s20 }
  0x5f   : > { %674 = vrot.lane.b32.xlu2 %v4155_v11, %s3748_s20  ;;  %v4179_v11 = vsel %vm526_vm2, %v530_v10, %v532_v37  ;;  %v540_v10 = vrot.slane %v3836_v24, 2  ;;  %v4193_v37 = vsel %vm526_vm2, %v535_v20, %v537_v17  ;;  %v545_v17 = vrot.slane %v3880_v46, 2 }
  0x60   : > { %672 = vrot.lane.b32.xlu1 %v4158_v57, %s3748_s20  ;;  %676 = vrot.lane.b32.xlu0 %v4161_v13, %s3748_s20  ;;  %8000 = vst [vmem:[#allocation47_spill] sm:$0xff] %v4179_v11  ;;  %v539_v13 = vrot.slane %v3842_v26, 2 }
  0x61   : > { %8001 = vst [vmem:[#allocation48_spill] sm:$0xff] %v4193_v37 }
  0x67   : > { %711 = vrot.lane.b32.xlu2 %v4173_v18, %s3749_s25  ;;  %v4196_v18 = vsel %vm526_vm2, %v534_v38, %v535_v20  ;;  %v542_v38 = vrot.slane %v3858_v32, 2  ;;  %v4214_v20 = vsel %vm526_vm2, %v544_v15, %v545_v17  ;;  %v550_v32 = vrot.slane %v3890_v50, 2 }
  0x68   : > { %709 = vrot.lane.b32.xlu1 %v4176_v56, %s3749_s25  ;;  %713 = vrot.lane.b32.xlu0 %v4179_v11, %s3749_s25  ;;  %8002 = vst [vmem:[#allocation49_spill] sm:$0xff] %v4196_v18  ;;  %v4199_v56 = vsel %vm526_vm2, %v539_v13, %v540_v10  ;;  %v547_v13 = vrot.slane %v3883_v47, 2  ;;  %v552_v47 = vrot.slane %v3924_v4, 2 }
  0x69   : > { %8004 = vst [vmem:[#allocation51_spill] sm:$0xff] %v4214_v20 }
  0x6f   : > { %717 = vrot.lane.b32.xlu2 %v4193_v37, %s3749_s25  ;;  %v4217_v37 = vsel %vm526_vm2, %v540_v10, %v542_v38  ;;  %v549_v10 = vrot.slane %v3893_v51, 2  ;;  %v555_v38 = vrot.slane %v3917_v63, 2 }
  0x70   : > { %715 = vrot.lane.b32.xlu1 %v4196_v18, %s3749_s25  ;;  %719 = vrot.lane.b32.xlu0 %v4199_v56, %s3749_s25  ;;  %8005 = vst [vmem:[#allocation52_spill] sm:$0xff] %v4217_v37  ;;  %v4220_v18 = vsel %vm526_vm2, %v545_v17, %v547_v13  ;;  %v554_v17 = vrot.slane %v3920_v2, 2  ;;  %v4236_v13 = vsel %vm526_vm2, %v550_v32, %v552_v47  ;;  %v559_v47 = vrot.slane %v3946_v23, 2 }
  0x71   : > { %v4209_v11 = vpop.permute.xlu2 %624  ;;  %8006 = vst [vmem:[#allocation53_spill] sm:$0xff] %v4220_v18 }
  0x72   : > { %8003 = vst [vmem:[#allocation50_spill] sm:$0xff] %v4209_v11  ;;  %v4239_v11 = vsel %vm526_vm2, %v549_v10, %v550_v32  ;;  %v557_v10 = vrot.slane %v3927_v5, 2  ;;  %v565_v5 = vrot.slane %v3961_v35, 2 }
  0x73   : > { %8008 = vst [vmem:[#allocation55_spill] sm:$0xff] %v4236_v13 }
  0x74   : > { %8009 = vst [vmem:[#allocation56_spill] sm:$0xff] %v4239_v11 }
  0x77   : > { %723 = vrot.lane.b32.xlu2 %v4214_v20, %s3749_s25 }
  0x78   : > { %721 = vrot.lane.b32.xlu1 %v4217_v37, %s3749_s25  ;;  %725 = vrot.lane.b32.xlu0 %v4220_v18, %s3749_s25  ;;  %v4242_v18 = vsel %vm526_vm2, %v554_v17, %v555_v38  ;;  %v562_v17 = vrot.slane %v3958_v34, 2  ;;  %v567_v34 = vrot.slane %v3983_v55, 2 }
  0x79   : > { %v4230_v15 = vpop.permute.xlu2 %626  ;;  %8010 = vst [vmem:[#allocation57_spill] sm:$0xff] %v4242_v18 }
  0x7a   : > { %8007 = vst [vmem:[#allocation54_spill] sm:$0xff] %v4230_v15  ;;  %v560_v15 = vrot.slane %v3955_v33, 2 }
  0x7f   : > { %729 = vrot.lane.b32.xlu2 %v4236_v13, %s3749_s25  ;;  %v4259_v13 = vsel %vm526_vm2, %v559_v47, %v560_v15 }
  0x80   : > { %727 = vrot.lane.b32.xlu1 %v4239_v11, %s3749_s25  ;;  %731 = vrot.lane.b32.xlu0 %v4242_v18, %s3749_s25  ;;  %v4250_v4 = vpop.permute.xlu0 %616  ;;  %8013 = vst [vmem:[#allocation60_spill] sm:$0xff] %v4259_v13  ;;  %v4262_v11 = vsel %vm526_vm2, %v555_v38, %v557_v10  ;;  %v4265_v18 = vsel %vm526_vm2, %v560_v15, %v562_v17  ;;  %v564_v38 = vrot.slane %v3964_v36, 2  ;;  %v569_v15 = vrot.slane %v3995_v59, 2 }
  0x81   : > { %8011 = vst [vmem:[#allocation58_spill] sm:$0xff] %v4250_v4  ;;  %v4254_v32 = vpop.permute.xlu2 %632  ;;  %v570_v10 = vrot.slane %v3992_v58, 2  ;;  %v4285_v4 = vsel %vm526_vm2, %v565_v5, %v567_v34  ;;  %v575_v34 = vrot.slane %v4024_v41, 2 }
  0x82   : > { %8012 = vst [vmem:[#allocation59_spill] sm:$0xff] %v4254_v32 }
  0x83   : > { %8014 = vst [vmem:[#allocation61_spill] sm:$0xff] %v4262_v11  ;;  %v4291_v55 = vsel %vm526_vm2, %v569_v15, %v570_v10 }
  0x84   : > { %8015 = vst [vmem:[#allocation62_spill] sm:$0xff] %v4265_v18 }
  0x85   : > { %8019 = vst [vmem:[#allocation66_spill] sm:$0xff] %v4285_v4 }
  0x86   : > { %8021 = vst [vmem:[#allocation68_spill] sm:$0xff] %v4291_v55 }
  0x87   : > { %735 = vrot.lane.b32.xlu2 %v4259_v13, %s3749_s25 }
  0x88   : > { %733 = vrot.lane.b32.xlu1 %v4262_v11, %s3749_s25  ;;  %737 = vrot.lane.b32.xlu0 %v4265_v18, %s3749_s25  ;;  %v4288_v18 = vsel %vm526_vm2, %v564_v38, %v565_v5  ;;  %v572_v5 = vrot.slane %v3998_v3, 2  ;;  %v577_v38 = vrot.slane %v4027_v42, 2  ;;  %v580_v3 = vrot.slane %v4033_v53, 2 }
  0x89   : > { %v4275_v47 = vpop.permute.xlu2 %638  ;;  %8020 = vst [vmem:[#allocation67_spill] sm:$0xff] %v4288_v18  ;;  %v582_v42 = vrot.slane %v4067_v39, 2 }
  0x8a   : > { %8016 = vst [vmem:[#allocation63_spill] sm:$0xff] %v4275_v47  ;;  %v4280_v17 = vpop.permute.xlu1 %620  ;;  %v4282_v32 = vpop.permute.xlu0 %618  ;;  %v574_v47 = vrot.slane %v4030_v52, 2 }
  0x8b   : > { %8017 = vst [vmem:[#allocation64_spill] sm:$0xff] %v4280_v17 }
  0x8c   : > { %8018 = vst [vmem:[#allocation65_spill] sm:$0xff] %v4282_v32 }
  0x8f   : > { %741 = vrot.lane.b32.xlu2 %v4285_v4, %s3749_s25  ;;  %v4310_v4 = vsel %vm526_vm2, %v574_v47, %v575_v34 }
  0x90   : > { %739 = vrot.lane.b32.xlu1 %v4288_v18, %s3749_s25  ;;  %743 = vrot.lane.b32.xlu0 %v4291_v55, %s3749_s25  ;;  %8025 = vst [vmem:[#allocation72_spill] sm:$0xff] %v4310_v4  ;;  %v4313_v18 = vsel %vm526_vm2, %v570_v10, %v572_v5  ;;  %v4316_v55 = vsel %vm526_vm2, %v575_v34, %v577_v38  ;;  %v579_v10 = vrot.slane %v4036_v6, 2  ;;  %v584_v34 = vrot.slane %v4064_v40, 2 }
  0x91   : > { %v4301_v17 = vpop.permute.xlu2 %644  ;;  %8026 = vst [vmem:[#allocation73_spill] sm:$0xff] %v4313_v18  ;;  %v585_v5 = vrot.slane %v4061_v1, 2 }
  0x92   : > { %8022 = vst [vmem:[#allocation69_spill] sm:$0xff] %v4301_v17  ;;  %v4305_v15 = vpop.permute.xlu1 %622  ;;  %v4307_v32 = vpop.permute.xlu0 %628 }
  0x93   : > { %8023 = vst [vmem:[#allocation70_spill] sm:$0xff] %v4305_v15  ;;  %v4339_v15 = vsel %vm526_vm2, %v579_v10, %v580_v3  ;;  %v4342_v39 = vsel %vm526_vm2, %v584_v34, %v585_v5  ;;  %v592_v10 = vrot.slane %v4099_v28, 2  ;;  %v595_v28 = vrot.slane %v4105_v9, 2 }
  0x94   : > { %8024 = vst [vmem:[#allocation71_spill] sm:$0xff] %v4307_v32  ;;  %v4336_v32 = vsel %vm526_vm2, %v580_v3, %v582_v42  ;;  %v590_v42 = vrot.slane %v4096_v29, 2  ;;  %v587_v3 = vrot.slane %v4070_v48, 2  ;;  %v597_v48 = vrot.slane %v4139_v61, 2 }
  0x95   : > { %8027 = vst [vmem:[#allocation74_spill] sm:$0xff] %v4316_v55 }
  0x96   : > { %8031 = vst [vmem:[#allocation78_spill] sm:$0xff] %v4336_v32 }
  0x97   : > { %747 = vrot.lane.b32.xlu2 %v4310_v4, %s3749_s25  ;;  %8032 = vst [vmem:[#allocation79_spill] sm:$0xff] %v4339_v15 }
  0x98   : > { %745 = vrot.lane.b32.xlu1 %v4313_v18, %s3749_s25  ;;  %749 = vrot.lane.b32.xlu0 %v4316_v55, %s3749_s25  ;;  %8033 = vst [vmem:[#allocation80_spill] sm:$0xff] %v4342_v39  ;;  %v4364_v55 = vsel %vm526_vm2, %v585_v5, %v587_v3  ;;  %v594_v5 = vrot.slane %v4108_v8, 2  ;;  %v600_v3 = vrot.slane %v4133_v22, 2 }
  0x99   : > { %v4326_v47 = vpop.permute.xlu2 %650 }
  0x9a   : > { %8028 = vst [vmem:[#allocation75_spill] sm:$0xff] %v4326_v47  ;;  %v4331_v38 = vpop.permute.xlu1 %630  ;;  %v4333_v17 = vpop.permute.xlu0 %634 }
  0x9b   : > { %8029 = vst [vmem:[#allocation76_spill] sm:$0xff] %v4331_v38 }
  0x9c   : > { %8030 = vst [vmem:[#allocation77_spill] sm:$0xff] %v4333_v17  ;;  %v589_v17 = vrot.slane %v4102_v7, 2 }
  0x9f   : > { %753 = vrot.lane.b32.xlu2 %v4336_v32, %s3749_s25  ;;  %v4361_v32 = vsel %vm526_vm2, %v589_v17, %v590_v42 }
  0xa0   : > { %751 = vrot.lane.b32.xlu1 %v4339_v15, %s3749_s25  ;;  %755 = vrot.lane.b32.xlu0 %v4342_v39, %s3749_s25  ;;  %v4367_v39 = vsel %vm526_vm2, %v590_v42, %v592_v10  ;;  %v599_v42 = vrot.slane %v4136_v62, 2 }
  0xa1   : > { %v4352_v38 = vpop.permute.xlu2 %656 }
  0xa2   : > { %8034 = vst [vmem:[#allocation81_spill] sm:$0xff] %v4352_v38  ;;  %v4356_v34 = vpop.permute.xlu1 %636  ;;  %v4358_v47 = vpop.permute.xlu0 %640  ;;  %v4390_v38 = vsel %vm526_vm2, %v594_v5, %v595_v28  ;;  %v4393_v61 = vsel %vm526_vm2, %v599_v42, %v600_v3 }
  0xa3   : > { %8035 = vst [vmem:[#allocation82_spill] sm:$0xff] %v4356_v34  ;;  %v4387_v34 = vsel %vm526_vm2, %v595_v28, %v597_v48  ;;  %v602_v48 = vrot.slane %v4142_v12, 2 }
  0xa4   : > { %8036 = vst [vmem:[#allocation83_spill] sm:$0xff] %v4358_v47 }
  0xa5   : > { %8040 = vst [vmem:[#allocation87_spill] sm:$0xff] %v4387_v34  ;;  %v4409_v5 = vsel %vm526_vm2, %v600_v3, %v602_v48 }
  0xa6   : > { %8041 = vst [vmem:[#allocation88_spill] sm:$0xff] %v4390_v38 }
  0xa7   : > { %759 = vrot.lane.b32.xlu2 %v4361_v32, %s3749_s25 }
  0xa8   : > { %757 = vrot.lane.b32.xlu1 %v4364_v55, %s3749_s25  ;;  %761 = vrot.lane.b32.xlu0 %v4367_v39, %s3749_s25 }
  0xa9   : > { %v4377_v17 = vpop.permute.xlu2 %662 }
  0xaa   : > { %8037 = vst [vmem:[#allocation84_spill] sm:$0xff] %v4377_v17  ;;  %v4382_v10 = vpop.permute.xlu1 %642  ;;  %v4384_v47 = vpop.permute.xlu0 %646 }
  0xab   : > { %8038 = vst [vmem:[#allocation85_spill] sm:$0xff] %v4382_v10 }
  0xac   : > { %8039 = vst [vmem:[#allocation86_spill] sm:$0xff] %v4384_v47 }
  0xaf   : > { %765 = vrot.lane.b32.xlu2 %v4387_v34, %s3749_s25 }
  0xb0   : > { %763 = vrot.lane.b32.xlu1 %v4390_v38, %s3749_s25  ;;  %767 = vrot.lane.b32.xlu0 %v4393_v61, %s3749_s25 }
  0xb1   : > { %v4401_v10 = vpop.permute.xlu2 %668 }
  0xb2   : > { %8042 = vst [vmem:[#allocation89_spill] sm:$0xff] %v4401_v10  ;;  %v4404_v17 = vpop.permute.xlu1 %648  ;;  %v4406_v28 = vpop.permute.xlu0 %652 }
  0xb3   : > { %8043 = vst [vmem:[#allocation90_spill] sm:$0xff] %v4404_v17 }
  0xb4   : > { %8044 = vst [vmem:[#allocation91_spill] sm:$0xff] %v4406_v28 }
  0xb7   : > { %802 = vrot.lane.b32.xlu2 %v3822_v16, %s3750_s26 }
  0xb8   : > { %769 = vrot.lane.b32.xlu1 %v4409_v5, %s3749_s25  ;;  %804 = vrot.lane.b32.xlu0 %v3827_v19, %s3750_s26 }
  0xb9   : > { %v4417_v42 = vpop.permute.xlu2 %674 }
  0xba   : > { %8045 = vst [vmem:[#allocation92_spill] sm:$0xff] %v4417_v42  ;;  %v4419_v12 = vpop.permute.xlu1 %654  ;;  %v4421_v10 = vpop.permute.xlu0 %658 }
  0xbb   : > { %8046 = vst [vmem:[#allocation93_spill] sm:$0xff] %v4419_v12 }
  0xbc   : > { %8047 = vst [vmem:[#allocation94_spill] sm:$0xff] %v4421_v10 }
  0xbf   : > { %808 = vrot.lane.b32.xlu2 %v3816_v14, %s3750_s26 }
  0xc0   : > { %806 = vrot.lane.b32.xlu1 %v3845_v27, %s3750_s26  ;;  %810 = vrot.lane.b32.xlu0 %v3842_v26, %s3750_s26 }
  0xc1   : > { %v4429_v3 = vpop.permute.xlu2 %711 }
  0xc2   : > { %8048 = vst [vmem:[#allocation95_spill] sm:$0xff] %v4429_v3  ;;  %v4431_v48 = vpop.permute.xlu1 %660  ;;  %v4433_v28 = vpop.permute.xlu0 %664  ;;  %v4521_v3 = vld [vmem:[%s3807_s24 + $0xf8] sm:$0xff] }
  0xc3   : > { %8049 = vst [vmem:[#allocation96_spill] sm:$0xff] %v4431_v48 }
  0xc4   : > { %8050 = vst [vmem:[#allocation97_spill] sm:$0xff] %v4433_v28 }
  0xc7   : > { %814 = vrot.lane.b32.xlu2 %v3887_v49, %s3750_s26 }
  0xc8   : > { %812 = vrot.lane.b32.xlu1 %v3836_v24, %s3750_s26  ;;  %816 = vrot.lane.b32.xlu0 %v3880_v46, %s3750_s26 }
  0xc9   : > { %v4441_v42 = vpop.permute.xlu2 %717 }
  0xca   : > { %8051 = vst [vmem:[#allocation98_spill] sm:$0xff] %v4441_v42  ;;  %v4443_v10 = vpop.permute.xlu1 %666  ;;  %v4445_v12 = vpop.permute.xlu0 %670 }
  0xcb   : > { %8052 = vst [vmem:[#allocation99_spill] sm:$0xff] %v4443_v10 }
  0xcc   : > { %8053 = vst [vmem:[#allocation100_spill] sm:$0xff] %v4445_v12 }
  0xcf   : > { %820 = vrot.lane.b32.xlu2 %v3890_v50, %s3750_s26 }
  0xd0   : > { %818 = vrot.lane.b32.xlu1 %v3893_v51, %s3750_s26  ;;  %822 = vrot.lane.b32.xlu0 %v3920_v2, %s3750_s26 }
  0xd1   : > { %v4453_v28 = vpop.permute.xlu2 %723 }
  0xd2   : > { %8054 = vst [vmem:[#allocation101_spill] sm:$0xff] %v4453_v28  ;;  %v4455_v48 = vpop.permute.xlu1 %672  ;;  %v4457_v17 = vpop.permute.xlu0 %676 }
  0xd3   : > { %8055 = vst [vmem:[#allocation102_spill] sm:$0xff] %v4455_v48 }
  0xd4   : > { %8056 = vst [vmem:[#allocation103_spill] sm:$0xff] %v4457_v17 }
  0xd7   : > { %826 = vrot.lane.b32.xlu2 %v3946_v23, %s3750_s26 }
  0xd8   : > { %824 = vrot.lane.b32.xlu1 %v3917_v63, %s3750_s26  ;;  %828 = vrot.lane.b32.xlu0 %v3955_v33, %s3750_s26 }
  0xd9   : > { %v4465_v12 = vpop.permute.xlu2 %729 }
  0xda   : > { %8057 = vst [vmem:[#allocation104_spill] sm:$0xff] %v4465_v12  ;;  %v4467_v10 = vpop.permute.xlu1 %709  ;;  %v4469_v42 = vpop.permute.xlu0 %713 }
  0xdb   : > { %8058 = vst [vmem:[#allocation105_spill] sm:$0xff] %v4467_v10 }
  0xdc   : > { %8059 = vst [vmem:[#allocation106_spill] sm:$0xff] %v4469_v42 }
  0xdf   : > { %832 = vrot.lane.b32.xlu2 %v3961_v35, %s3750_s26 }
  0xe0   : > { %830 = vrot.lane.b32.xlu1 %v3964_v36, %s3750_s26  ;;  %834 = vrot.lane.b32.xlu0 %v3995_v59, %s3750_s26 }
  0xe1   : > { %v4477_v17 = vpop.permute.xlu2 %735 }
  0xe2   : > { %8060 = vst [vmem:[#allocation107_spill] sm:$0xff] %v4477_v17  ;;  %v4479_v48 = vpop.permute.xlu1 %715  ;;  %v4481_v28 = vpop.permute.xlu0 %719 }
  0xe3   : > { %8061 = vst [vmem:[#allocation108_spill] sm:$0xff] %v4479_v48 }
  0xe4   : > { %8062 = vst [vmem:[#allocation109_spill] sm:$0xff] %v4481_v28 }
  0xe7   : > { %838 = vrot.lane.b32.xlu2 %v4030_v52, %s3750_s26 }
  0xe8   : > { %836 = vrot.lane.b32.xlu1 %v3992_v58, %s3750_s26  ;;  %840 = vrot.lane.b32.xlu0 %v4024_v41, %s3750_s26 }
  0xe9   : > { %v4489_v12 = vpop.permute.xlu2 %741 }
  0xea   : > { %8063 = vst [vmem:[#allocation110_spill] sm:$0xff] %v4489_v12  ;;  %v4491_v42 = vpop.permute.xlu1 %721  ;;  %v4493_v17 = vpop.permute.xlu0 %725 }
  0xeb   : > { %8064 = vst [vmem:[#allocation111_spill] sm:$0xff] %v4491_v42 }
  0xec   : > { %8065 = vst [vmem:[#allocation112_spill] sm:$0xff] %v4493_v17 }
  0xef   : > { %844 = vrot.lane.b32.xlu2 %v4033_v53, %s3750_s26 }
  0xf0   : > { %842 = vrot.lane.b32.xlu1 %v4036_v6, %s3750_s26  ;;  %846 = vrot.lane.b32.xlu0 %v4064_v40, %s3750_s26 }
  0xf1   : > { %v4501_v28 = vpop.permute.xlu2 %747 }
  0xf2   : > { %8066 = vst [vmem:[#allocation113_spill] sm:$0xff] %v4501_v28  ;;  %v4503_v48 = vpop.permute.xlu1 %727  ;;  %v4505_v19 = vpop.permute.xlu0 %731  ;;  %v255_v28 = vld [vmem:[%s3807_s24 + $0xf0] sm:$0xff] }
  0xf3   : > { %8067 = vst [vmem:[#allocation114_spill] sm:$0xff] %v4503_v48 }
  0xf4   : > { %8068 = vst [vmem:[#allocation115_spill] sm:$0xff] %v4505_v19  ;;  %v335_v19 = vrot.slane %v255_v28, 7 }
  0xf6   : > { %v4537_v16 = vsel %vm289_vm0, 0.0, %v335_v19 }
  0xf7   : > { %850 = vrot.lane.b32.xlu2 %v4102_v7, %s3750_s26 }
  0xf8   : > { %848 = vrot.lane.b32.xlu1 %v4061_v1, %s3750_s26  ;;  %852 = vrot.lane.b32.xlu0 %v4096_v29, %s3750_s26 }
  0xf9   : > { %v4513_v17 = vpop.permute.xlu2 %753 }
  0xfa   : > { %8069 = vst [vmem:[#allocation116_spill] sm:$0xff] %v4513_v17  ;;  %v4515_v42 = vpop.permute.xlu1 %733  ;;  %v4517_v12 = vpop.permute.xlu0 %737  ;;  %v7798_v17 = vrot.slane %v4521_v3, 7 }
  0xfb   : > { %8070 = vst [vmem:[#allocation117_spill] sm:$0xff] %v4515_v42 }
  0xfc   : > { %8071 = vst [vmem:[#allocation118_spill] sm:$0xff] %v4517_v12  ;;  %v4542_v47 = vsel %vm289_vm0, %v335_v19, %v7798_v17 }
  0xff   : > { %856 = vrot.lane.b32.xlu2 %v4105_v9, %s3750_s26 }
 0x100   : > { %854 = vrot.lane.b32.xlu1 %v4108_v8, %s3750_s26  ;;  %858 = vrot.lane.b32.xlu0 %v4136_v62, %s3750_s26 }
 0x101   : > { %v4529_v48 = vpop.permute.xlu2 %759 }
 0x102   : > { %8072 = vst [vmem:[#allocation119_spill] sm:$0xff] %v4529_v48  ;;  %v4532_v42 = vpop.permute.xlu1 %739  ;;  %v4534_v12 = vpop.permute.xlu0 %743 }
 0x103   : > { %8073 = vst [vmem:[#allocation120_spill] sm:$0xff] %v4532_v42 }
 0x104   : > { %8074 = vst [vmem:[#allocation121_spill] sm:$0xff] %v4534_v12 }
 0x107   : > { %862 = vrot.lane.b32.xlu2 %v4537_v16, %s3750_s26 }
 0x108   : > { %860 = vrot.lane.b32.xlu1 %v4133_v22, %s3750_s26  ;;  %864 = vrot.lane.b32.xlu0 %v4542_v47, %s3750_s26 }
 0x109   : > { %v4550_v28 = vpop.permute.xlu2 %765 }
 0x10a   : > { %8075 = vst [vmem:[#allocation122_spill] sm:$0xff] %v4550_v28  ;;  %v4552_v48 = vpop.permute.xlu1 %745  ;;  %v4554_v12 = vpop.permute.xlu0 %749 }
 0x10b   : > { %8076 = vst [vmem:[#allocation123_spill] sm:$0xff] %v4552_v48 }
 0x10c   : > { %8077 = vst [vmem:[#allocation124_spill] sm:$0xff] %v4554_v12 }
 0x10f   : > { %900 = vrot.lane.b32.xlu2 %v3852_v30, %s3751_s27 }
 0x110   : > { %898 = vrot.lane.b32.xlu1 %v3855_v31, %s3751_s27  ;;  %902 = vrot.lane.b32.xlu0 %v3874_v44, %s3751_s27 }
 0x111   : > { %v4562_v19 = vpop.permute.xlu2 %802 }
 0x112   : > { %8078 = vst [vmem:[#allocation125_spill] sm:$0xff] %v4562_v19  ;;  %v4564_v17 = vpop.permute.xlu1 %751  ;;  %v4566_v42 = vpop.permute.xlu0 %755 }
 0x113   : > { %8079 = vst [vmem:[#allocation126_spill] sm:$0xff] %v4564_v17  ;;  %v8085_v17 = vld [vmem:[#allocation9_spill] sm:$0xff] }
 0x114   : > { %8080 = vst [vmem:[#allocation127_spill] sm:$0xff] %v4566_v42  ;;  %v8084_v42 = vld [vmem:[#allocation8_spill] sm:$0xff] }
 0x117   : > { %906 = vrot.lane.b32.xlu2 %v3871_v43, %s3751_s27 }
 0x118   : > { %904 = vrot.lane.b32.xlu1 %v3839_v25, %s3751_s27  ;;  %908 = vrot.lane.b32.xlu0 %v3877_v45, %s3751_s27 }
 0x119   : > { %v4574_v30 = vpop.permute.xlu2 %808 }
 0x11a   : > { %8081 = vst [vmem:[#allocation128_spill] sm:$0xff] %v4574_v30  ;;  %v4576_v31 = vpop.permute.xlu1 %757  ;;  %v4578_v28 = vpop.permute.xlu0 %761  ;;  %v8089_v30 = vld [vmem:[#allocation12_spill] sm:$0xff] }
 0x11b   : > { %8082 = vst [vmem:[#allocation129_spill] sm:$0xff] %v4576_v31  ;;  %v8091_v31 = vld [vmem:[#allocation15_spill] sm:$0xff] }
 0x11c   : > { %8083 = vst [vmem:[#allocation130_spill] sm:$0xff] %v4578_v28  ;;  %v8090_v28 = vld [vmem:[#allocation14_spill] sm:$0xff] }
 0x11f   : > { %912 = vrot.lane.b32.xlu2 %v3908_v60, %s3751_s27 }
 0x120   : > { %910 = vrot.lane.b32.xlu1 %v8084_v42, %s3751_s27  ;;  %914 = vrot.lane.b32.xlu0 %v8085_v17, %s3751_s27 }
 0x121   : > { %v4586_v12 = vpop.permute.xlu2 %814 }
 0x122   : > { %8086 = vst [vmem:[#allocation131_spill] sm:$0xff] %v4586_v12  ;;  %v4588_v48 = vpop.permute.xlu1 %763  ;;  %v4590_v19 = vpop.permute.xlu0 %767  ;;  %v8095_v12 = vld [vmem:[#allocation17_spill] sm:$0xff] }
 0x123   : > { %8087 = vst [vmem:[#allocation132_spill] sm:$0xff] %v4588_v48  ;;  %v8097_v48 = vld [vmem:[#allocation19_spill] sm:$0xff] }
 0x124   : > { %8088 = vst [vmem:[#allocation133_spill] sm:$0xff] %v4590_v19  ;;  %v8096_v19 = vld [vmem:[#allocation18_spill] sm:$0xff] }
 0x127   : > { %918 = vrot.lane.b32.xlu2 %v8089_v30, %s3751_s27 }
 0x128   : > { %916 = vrot.lane.b32.xlu1 %v8090_v28, %s3751_s27  ;;  %920 = vrot.lane.b32.xlu0 %v8091_v31, %s3751_s27 }
 0x129   : > { %v4598_v10 = vpop.permute.xlu2 %820 }
 0x12a   : > { %8092 = vst [vmem:[#allocation134_spill] sm:$0xff] %v4598_v10  ;;  %v4600_v42 = vpop.permute.xlu1 %769  ;;  %v4602_v17 = vpop.permute.xlu0 %804  ;;  %v8101_v10 = vld [vmem:[#allocation20_spill] sm:$0xff] }
 0x12b   : > { %8093 = vst [vmem:[#allocation135_spill] sm:$0xff] %v4600_v42  ;;  %v8102_v42 = vld [vmem:[#allocation21_spill] sm:$0xff] }
 0x12c   : > { %8094 = vst [vmem:[#allocation136_spill] sm:$0xff] %v4602_v17  ;;  %v8103_v17 = vld [vmem:[#allocation22_spill] sm:$0xff] }
 0x12f   : > { %924 = vrot.lane.b32.xlu2 %v8095_v12, %s3751_s27 }
 0x130   : > { %922 = vrot.lane.b32.xlu1 %v8096_v19, %s3751_s27  ;;  %926 = vrot.lane.b32.xlu0 %v8097_v48, %s3751_s27 }
 0x131   : > { %v4610_v30 = vpop.permute.xlu2 %826 }
 0x132   : > { %8098 = vst [vmem:[#allocation137_spill] sm:$0xff] %v4610_v30  ;;  %v4612_v28 = vpop.permute.xlu1 %806  ;;  %v4614_v31 = vpop.permute.xlu0 %810  ;;  %v8107_v30 = vld [vmem:[#allocation26_spill] sm:$0xff] }
 0x133   : > { %8099 = vst [vmem:[#allocation138_spill] sm:$0xff] %v4612_v28  ;;  %v8109_v28 = vld [vmem:[#allocation28_spill] sm:$0xff] }
 0x134   : > { %8100 = vst [vmem:[#allocation139_spill] sm:$0xff] %v4614_v31  ;;  %v8108_v31 = vld [vmem:[#allocation27_spill] sm:$0xff] }
 0x137   : > { %930 = vrot.lane.b32.xlu2 %v8101_v10, %s3751_s27 }
 0x138   : > { %928 = vrot.lane.b32.xlu1 %v8102_v42, %s3751_s27  ;;  %932 = vrot.lane.b32.xlu0 %v8103_v17, %s3751_s27 }
 0x139   : > { %v4622_v12 = vpop.permute.xlu2 %832 }
 0x13a   : > { %8104 = vst [vmem:[#allocation140_spill] sm:$0xff] %v4622_v12  ;;  %v4624_v19 = vpop.permute.xlu1 %812  ;;  %v4626_v48 = vpop.permute.xlu0 %816  ;;  %v8113_v12 = vld [vmem:[#allocation31_spill] sm:$0xff] }
 0x13b   : > { %8105 = vst [vmem:[#allocation141_spill] sm:$0xff] %v4624_v19  ;;  %v8115_v19 = vld [vmem:[#allocation33_spill] sm:$0xff] }
 0x13c   : > { %8106 = vst [vmem:[#allocation142_spill] sm:$0xff] %v4626_v48  ;;  %v8114_v48 = vld [vmem:[#allocation32_spill] sm:$0xff] }
 0x13f   : > { %936 = vrot.lane.b32.xlu2 %v8107_v30, %s3751_s27 }
 0x140   : > { %934 = vrot.lane.b32.xlu1 %v8108_v31, %s3751_s27  ;;  %938 = vrot.lane.b32.xlu0 %v8109_v28, %s3751_s27 }
 0x141   : > { %v4634_v10 = vpop.permute.xlu2 %838 }
 0x142   : > { %8110 = vst [vmem:[#allocation143_spill] sm:$0xff] %v4634_v10  ;;  %v4636_v42 = vpop.permute.xlu1 %818  ;;  %v4638_v17 = vpop.permute.xlu0 %822 }
 0x143   : > { %8111 = vst [vmem:[#allocation144_spill] sm:$0xff] %v4636_v42 }
 0x144   : > { %8112 = vst [vmem:[#allocation145_spill] sm:$0xff] %v4638_v17 }
 0x147   : > { %942 = vrot.lane.b32.xlu2 %v8113_v12, %s3751_s27 }
 0x148   : > { %940 = vrot.lane.b32.xlu1 %v8114_v48, %s3751_s27  ;;  %944 = vrot.lane.b32.xlu0 %v8115_v19, %s3751_s27 }
 0x149   : > { %v4646_v30 = vpop.permute.xlu2 %844 }
 0x14a   : > { %8116 = vst [vmem:[#allocation31_spill] sm:$0xff] %v4646_v30  ;;  %v4648_v31 = vpop.permute.xlu1 %824  ;;  %v4650_v28 = vpop.permute.xlu0 %828  ;;  %v8122_v30 = vrot.slane %v4521_v3, 7  ;;  %v606_v3 = vrot.slane %v4537_v16, 1 }
 0x14b   : > { %8117 = vst [vmem:[#allocation32_spill] sm:$0xff] %v4648_v31 }
 0x14c   : > { %8118 = vst [vmem:[#allocation33_spill] sm:$0xff] %v4650_v28  ;;  %v4667_v31 = vsel %vm289_vm0, %v8122_v30, 0.0  ;;  %v8123_v28 = vld [vmem:[#allocation42_spill] sm:$0xff] }
 0x14f   : > { %948 = vrot.lane.b32.xlu2 %v4124_v54, %s3751_s27 }
 0x150   : > { %946 = vrot.lane.b32.xlu1 %v4127_v21, %s3751_s27  ;;  %950 = vrot.lane.b32.xlu0 %v4130_v0, %s3751_s27  ;;  %v8124_v21 = vld [vmem:[#allocation44_spill] sm:$0xff] }
 0x151   : > { %v4658_v17 = vpop.permute.xlu2 %850 }
 0x152   : > { %8119 = vst [vmem:[#allocation146_spill] sm:$0xff] %v4658_v17  ;;  %v4660_v42 = vpop.permute.xlu1 %830  ;;  %v4662_v10 = vpop.permute.xlu0 %834  ;;  %v607_v17 = vrot.slane %v4542_v47, 1 }
 0x153   : > { %8120 = vst [vmem:[#allocation147_spill] sm:$0xff] %v4660_v42  ;;  %v609_v42 = vrot.slane %v4667_v31, 1 }
 0x154   : > { %8121 = vst [vmem:[#allocation148_spill] sm:$0xff] %v4662_v10 }
 0x157   : > { %954 = vrot.lane.b32.xlu2 %v8123_v28, %s3751_s27  ;;  %v4685_v28 = vsel %vm448_vm1, %v607_v17, %v609_v42  ;;  %v8134_v42 = vld [vmem:[#allocation49_spill] sm:$0xff] }
 0x158   : > { %952 = vrot.lane.b32.xlu1 %v4158_v57, %s3751_s27  ;;  %956 = vrot.lane.b32.xlu0 %v8124_v21, %s3751_s27  ;;  %8128 = vst [vmem:[#allocation152_spill] sm:$0xff] %v4685_v28  ;;  %v4688_v57 = vsel %vm448_vm1, %v606_v3, %v607_v17  ;;  %v8135_v17 = vld [vmem:[#allocation47_spill] sm:$0xff]  ;;  %v8136_v3 = vld [vmem:[#allocation48_spill] sm:$0xff] }
 0x159   : > { %v4677_v0 = vpop.permute.xlu2 %856  ;;  %8129 = vst [vmem:[#allocation153_spill] sm:$0xff] %v4688_v57 }
 0x15a   : > { %8125 = vst [vmem:[#allocation149_spill] sm:$0xff] %v4677_v0  ;;  %v4680_v10 = vpop.permute.xlu1 %836  ;;  %v4682_v30 = vpop.permute.xlu0 %840  ;;  %v8130_v0 = vld [vmem:[#allocation45_spill] sm:$0xff] }
 0x15b   : > { %8126 = vst [vmem:[#allocation150_spill] sm:$0xff] %v4680_v10 }
 0x15c   : > { %8127 = vst [vmem:[#allocation151_spill] sm:$0xff] %v4682_v30 }
 0x15f   : > { %960 = vrot.lane.b32.xlu2 %v4685_v28, %s3751_s27 }
 0x160   : > { %958 = vrot.lane.b32.xlu1 %v4688_v57, %s3751_s27  ;;  %994 = vrot.lane.b32.xlu0 %v8130_v0, %s3752_s28 }
 0x161   : > { %v4696_v21 = vpop.permute.xlu2 %862 }
 0x162   : > { %8131 = vst [vmem:[#allocation45_spill] sm:$0xff] %v4696_v21  ;;  %v4698_v10 = vpop.permute.xlu1 %842  ;;  %v4700_v30 = vpop.permute.xlu0 %846 }
 0x163   : > { %8132 = vst [vmem:[#allocation154_spill] sm:$0xff] %v4698_v10  ;;  %v8143_v10 = vld [vmem:[#allocation56_spill] sm:$0xff] }
 0x164   : > { %8133 = vst [vmem:[#allocation155_spill] sm:$0xff] %v4700_v30 }
 0x167   : > { %998 = vrot.lane.b32.xlu2 %v8134_v42, %s3752_s28 }
 0x168   : > { %996 = vrot.lane.b32.xlu1 %v8135_v17, %s3752_s28  ;;  %1000 = vrot.lane.b32.xlu0 %v8136_v3, %s3752_s28 }
 0x169   : > { %v4708_v57 = vpop.permute.xlu2 %900 }
 0x16a   : > { %8137 = vst [vmem:[#allocation49_spill] sm:$0xff] %v4708_v57  ;;  %v4710_v28 = vpop.permute.xlu1 %848  ;;  %v4712_v0 = vpop.permute.xlu0 %852 }
 0x16b   : > { %8138 = vst [vmem:[#allocation47_spill] sm:$0xff] %v4710_v28  ;;  %v8145_v28 = vld [vmem:[#allocation55_spill] sm:$0xff] }
 0x16c   : > { %8139 = vst [vmem:[#allocation48_spill] sm:$0xff] %v4712_v0  ;;  %v8144_v0 = vld [vmem:[#allocation53_spill] sm:$0xff] }
 0x16f   : > { %1004 = vrot.lane.b32.xlu2 %v4217_v37, %s3752_s28 }
 0x170   : > { %1002 = vrot.lane.b32.xlu1 %v4199_v56, %s3752_s28  ;;  %1006 = vrot.lane.b32.xlu0 %v4214_v20, %s3752_s28 }
 0x171   : > { %v4720_v21 = vpop.permute.xlu2 %906 }
 0x172   : > { %8140 = vst [vmem:[#allocation156_spill] sm:$0xff] %v4720_v21  ;;  %v4722_v17 = vpop.permute.xlu1 %854  ;;  %v4724_v30 = vpop.permute.xlu0 %858 }
 0x173   : > { %8141 = vst [vmem:[#allocation157_spill] sm:$0xff] %v4722_v17 }
 0x174   : > { %8142 = vst [vmem:[#allocation158_spill] sm:$0xff] %v4724_v30  ;;  %v8149_v30 = vld [vmem:[#allocation57_spill] sm:$0xff] }
 0x177   : > { %1010 = vrot.lane.b32.xlu2 %v8143_v10, %s3752_s28 }
 0x178   : > { %1008 = vrot.lane.b32.xlu1 %v8144_v0, %s3752_s28  ;;  %1012 = vrot.lane.b32.xlu0 %v8145_v28, %s3752_s28 }
 0x179   : > { %v4732_v57 = vpop.permute.xlu2 %912 }
 0x17a   : > { %8146 = vst [vmem:[#allocation53_spill] sm:$0xff] %v4732_v57  ;;  %v4734_v37 = vpop.permute.xlu1 %860  ;;  %v4736_v20 = vpop.permute.xlu0 %864  ;;  %v8153_v57 = vld [vmem:[#allocation67_spill] sm:$0xff] }
 0x17b   : > { %8147 = vst [vmem:[#allocation55_spill] sm:$0xff] %v4734_v37  ;;  %v8155_v37 = vld [vmem:[#allocation66_spill] sm:$0xff] }
 0x17c   : > { %8148 = vst [vmem:[#allocation159_spill] sm:$0xff] %v4736_v20  ;;  %v8154_v20 = vld [vmem:[#allocation62_spill] sm:$0xff] }
 0x17f   : > { %1016 = vrot.lane.b32.xlu2 %v4262_v11, %s3752_s28 }
 0x180   : > { %1014 = vrot.lane.b32.xlu1 %v8149_v30, %s3752_s28  ;;  %1018 = vrot.lane.b32.xlu0 %v4259_v13, %s3752_s28 }
 0x181   : > { %v4744_v17 = vpop.permute.xlu2 %918 }
 0x182   : > { %8150 = vst [vmem:[#allocation160_spill] sm:$0xff] %v4744_v17  ;;  %v4746_v21 = vpop.permute.xlu1 %898  ;;  %v4748_v10 = vpop.permute.xlu0 %902  ;;  %v8159_v17 = vld [vmem:[#allocation68_spill] sm:$0xff] }
 0x183   : > { %8151 = vst [vmem:[#allocation161_spill] sm:$0xff] %v4746_v21 }
 0x184   : > { %8152 = vst [vmem:[#allocation162_spill] sm:$0xff] %v4748_v10 }
 0x187   : > { %1022 = vrot.lane.b32.xlu2 %v8153_v57, %s3752_s28 }
 0x188   : > { %1020 = vrot.lane.b32.xlu1 %v8154_v20, %s3752_s28  ;;  %1024 = vrot.lane.b32.xlu0 %v8155_v37, %s3752_s28 }
 0x189   : > { %v4756_v11 = vpop.permute.xlu2 %924 }
 0x18a   : > { %8156 = vst [vmem:[#allocation62_spill] sm:$0xff] %v4756_v11  ;;  %v4758_v30 = vpop.permute.xlu1 %904  ;;  %v4760_v13 = vpop.permute.xlu0 %908  ;;  %v8163_v11 = vld [vmem:[#allocation74_spill] sm:$0xff] }
 0x18b   : > { %8157 = vst [vmem:[#allocation66_spill] sm:$0xff] %v4758_v30 }
 0x18c   : > { %8158 = vst [vmem:[#allocation163_spill] sm:$0xff] %v4760_v13  ;;  %v8164_v13 = vld [vmem:[#allocation78_spill] sm:$0xff] }
 0x18f   : > { %1028 = vrot.lane.b32.xlu2 %v4313_v18, %s3752_s28 }
 0x190   : > { %1026 = vrot.lane.b32.xlu1 %v8159_v17, %s3752_s28  ;;  %1030 = vrot.lane.b32.xlu0 %v4310_v4, %s3752_s28 }
 0x191   : > { %v4768_v10 = vpop.permute.xlu2 %930 }
 0x192   : > { %8160 = vst [vmem:[#allocation68_spill] sm:$0xff] %v4768_v10  ;;  %v4770_v21 = vpop.permute.xlu1 %910  ;;  %v4772_v57 = vpop.permute.xlu0 %914 }
 0x193   : > { %8161 = vst [vmem:[#allocation164_spill] sm:$0xff] %v4770_v21 }
 0x194   : > { %8162 = vst [vmem:[#allocation165_spill] sm:$0xff] %v4772_v57  ;;  %v8168_v57 = vld [vmem:[#allocation80_spill] sm:$0xff] }
 0x197   : > { %1034 = vrot.lane.b32.xlu2 %v4339_v15, %s3752_s28 }
 0x198   : > { %1032 = vrot.lane.b32.xlu1 %v8163_v11, %s3752_s28  ;;  %1036 = vrot.lane.b32.xlu0 %v8164_v13, %s3752_s28 }
 0x199   : > { %v4780_v30 = vpop.permute.xlu2 %936 }
 0x19a   : > { %8165 = vst [vmem:[#allocation74_spill] sm:$0xff] %v4780_v30  ;;  %v4782_v18 = vpop.permute.xlu1 %916  ;;  %v4784_v4 = vpop.permute.xlu0 %920 }
 0x19b   : > { %8166 = vst [vmem:[#allocation78_spill] sm:$0xff] %v4782_v18  ;;  %v612_v18 = vrot.slane %v4542_v47, 2 }
 0x19c   : > { %8167 = vst [vmem:[#allocation166_spill] sm:$0xff] %v4784_v4  ;;  %v611_v4 = vrot.slane %v4537_v16, 2 }
 0x19f   : > { %1040 = vrot.lane.b32.xlu2 %v4364_v55, %s3752_s28 }
 0x1a0   : > { %1038 = vrot.lane.b32.xlu1 %v8168_v57, %s3752_s28  ;;  %1042 = vrot.lane.b32.xlu0 %v4361_v32, %s3752_s28 }
 0x1a1   : > { %v4792_v21 = vpop.permute.xlu2 %942 }
 0x1a2   : > { %8169 = vst [vmem:[#allocation80_spill] sm:$0xff] %v4792_v21  ;;  %v4794_v10 = vpop.permute.xlu1 %922  ;;  %v4796_v15 = vpop.permute.xlu0 %926 }
 0x1a3   : > { %8170 = vst [vmem:[#allocation167_spill] sm:$0xff] %v4794_v10 }
 0x1a4   : > { %8171 = vst [vmem:[#allocation168_spill] sm:$0xff] %v4796_v15  ;;  %v4813_v15 = vsel %vm526_vm2, %v611_v4, %v612_v18 }
 0x1a7   : > { %1046 = vrot.lane.b32.xlu2 %v4390_v38, %s3752_s28 }
 0x1a8   : > { %1044 = vrot.lane.b32.xlu1 %v4367_v39, %s3752_s28  ;;  %1048 = vrot.lane.b32.xlu0 %v4387_v34, %s3752_s28 }
 0x1a9   : > { %v4806_v30 = vpop.permute.xlu2 %948 }
 0x1aa   : > { %8172 = vst [vmem:[#allocation169_spill] sm:$0xff] %v4806_v30  ;;  %v4808_v21 = vpop.permute.xlu1 %928  ;;  %v4810_v10 = vpop.permute.xlu0 %932  ;;  %v614_v30 = vrot.slane %v4667_v31, 2 }
 0x1ab   : > { %8173 = vst [vmem:[#allocation170_spill] sm:$0xff] %v4808_v21 }
 0x1ac   : > { %v4829_v4 = vsel %vm526_vm2, %v612_v18, %v614_v30 }
 0x1af   : > { %1052 = vrot.lane.b32.xlu2 %v4409_v5, %s3752_s28 }
 0x1b0   : > { %1050 = vrot.lane.b32.xlu1 %v4393_v61, %s3752_s28  ;;  %1054 = vrot.lane.b32.xlu0 %v4813_v15, %s3752_s28 }
 0x1b1   : > { %v4821_v38 = vpop.permute.xlu2 %954 }
 0x1b2   : > { %8174 = vst [vmem:[#allocation171_spill] sm:$0xff] %v4821_v38  ;;  %v4824_v34 = vpop.permute.xlu1 %934  ;;  %v4826_v21 = vpop.permute.xlu0 %938 }
 0x1b3   : > { %8175 = vst [vmem:[#allocation172_spill] sm:$0xff] %v4824_v34 }
 0x1b4   : > { %8176 = vst [vmem:[#allocation173_spill] sm:$0xff] %v4826_v21 }
 0x1b7   : > { %1090 = vrot.lane.b32.xlu2 %v3845_v27, %s3753_s29 }
 0x1b8   : > { %1056 = vrot.lane.b32.xlu1 %v4829_v4, %s3752_s28  ;;  %1092 = vrot.lane.b32.xlu0 %v3816_v14, %s3753_s29 }
 0x1b9   : > { %v4837_v38 = vpop.permute.xlu2 %960 }
 0x1ba   : > { %8177 = vst [vmem:[#allocation174_spill] sm:$0xff] %v4837_v38  ;;  %v4839_v31 = vpop.permute.xlu1 %940  ;;  %v4841_v34 = vpop.permute.xlu0 %944 }
 0x1bb   : > { %8178 = vst [vmem:[#allocation175_spill] sm:$0xff] %v4839_v31 }
 0x1bc   : > { %8179 = vst [vmem:[#allocation176_spill] sm:$0xff] %v4841_v34 }
 0x1bf   : > { %1096 = vrot.lane.b32.xlu2 %v3836_v24, %s3753_s29 }
 0x1c0   : > { %1094 = vrot.lane.b32.xlu1 %v3842_v26, %s3753_s29  ;;  %1098 = vrot.lane.b32.xlu0 %v3887_v49, %s3753_s29 }
 0x1c1   : > { %v4849_v18 = vpop.permute.xlu2 %998 }
 0x1c2   : > { %v4851_v30 = vpop.permute.xlu1 %946  ;;  %v4853_v21 = vpop.permute.xlu0 %950 }
 0x1c3   : > { %8180 = vst [vmem:[#allocation177_spill] sm:$0xff] %v4851_v30 }
 0x1c4   : > { %8181 = vst [vmem:[#allocation178_spill] sm:$0xff] %v4853_v21 }
 0x1c7   : > { %1102 = vrot.lane.b32.xlu2 %v3893_v51, %s3753_s29 }
 0x1c8   : > { %1100 = vrot.lane.b32.xlu1 %v3880_v46, %s3753_s29  ;;  %1104 = vrot.lane.b32.xlu0 %v3890_v50, %s3753_s29 }
 0x1c9   : > { %v4861_v38 = vpop.permute.xlu2 %1004 }
 0x1ca   : > { %v4863_v34 = vpop.permute.xlu1 %952  ;;  %v4865_v31 = vpop.permute.xlu0 %956 }
 0x1cb   : > { %8182 = vst [vmem:[#allocation179_spill] sm:$0xff] %v4863_v34 }
 0x1cc   : > { %8183 = vst [vmem:[#allocation180_spill] sm:$0xff] %v4865_v31 }
 0x1cf   : > { %1108 = vrot.lane.b32.xlu2 %v3917_v63, %s3753_s29 }
 0x1d0   : > { %1106 = vrot.lane.b32.xlu1 %v3920_v2, %s3753_s29  ;;  %1110 = vrot.lane.b32.xlu0 %v3946_v23, %s3753_s29 }
 0x1d1   : > { %v4873_v21 = vpop.permute.xlu2 %1010 }
 0x1d2   : > { %v4875_v30 = vpop.permute.xlu1 %958  ;;  %v4877_v50 = vpop.permute.xlu0 %994 }
 0x1d3   : > { %8184 = vst [vmem:[#allocation181_spill] sm:$0xff] %v4875_v30 }
 0x1d7   : > { %1114 = vrot.lane.b32.xlu2 %v3964_v36, %s3753_s29 }
 0x1d8   : > { %1112 = vrot.lane.b32.xlu1 %v3955_v33, %s3753_s29  ;;  %1116 = vrot.lane.b32.xlu0 %v3961_v35, %s3753_s29 }
 0x1d9   : > { %v4885_v31 = vpop.permute.xlu2 %1016 }
 0x1da   : > { %8185 = vst [vmem:[#allocation182_spill] sm:$0xff] %v4885_v31  ;;  %v4887_v34 = vpop.permute.xlu1 %996  ;;  %v4889_v23 = vpop.permute.xlu0 %1000 }
 0x1df   : > { %1120 = vrot.lane.b32.xlu2 %v3992_v58, %s3753_s29 }
 0x1e0   : > { %1118 = vrot.lane.b32.xlu1 %v3995_v59, %s3753_s29  ;;  %1122 = vrot.lane.b32.xlu0 %v4030_v52, %s3753_s29 }
 0x1e1   : > { %v4897_v30 = vpop.permute.xlu2 %1022 }
 0x1e2   : > { %8186 = vst [vmem:[#allocation183_spill] sm:$0xff] %v4897_v30  ;;  %v4899_v33 = vpop.permute.xlu1 %1002  ;;  %v4901_v63 = vpop.permute.xlu0 %1006 }
 0x1e7   : > { %1126 = vrot.lane.b32.xlu2 %v4036_v6, %s3753_s29 }
 0x1e8   : > { %1124 = vrot.lane.b32.xlu1 %v4024_v41, %s3753_s29  ;;  %1128 = vrot.lane.b32.xlu0 %v4033_v53, %s3753_s29 }
 0x1e9   : > { %v4909_v2 = vpop.permute.xlu2 %1028 }
 0x1ea   : > { %v4911_v31 = vpop.permute.xlu1 %1008  ;;  %v4913_v51 = vpop.permute.xlu0 %1012 }
 0x1eb   : > { %8187 = vst [vmem:[#allocation184_spill] sm:$0xff] %v4913_v51 }
 0x1ef   : > { %1132 = vrot.lane.b32.xlu2 %v4061_v1, %s3753_s29 }
 0x1f0   : > { %1130 = vrot.lane.b32.xlu1 %v4064_v40, %s3753_s29  ;;  %1134 = vrot.lane.b32.xlu0 %v4102_v7, %s3753_s29 }
 0x1f1   : > { %v4921_v30 = vpop.permute.xlu2 %1034 }
 0x1f2   : > { %v4923_v6 = vpop.permute.xlu1 %1014  ;;  %v4925_v53 = vpop.permute.xlu0 %1018 }
 0x1f3   : > { %8188 = vst [vmem:[#allocation185_spill] sm:$0xff] %v4923_v6  ;;  %v8217_v6 = vld [vmem:[#allocation26_spill] sm:$0xff] }
 0x1f4   : > { %8189 = vst [vmem:[#allocation186_spill] sm:$0xff] %v4925_v53  ;;  %v8194_v53 = vmov 0.0  }
 0x1f7   : > { %1138 = vrot.lane.b32.xlu2 %v4108_v8, %s3753_s29 }
 0x1f8   : > { %1136 = vrot.lane.b32.xlu1 %v4096_v29, %s3753_s29  ;;  %1140 = vrot.lane.b32.xlu0 %v4105_v9, %s3753_s29 }
 0x1f9   : > { %v4933_v1 = vpop.permute.xlu2 %1040 }
 0x1fa   : > { %8190 = vst [vmem:[#allocation187_spill] sm:$0xff] %v4933_v1  ;;  %v4935_v40 = vpop.permute.xlu1 %1020  ;;  %v4937_v7 = vpop.permute.xlu0 %1024  ;;  %v8208_v1 = vld [vmem:[#allocation17_spill] sm:$0xff] }
 0x1fb   : > { %8191 = vst [vmem:[#allocation188_spill] sm:$0xff] %v4935_v40  ;;  %v8204_v40 = vld [vmem:[#allocation14_spill] sm:$0xff] }
 0x1fc   : > { %8192 = vst [vmem:[#allocation189_spill] sm:$0xff] %v4937_v7 }
 0x1ff   : > { %1144 = vrot.lane.b32.xlu2 %v4133_v22, %s3753_s29 }
 0x200   : > { %1142 = vrot.lane.b32.xlu1 %v4136_v62, %s3753_s29  ;;  %1146 = vrot.lane.b32.xlu0 %v4537_v16, %s3753_s29 }
 0x201   : > { %v4945_v8 = vpop.permute.xlu2 %1046 }
 0x202   : > { %8193 = vst [vmem:[#allocation190_spill] sm:$0xff] %v4945_v8  ;;  %v4947_v29 = vpop.permute.xlu1 %1026  ;;  %v4949_v9 = vpop.permute.xlu0 %1030  ;;  %v8203_v8 = vld [vmem:[#allocation12_spill] sm:$0xff] }
 0x207   : > { %1150 = vrot.lane.b32.xlu2 %v8194_v53, %s3753_s29 }
 0x208   : > { %1148 = vrot.lane.b32.xlu1 %v4542_v47, %s3753_s29  ;;  %1183 = vrot.lane.b32.xlu0 %v3874_v44, %s3754_s30 }
 0x209   : > { %v4957_v22 = vpop.permute.xlu2 %1052 }
 0x20a   : > { %8195 = vst [vmem:[#allocation191_spill] sm:$0xff] %v4957_v22  ;;  %v4959_v62 = vpop.permute.xlu1 %1032  ;;  %v4961_v16 = vpop.permute.xlu0 %1036  ;;  %v8199_v22 = vld [vmem:[#allocation8_spill] sm:$0xff] }
 0x20b   : > { %8196 = vst [vmem:[#allocation192_spill] sm:$0xff] %v4961_v16  ;;  %v8227_v16 = vld [vmem:[#allocation42_spill] sm:$0xff] }
 0x20f   : > { %1187 = vrot.lane.b32.xlu2 %v3871_v43, %s3754_s30  ;;  %v8200_v43 = vld [vmem:[#allocation9_spill] sm:$0xff] }
 0x210   : > { %1185 = vrot.lane.b32.xlu1 %v3839_v25, %s3754_s30  ;;  %1189 = vrot.lane.b32.xlu0 %v3877_v45, %s3754_s30 }
 0x211   : > { %v4969_v53 = vpop.permute.xlu2 %1090 }
 0x212   : > { %v4971_v47 = vpop.permute.xlu1 %1038  ;;  %v4973_v44 = vpop.permute.xlu0 %1042 }
 0x213   : > { %8197 = vst [vmem:[#allocation193_spill] sm:$0xff] %v4971_v47  ;;  %v8213_v47 = vld [vmem:[#allocation20_spill] sm:$0xff] }
 0x214   : > { %8198 = vst [vmem:[#allocation194_spill] sm:$0xff] %v4973_v44 }
 0x217   : > { %1193 = vrot.lane.b32.xlu2 %v3908_v60, %s3754_s30  ;;  %v8205_v60 = vld [vmem:[#allocation15_spill] sm:$0xff] }
 0x218   : > { %1191 = vrot.lane.b32.xlu1 %v8199_v22, %s3754_s30  ;;  %1195 = vrot.lane.b32.xlu0 %v8200_v43, %s3754_s30 }
 0x219   : > { %v4981_v7 = vpop.permute.xlu2 %1096 }
 0x21a   : > { %v4983_v25 = vpop.permute.xlu1 %1044  ;;  %v4985_v45 = vpop.permute.xlu0 %1048 }
 0x21b   : > { %8201 = vst [vmem:[#allocation8_spill] sm:$0xff] %v4983_v25 }
 0x21c   : > { %8202 = vst [vmem:[#allocation9_spill] sm:$0xff] %v4985_v45  ;;  %v8209_v45 = vld [vmem:[#allocation18_spill] sm:$0xff] }
 0x21f   : > { %1199 = vrot.lane.b32.xlu2 %v8203_v8, %s3754_s30  ;;  %v8210_v8 = vld [vmem:[#allocation19_spill] sm:$0xff] }
 0x220   : > { %1197 = vrot.lane.b32.xlu1 %v8204_v40, %s3754_s30  ;;  %1201 = vrot.lane.b32.xlu0 %v8205_v60, %s3754_s30 }
 0x221   : > { %v4993_v44 = vpop.permute.xlu2 %1102 }
 0x222   : > { %v4995_v22 = vpop.permute.xlu1 %1050  ;;  %v4997_v43 = vpop.permute.xlu0 %1054 }
 0x223   : > { %8206 = vst [vmem:[#allocation12_spill] sm:$0xff] %v4995_v22 }
 0x224   : > { %8207 = vst [vmem:[#allocation14_spill] sm:$0xff] %v4997_v43  ;;  %v8214_v43 = vld [vmem:[#allocation21_spill] sm:$0xff] }
 0x227   : > { %1205 = vrot.lane.b32.xlu2 %v8208_v1, %s3754_s30  ;;  %v8215_v1 = vld [vmem:[#allocation22_spill] sm:$0xff] }
 0x228   : > { %1203 = vrot.lane.b32.xlu1 %v8209_v45, %s3754_s30  ;;  %1207 = vrot.lane.b32.xlu0 %v8210_v8, %s3754_s30 }
 0x229   : > { %v5005_v25 = vpop.permute.xlu2 %1108 }
 0x22a   : > { %8211 = vst [vmem:[#allocation15_spill] sm:$0xff] %v5005_v25  ;;  %v5007_v40 = vpop.permute.xlu1 %1056  ;;  %v5009_v60 = vpop.permute.xlu0 %1092 }
 0x22b   : > { %8212 = vst [vmem:[#allocation17_spill] sm:$0xff] %v5007_v40  ;;  %v8218_v40 = vld [vmem:[#allocation27_spill] sm:$0xff] }
 0x22f   : > { %1211 = vrot.lane.b32.xlu2 %v8213_v47, %s3754_s30  ;;  %v8219_v47 = vld [vmem:[#allocation28_spill] sm:$0xff] }
 0x230   : > { %1209 = vrot.lane.b32.xlu1 %v8214_v43, %s3754_s30  ;;  %1213 = vrot.lane.b32.xlu0 %v8215_v1, %s3754_s30 }
 0x231   : > { %v5017_v22 = vpop.permute.xlu2 %1114 }
 0x232   : > { %8216 = vst [vmem:[#allocation18_spill] sm:$0xff] %v5017_v22  ;;  %v5019_v45 = vpop.permute.xlu1 %1094  ;;  %v5021_v8 = vpop.permute.xlu0 %1098 }
 0x237   : > { %1217 = vrot.lane.b32.xlu2 %v8217_v6, %s3754_s30 }
 0x238   : > { %1215 = vrot.lane.b32.xlu1 %v8218_v40, %s3754_s30  ;;  %1219 = vrot.lane.b32.xlu0 %v8219_v47, %s3754_s30 }
 0x239   : > { %v5029_v25 = vpop.permute.xlu2 %1120 }
 0x23a   : > { %8220 = vst [vmem:[#allocation19_spill] sm:$0xff] %v5029_v25  ;;  %v5031_v43 = vpop.permute.xlu1 %1100  ;;  %v5033_v1 = vpop.permute.xlu0 %1104  ;;  %v8222_v25 = vld [vmem:[#allocation38_spill] sm:$0xff] }
 0x23f   : > { %1223 = vrot.lane.b32.xlu2 %v8113_v12, %s3754_s30  ;;  %v8223_v12 = vld [vmem:[#allocation39_spill] sm:$0xff] }
 0x240   : > { %1221 = vrot.lane.b32.xlu1 %v8114_v48, %s3754_s30  ;;  %1225 = vrot.lane.b32.xlu0 %v8115_v19, %s3754_s30 }
 0x241   : > { %v5041_v6 = vpop.permute.xlu2 %1126 }
 0x242   : > { %v5043_v40 = vpop.permute.xlu1 %1106  ;;  %v5045_v47 = vpop.permute.xlu0 %1110 }
 0x243   : > { %8221 = vst [vmem:[#allocation20_spill] sm:$0xff] %v5045_v47  ;;  %v8228_v47 = vld [vmem:[#allocation43_spill] sm:$0xff] }
 0x247   : > { %1229 = vrot.lane.b32.xlu2 %v4124_v54, %s3754_s30  ;;  %v8229_v54 = vld [vmem:[#allocation44_spill] sm:$0xff] }
 0x248   : > { %1227 = vrot.lane.b32.xlu1 %v8222_v25, %s3754_s30  ;;  %1231 = vrot.lane.b32.xlu0 %v8223_v12, %s3754_s30 }
 0x249   : > { %v5053_v22 = vpop.permute.xlu2 %1132 }
 0x24a   : > { %8224 = vst [vmem:[#allocation21_spill] sm:$0xff] %v5053_v22  ;;  %v5055_v48 = vpop.permute.xlu1 %1112  ;;  %v5057_v19 = vpop.permute.xlu0 %1116  ;;  %v8232_v22 = vld [vmem:[#allocation152_spill] sm:$0xff] }
 0x24b   : > { %8225 = vst [vmem:[#allocation22_spill] sm:$0xff] %v5055_v48 }
 0x24c   : > { %8226 = vst [vmem:[#allocation26_spill] sm:$0xff] %v5057_v19  ;;  %v8233_v19 = vld [vmem:[#allocation153_spill] sm:$0xff] }
 0x24f   : > { %1235 = vrot.lane.b32.xlu2 %v8227_v16, %s3754_s30  ;;  %v8234_v16 = vld [vmem:[#allocation2_spill] sm:$0xff] }
 0x250   : > { %1233 = vrot.lane.b32.xlu1 %v8228_v47, %s3754_s30  ;;  %1237 = vrot.lane.b32.xlu0 %v8229_v54, %s3754_s30 }
 0x251   : > { %v5065_v51 = vpop.permute.xlu2 %1138 }
 0x252   : > { %8230 = vst [vmem:[#allocation27_spill] sm:$0xff] %v5065_v51  ;;  %v5067_v25 = vpop.permute.xlu1 %1118  ;;  %v5069_v12 = vpop.permute.xlu0 %1122 }
 0x253   : > { %8231 = vst [vmem:[#allocation28_spill] sm:$0xff] %v5067_v25  ;;  %v8240_v25 = vld [vmem:[#allocation52_spill] sm:$0xff] }
 0x257   : > { %1241 = vrot.lane.b32.xlu2 %v8232_v22, %s3754_s30 }
 0x258   : > { %1239 = vrot.lane.b32.xlu1 %v8233_v19, %s3754_s30  ;;  %1243 = vrot.lane.b32.xlu0 %v8234_v16, %s3754_s30 }
 0x259   : > { %v5077_v48 = vpop.permute.xlu2 %1144 }
 0x25a   : > { %8235 = vst [vmem:[#allocation38_spill] sm:$0xff] %v5077_v48  ;;  %v5079_v47 = vpop.permute.xlu1 %1124  ;;  %v5081_v54 = vpop.permute.xlu0 %1128  ;;  %v8239_v48 = vld [vmem:[#allocation51_spill] sm:$0xff] }
 0x25f   : > { %1278 = vrot.lane.b32.xlu2 %v8136_v3, %s3755_s6 }
 0x260   : > { %1276 = vrot.lane.b32.xlu1 %v8134_v42, %s3755_s6  ;;  %1280 = vrot.lane.b32.xlu0 %v4199_v56, %s3755_s6 }
 0x261   : > { %v5089_v22 = vpop.permute.xlu2 %1150 }
 0x262   : > { %8236 = vst [vmem:[#allocation39_spill] sm:$0xff] %v5089_v22  ;;  %v5091_v19 = vpop.permute.xlu1 %1130  ;;  %v5093_v16 = vpop.permute.xlu0 %1134  ;;  %v8243_v22 = vld [vmem:[#allocation56_spill] sm:$0xff] }
 0x263   : > { %8237 = vst [vmem:[#allocation42_spill] sm:$0xff] %v5091_v19 }
 0x264   : > { %8238 = vst [vmem:[#allocation43_spill] sm:$0xff] %v5093_v16  ;;  %v8247_v16 = vld [vmem:[#allocation60_spill] sm:$0xff] }
 0x267   : > { %1284 = vrot.lane.b32.xlu2 %v8239_v48, %s3755_s6  ;;  %v8244_v48 = vld [vmem:[#allocation57_spill] sm:$0xff] }
 0x268   : > { %1282 = vrot.lane.b32.xlu1 %v8240_v25, %s3755_s6  ;;  %1286 = vrot.lane.b32.xlu0 %v8144_v0, %s3755_s6 }
 0x269   : > { %v5101_v3 = vpop.permute.xlu2 %1187 }
 0x26a   : > { %v5103_v42 = vpop.permute.xlu1 %1136  ;;  %v5105_v56 = vpop.permute.xlu0 %1140 }
 0x26b   : > { %8241 = vst [vmem:[#allocation44_spill] sm:$0xff] %v5103_v42  ;;  %v8262_v42 = vld [vmem:[#allocation88_spill] sm:$0xff] }
 0x26c   : > { %8242 = vst [vmem:[#allocation152_spill] sm:$0xff] %v5105_v56  ;;  %v8248_v56 = vld [vmem:[#allocation61_spill] sm:$0xff] }
 0x26f   : > { %1290 = vrot.lane.b32.xlu2 %v8145_v28, %s3755_s6 }
 0x270   : > { %1288 = vrot.lane.b32.xlu1 %v8243_v22, %s3755_s6  ;;  %1292 = vrot.lane.b32.xlu0 %v8244_v48, %s3755_s6 }
 0x271   : > { %v5113_v51 = vpop.permute.xlu2 %1193 }
 0x272   : > { %v5115_v25 = vpop.permute.xlu1 %1142  ;;  %v5117_v0 = vpop.permute.xlu0 %1146 }
 0x273   : > { %8245 = vst [vmem:[#allocation153_spill] sm:$0xff] %v5115_v25  ;;  %v8253_v25 = vld [vmem:[#allocation72_spill] sm:$0xff] }
 0x274   : > { %8246 = vst [vmem:[#allocation2_spill] sm:$0xff] %v5117_v0  ;;  %v8251_v0 = vld [vmem:[#allocation67_spill] sm:$0xff] }
 0x277   : > { %1296 = vrot.lane.b32.xlu2 %v8247_v16, %s3755_s6 }
 0x278   : > { %1294 = vrot.lane.b32.xlu1 %v8248_v56, %s3755_s6  ;;  %1298 = vrot.lane.b32.xlu0 %v8154_v20, %s3755_s6 }
 0x279   : > { %v5125_v28 = vpop.permute.xlu2 %1199 }
 0x27a   : > { %8249 = vst [vmem:[#allocation51_spill] sm:$0xff] %v5125_v28  ;;  %v5127_v22 = vpop.permute.xlu1 %1148  ;;  %v5129_v48 = vpop.permute.xlu0 %1183 }
 0x27b   : > { %8250 = vst [vmem:[#allocation52_spill] sm:$0xff] %v5127_v22  ;;  %v8254_v22 = vld [vmem:[#allocation73_spill] sm:$0xff] }
 0x27f   : > { %1302 = vrot.lane.b32.xlu2 %v8155_v37, %s3755_s6 }
 0x280   : > { %1300 = vrot.lane.b32.xlu1 %v8251_v0, %s3755_s6  ;;  %1304 = vrot.lane.b32.xlu0 %v8159_v17, %s3755_s6 }
 0x281   : > { %v5137_v16 = vpop.permute.xlu2 %1205 }
 0x282   : > { %8252 = vst [vmem:[#allocation56_spill] sm:$0xff] %v5137_v16  ;;  %v5139_v56 = vpop.permute.xlu1 %1185  ;;  %v5141_v20 = vpop.permute.xlu0 %1189  ;;  %v8256_v16 = vld [vmem:[#allocation79_spill] sm:$0xff] }
 0x287   : > { %1308 = vrot.lane.b32.xlu2 %v8253_v25, %s3755_s6 }
 0x288   : > { %1306 = vrot.lane.b32.xlu1 %v8254_v22, %s3755_s6  ;;  %1310 = vrot.lane.b32.xlu0 %v8163_v11, %s3755_s6 }
 0x289   : > { %v5149_v37 = vpop.permute.xlu2 %1211 }
 0x28a   : > { %8255 = vst [vmem:[#allocation57_spill] sm:$0xff] %v5149_v37  ;;  %v5151_v0 = vpop.permute.xlu1 %1191  ;;  %v5153_v17 = vpop.permute.xlu0 %1195  ;;  %v8261_v37 = vld [vmem:[#allocation87_spill] sm:$0xff] }
 0x28f   : > { %1314 = vrot.lane.b32.xlu2 %v8164_v13, %s3755_s6 }
 0x290   : > { %1312 = vrot.lane.b32.xlu1 %v8256_v16, %s3755_s6  ;;  %1316 = vrot.lane.b32.xlu0 %v8168_v57, %s3755_s6 }
 0x291   : > { %v5161_v25 = vpop.permute.xlu2 %1217 }
 0x292   : > { %v5163_v22 = vpop.permute.xlu1 %1197  ;;  %v5165_v11 = vpop.permute.xlu0 %1201 }
 0x293   : > { %8257 = vst [vmem:[#allocation60_spill] sm:$0xff] %v5165_v11 }
 0x297   : > { %1320 = vrot.lane.b32.xlu2 %v4361_v32, %s3755_s6 }
 0x298   : > { %1318 = vrot.lane.b32.xlu1 %v4364_v55, %s3755_s6  ;;  %1322 = vrot.lane.b32.xlu0 %v4367_v39, %s3755_s6 }
 0x299   : > { %v5173_v13 = vpop.permute.xlu2 %1223 }
 0x29a   : > { %8258 = vst [vmem:[#allocation61_spill] sm:$0xff] %v5173_v13  ;;  %v5175_v16 = vpop.permute.xlu1 %1203  ;;  %v5177_v57 = vpop.permute.xlu0 %1207  ;;  %v8279_v13 = vld [vmem:[#allocation125_spill] sm:$0xff] }
 0x29b   : > { %8259 = vst [vmem:[#allocation67_spill] sm:$0xff] %v5175_v16 }
 0x29c   : > { %8260 = vst [vmem:[#allocation72_spill] sm:$0xff] %v5177_v57 }
 0x29f   : > { %1326 = vrot.lane.b32.xlu2 %v8261_v37, %s3755_s6 }
 0x2a0   : > { %1324 = vrot.lane.b32.xlu1 %v8262_v42, %s3755_s6  ;;  %1328 = vrot.lane.b32.xlu0 %v4393_v61, %s3755_s6 }
 0x2a1   : > { %v5185_v32 = vpop.permute.xlu2 %1229 }
 0x2a2   : > { %8263 = vst [vmem:[#allocation73_spill] sm:$0xff] %v5185_v32  ;;  %v5187_v55 = vpop.permute.xlu1 %1209  ;;  %v5189_v39 = vpop.permute.xlu0 %1213 }
 0x2a3   : > { %8264 = vst [vmem:[#allocation79_spill] sm:$0xff] %v5187_v55  ;;  %v1635_v55 = vld [vmem:[%s7721_s1 + $0x20] sm:$0xf] }
 0x2a4   : > { %8265 = vst [vmem:[#allocation87_spill] sm:$0xff] %v5189_v39  ;;  %3608 = vmatpush.msk.msra.mxu0 %vm1737_vm3, %v1635_v55  ;;  %3678 = vmatpush.msk.msra.mxu2 %vm1737_vm3, %v1635_v55  ;;  %v8267_v39 = vld [vmem:[#allocation46_spill] sm:$0xff] }
 0x2a7   : > { %1332 = vrot.lane.b32.xlu2 %v4813_v15, %s3755_s6  ;;  %v1634_v15 = vld [vmem:[%s7721_s1 + $0x18] sm:$0xff] }
 0x2a8   : > { %1330 = vrot.lane.b32.xlu1 %v4409_v5, %s3755_s6  ;;  %1334 = vrot.lane.b32.xlu0 %v4829_v4, %s3755_s6  ;;  %v1633_v5 = vld [vmem:[%s7721_s1 + $0x10] sm:$0xff]  ;;  %v1632_v4 = vld [vmem:[%s7721_s1 + $0x8] sm:$0xff] }
 0x2a9   : > { %v5197_v37 = vpop.permute.xlu2 %1235  ;;  %1753 = vmatpush.msra.mxu0 %v1634_v15  ;;  %3679 = vmatpush.msra.mxu2 %v1634_v15  ;;  %v1631_v15 = vld [vmem:[%s7721_s1] sm:$0xff] }
 0x2aa   : > { %8266 = vst [vmem:[#allocation88_spill] sm:$0xff] %v5197_v37  ;;  %v5199_v42 = vpop.permute.xlu1 %1215  ;;  %v5201_v61 = vpop.permute.xlu0 %1219 }
 0x2ab   : > { %1754 = vmatpush.msra.mxu0 %v1633_v5  ;;  %3680 = vmatpush.msra.mxu2 %v1633_v5 }
 0x2ad   : > { %1755 = vmatpush.msra.mxu0 %v1632_v4  ;;  %3681 = vmatpush.msra.mxu2 %v1632_v4 }
 0x2af   : > { %1756 = vmatpush.msra.mxu0 %v1631_v15  ;;  %3682 = vmatpush.msra.mxu2 %v1631_v15  ;;  %v8276_v15 = vld [vmem:[#allocation58_spill] sm:$0xff] }
 0x2b0   : > { %1336 = vrot.lane.b32.xlu1 %v8267_v39, %s3755_s6  ;;  %v1370_v46 = vsel %vm1369_vm4, 0.0, %v8276_v15 }
 0x2b1   : > { %v5219_v37 = vpop.permute.xlu2 %1241 }
 0x2b2   : > { %8268 = vst [vmem:[#allocation46_spill] sm:$0xff] %v5219_v37  ;;  %v5221_v55 = vpop.permute.xlu1 %1221  ;;  %v5223_v57 = vpop.permute.xlu0 %1225 }
 0x2b3   : > { %8269 = vst [vmem:[#allocation195_spill] sm:$0xff] %v5223_v57 }
 0x2b9   : > { %v1279_v32 = vpop.permute.xlu2 %1278 }
 0x2ba   : > { %v5228_v16 = vpop.permute.xlu1 %1227  ;;  %v5230_v5 = vpop.permute.xlu0 %1231 }
 0x2bb   : > { %8270 = vst [vmem:[#allocation196_spill] sm:$0xff] %v5228_v16  ;;  %v8277_v16 = vld [vmem:[#allocation105_spill] sm:$0xff] }
 0x2bc   : > { %8271 = vst [vmem:[#allocation197_spill] sm:$0xff] %v5230_v5  ;;  %v5248_v5 = vsel %vm1401_vm6, %v1370_v46, %v8277_v16 }
 0x2bd   : > { %8278 = vst [vmem:[#allocation58_spill] sm:$0xff] %v5248_v5 }
 0x2c1   : > { %v5232_v39 = vpop.permute.xlu2 %1284 }
 0x2c2   : > { %v5234_v37 = vpop.permute.xlu1 %1233  ;;  %v5236_v4 = vpop.permute.xlu0 %1237 }
 0x2c3   : > { %8272 = vst [vmem:[#allocation198_spill] sm:$0xff] %v5234_v37  ;;  %v8280_v37 = vld [vmem:[#allocation161_spill] sm:$0xff] }
 0x2c4   : > { %8273 = vst [vmem:[#allocation199_spill] sm:$0xff] %v5236_v4  ;;  %v1434_v4 = vsel %vm1433_vm5, %v5248_v5, %v8279_v13 }
 0x2c9   : > { %v5238_v11 = vpop.permute.xlu2 %1290 }
 0x2ca   : > { %v5240_v57 = vpop.permute.xlu1 %1239  ;;  %v5242_v41 = vpop.permute.xlu0 %1243 }
 0x2cb   : > { %8274 = vst [vmem:[#allocation200_spill] sm:$0xff] %v5240_v57  ;;  %v1467_v57 = vsel %vm1466_vm7, %v1434_v4, %v8280_v37  ;;  %v8282_v37 = vld [vmem:[#allocation136_spill] sm:$0xff] }
 0x2cc   : > { %8275 = vst [vmem:[#allocation201_spill] sm:$0xff] %v5242_v41  ;;  %v1500_v41 = vsel %vm1499_vm9, %v1467_v57, %v4877_v50  ;;  %v1435_v50 = vsel %vm1433_vm5, %v5248_v5, %v8282_v37  ;;  %v8283_v57 = vld [vmem:[#allocation49_spill] sm:$0xff]  ;;  %v8287_v5 = vld [vmem:[#allocation3_spill] sm:$0xff] }
 0x2cd   : > { %v1533_v15 = vsel %vm1532_vm8, %v1500_v41, %v4969_v53  ;;  %v1468_v41 = vsel %vm1466_vm7, %v1435_v50, %v8283_v57  ;;  %v8286_v57 = vld [vmem:[#allocation65_spill] sm:$0xff] }
 0x2ce   : > { %v1566_v46 = vsel %vm1565_vm10, %v1533_v15, %v5129_v48  ;;  %v1501_v53 = vsel %vm1499_vm9, %v1468_v41, %v4887_v34  ;;  %v1371_v34 = vsel %vm1369_vm4, %v8287_v5, %v8286_v57  ;;  %v8288_v41 = vld [vmem:[#allocation120_spill] sm:$0xff] }
 0x2cf   : > { %v1534_v48 = vsel %vm1532_vm8, %v1501_v53, %v5009_v60  ;;  %v8289_v53 = vld [vmem:[#allocation95_spill] sm:$0xff] }
 0x2d0   : > { %v1567_v15 = vsel %vm1565_vm10, %v1534_v48, %v5139_v56  ;;  %v1403_v56 = vsel %vm1401_vm6, %v1371_v34, %v8289_v53  ;;  %v8290_v48 = vld [vmem:[#allocation148_spill] sm:$0xff] }
 0x2d1   : > { %v5259_v28 = vpop.permute.xlu2 %1296  ;;  %v1600_v50 = vsel %vm1598_vm12, %v1567_v15, %v1279_v32  ;;  %v8293_v15 = vld [vmem:[#allocation162_spill] sm:$0xff] }
 0x2d2   : > { %8281 = vst [vmem:[#allocation105_spill] sm:$0xff] %v5259_v28  ;;  %v1277_v13 = vpop.permute.xlu1 %1276  ;;  %v1281_v16 = vpop.permute.xlu0 %1280  ;;  %v8291_v28 = vld [vmem:[#allocation138_spill] sm:$0xff] }
 0x2d3   : > { %v1599_v19 = vsel %vm1598_vm12, %v1566_v46, %v1277_v13  ;;  %v8285_v13 = vld [vmem:[#allocation86_spill] sm:$0xff] }
 0x2d4   : > { %3609 = vmatmul.msk.f32.vlgmr.msra.gmra.mxu0 %vm1640_vm11, %v1599_v19  ;;  %v1385_v37 = vsel %vm1369_vm4, %v3964_v36, %v8285_v13  ;;  %v1436_v36 = vsel %vm1433_vm5, %v1403_v56, %v8291_v28  ;;  %v8292_v13 = vld [vmem:[#allocation68_spill] sm:$0xff] }
 0x2d5   : > { %v1417_v60 = vsel %vm1401_vm6, %v1385_v37, %v8288_v41  ;;  %v1469_v5 = vsel %vm1466_vm7, %v1436_v36, %v8293_v15  ;;  %v8295_v56 = vld [vmem:[#allocation4_spill] sm:$0xff] }
 0x2d9   : > { %v5274_v4 = vpop.permute.xlu2 %1302 }
 0x2da   : > { %8284 = vst [vmem:[#allocation125_spill] sm:$0xff] %v5274_v4  ;;  %v1283_v46 = vpop.permute.xlu1 %1282  ;;  %v5278_v19 = vpop.permute.xlu0 %1286  ;;  %v1450_v4 = vsel %vm1433_vm5, %v1417_v60, %v8290_v48 }
 0x2db   : > { %v1483_v32 = vsel %vm1466_vm7, %v1450_v4, %v8292_v13  ;;  %v8298_v13 = vld [vmem:[#allocation66_spill] sm:$0xff] }
 0x2dc   : > { %3610 = vmatmul.msk.f32.gmra.mxu0 %vm1640_vm11, %v1600_v50  ;;  %v1516_v37 = vsel %vm1499_vm9, %v1483_v32, %v4947_v29  ;;  %v1502_v50 = vsel %vm1499_vm9, %v1469_v5, %v4849_v18 }
 0x2dd   : > { %v1549_v57 = vsel %vm1532_vm8, %v1516_v37, %v5069_v12  ;;  %v1535_v34 = vsel %vm1532_vm8, %v1502_v50, %v5019_v45  ;;  %v8294_v12 = vld [vmem:[#allocation64_spill] sm:$0xff] }
 0x2de   : > { %v1582_v28 = vsel %vm1565_vm10, %v1549_v57, %v5199_v42  ;;  %v1568_v4 = vsel %vm1565_vm10, %v1535_v34, %v5101_v3  ;;  %v1372_v45 = vsel %vm1369_vm4, %v8295_v56, %v8294_v12  ;;  %v8296_v42 = vld [vmem:[#allocation106_spill] sm:$0xff]  ;;  %v8297_v3 = vld [vmem:[#allocation128_spill] sm:$0xff] }
 0x2df   : > { %v1601_v18 = vsel %vm1598_vm12, %v1568_v4, %v1281_v16  ;;  %v1404_v48 = vsel %vm1401_vm6, %v1372_v45, %v8296_v42  ;;  %v8299_v34 = vld [vmem:[#allocation70_spill] sm:$0xff]  ;;  %v8301_v4 = vld [vmem:[#allocation139_spill] sm:$0xff] }
 0x2e0   : > { %v1437_v36 = vsel %vm1433_vm5, %v1404_v48, %v8297_v3  ;;  %v8303_v42 = vld [vmem:[#allocation50_spill] sm:$0xff] }
 0x2e1   : > { %v1309_v41 = vpop.permute.xlu2 %1308  ;;  %v1470_v32 = vsel %vm1466_vm7, %v1437_v36, %v8298_v13  ;;  %v1374_v48 = vsel %vm1369_vm4, %v3816_v14, %v8303_v42  ;;  %v8304_v3 = vld [vmem:[#allocation90_spill] sm:$0xff]  ;;  %v8316_v42 = vld [vmem:[#allocation164_spill] sm:$0xff] }
 0x2e2   : > { %v5312_v60 = vpop.permute.xlu1 %1288  ;;  %v5314_v53 = vpop.permute.xlu0 %1292  ;;  %v1615_v29 = vsel %vm1598_vm12, %v1582_v28, %v1309_v41  ;;  %v1503_v16 = vsel %vm1499_vm9, %v1470_v32, %v4889_v23  ;;  %v1373_v28 = vsel %vm1369_vm4, %v3845_v27, %v8299_v34  ;;  %v8300_v41 = vld [vmem:[#allocation108_spill] sm:$0xff]  ;;  %v8306_v36 = vld [vmem:[#allocation110_spill] sm:$0xff]  ;;  %v8307_v32 = vld [vmem:[#allocation141_spill] sm:$0xff] }
 0x2e3   : > { %3625 = vmatmul.msk.f32.vlgmr.msra.gmra.mxu2 %vm1640_vm11, %v1615_v29  ;;  %v1536_v15 = vsel %vm1532_vm8, %v1503_v16, %v4981_v7  ;;  %v1405_v23 = vsel %vm1401_vm6, %v1373_v28, %v8300_v41  ;;  %v8302_v29 = vld [vmem:[#allocation156_spill] sm:$0xff] }
 0x2e4   : > { %3611 = vmatmul.msk.f32.gmra.mxu0 %vm1640_vm11, %v1601_v18  ;;  %v1569_v5 = vsel %vm1565_vm10, %v1536_v15, %v5141_v20  ;;  %v1438_v7 = vsel %vm1433_vm5, %v1405_v23, %v8301_v4 }
 0x2e5   : > { %v1602_v57 = vsel %vm1598_vm12, %v1569_v5, %v1283_v46  ;;  %v1471_v20 = vsel %vm1466_vm7, %v1438_v7, %v8302_v29  ;;  %v8309_v5 = vld [vmem:[#allocation163_spill] sm:$0xff]  ;;  %v8310_v29 = vld [vmem:[#allocation54_spill] sm:$0xff] }
 0x2e6   : > { %v1504_v18 = vsel %vm1499_vm9, %v1471_v20, %v4899_v33  ;;  %v1386_v33 = vsel %vm1369_vm4, %v3961_v35, %v8304_v3  ;;  %v8311_v20 = vld [vmem:[#allocation75_spill] sm:$0xff] }
 0x2e7   : > { %v1537_v46 = vsel %vm1532_vm8, %v1504_v18, %v5021_v8  ;;  %v8305_v8 = vld [vmem:[#allocation98_spill] sm:$0xff]  ;;  %v1418_v13 = vsel %vm1401_vm6, %v1386_v33, %v8306_v36  ;;  %v8313_v18 = vld [vmem:[#allocation121_spill] sm:$0xff] }
 0x2e8   : > { %v1570_v27 = vsel %vm1565_vm10, %v1537_v46, %v5151_v0  ;;  %v1406_v0 = vsel %vm1401_vm6, %v1374_v48, %v8305_v8  ;;  %v8314_v46 = vld [vmem:[#allocation131_spill] sm:$0xff] }
 0x2e9   : > { %v1603_v45 = vsel %vm1598_vm12, %v1570_v27, %v5232_v39  ;;  %v1439_v16 = vsel %vm1433_vm5, %v1406_v0, %v8307_v32  ;;  %v8308_v39 = vld [vmem:[#allocation150_spill] sm:$0xff] }
 0x2ea   : > { %v5335_v37 = vpop.permute.xlu1 %1294  ;;  %v5337_v50 = vpop.permute.xlu0 %1298  ;;  %v1451_v15 = vsel %vm1433_vm5, %v1418_v13, %v8308_v39  ;;  %v1472_v14 = vsel %vm1466_vm7, %v1439_v16, %v8309_v5  ;;  %v8321_v5 = vld [vmem:[#allocation123_spill] sm:$0xff] }
 0x2eb   : > { %v1484_v35 = vsel %vm1466_vm7, %v1451_v15, %v4810_v10  ;;  %v8318_v15 = vld [vmem:[#allocation71_spill] sm:$0xff] }
 0x2ec   : > { %3612 = vmatmul.msk.f32.gmra.mxu0 %vm1640_vm11, %v1602_v57  ;;  %v1505_v57 = vsel %vm1499_vm9, %v1472_v14, %v4861_v38  ;;  %v1517_v34 = vsel %vm1499_vm9, %v1484_v35, %v4909_v2  ;;  %v8322_v14 = vld [vmem:[#allocation142_spill] sm:$0xff] }
 0x2ed   : > { %v1538_v28 = vsel %vm1532_vm8, %v1505_v57, %v5031_v43  ;;  %v1550_v41 = vsel %vm1532_vm8, %v1517_v34, %v5079_v47  ;;  %v1375_v43 = vsel %vm1369_vm4, %v3842_v26, %v8310_v29  ;;  %v1387_v47 = vsel %vm1369_vm4, %v3995_v59, %v8311_v20  ;;  %v8317_v59 = vld [vmem:[#allocation172_spill] sm:$0xff]  ;;  %v8323_v57 = vld [vmem:[#allocation151_spill] sm:$0xff]  ;;  %v8324_v34 = vld [vmem:[#allocation53_spill] sm:$0xff] }
 0x2ee   : > { %v1571_v23 = vsel %vm1565_vm10, %v1538_v28, %v5113_v51  ;;  %v1583_v4 = vsel %vm1565_vm10, %v1550_v41, %v5161_v25  ;;  %v8312_v51 = vld [vmem:[#allocation109_spill] sm:$0xff] }
 0x2ef   : > { %v1604_v38 = vsel %vm1598_vm12, %v1571_v23, %v5278_v19  ;;  %v1407_v25 = vsel %vm1401_vm6, %v1375_v43, %v8312_v51  ;;  %v1419_v19 = vsel %vm1401_vm6, %v1387_v47, %v8313_v18  ;;  %v8326_v47 = vld [vmem:[#allocation76_spill] sm:$0xff]  ;;  %v8327_v51 = vld [vmem:[#allocation93_spill] sm:$0xff] }
 0x2f0   : > { %v1440_v27 = vsel %vm1433_vm5, %v1407_v25, %v8314_v46  ;;  %v8330_v25 = vld [vmem:[#allocation144_spill] sm:$0xff]  ;;  %v8332_v46 = vld [vmem:[#allocation165_spill] sm:$0xff] }
 0x2f1   : > { %v1473_v48 = vsel %vm1466_vm7, %v1440_v27, %v8316_v42 }
 0x2f2   : > { %v5356_v12 = vpop.permute.xlu1 %1300  ;;  %v5358_v56 = vpop.permute.xlu0 %1304  ;;  %v1506_v33 = vsel %vm1499_vm9, %v1473_v48, %v4901_v63 }
 0x2f3   : > { %v1539_v0 = vsel %vm1532_vm8, %v1506_v33, %v4993_v44  ;;  %v8319_v44 = vld [vmem:[#allocation91_spill] sm:$0xff] }
 0x2f4   : > { %3613 = vmatmul.msk.f32.gmra.mxu0 %vm1640_vm11, %v1603_v45  ;;  %v8315_v45 = vld [vmem:[#allocation143_spill] sm:$0xff]  ;;  %v1572_v13 = vsel %vm1565_vm10, %v1539_v0, %v5153_v17 }
 0x2f5   : > { %v1452_v26 = vsel %vm1433_vm5, %v1419_v19, %v8315_v45  ;;  %v1605_v39 = vsel %vm1598_vm12, %v1572_v13, %v5312_v60  ;;  %v8320_v17 = vld [vmem:[#allocation111_spill] sm:$0xff]  ;;  %v8331_v19 = vld [vmem:[#allocation154_spill] sm:$0xff] }
 0x2f6   : > { %v1485_v3 = vsel %vm1466_vm7, %v1452_v26, %v8317_v59 }
 0x2f7   : > { %v1518_v8 = vsel %vm1499_vm9, %v1485_v3, %v4949_v9  ;;  %v1376_v9 = vsel %vm1369_vm4, %v3836_v24, %v8318_v15  ;;  %v8334_v3 = vld [vmem:[#allocation42_spill] sm:$0xff] }
 0x2f8   : > { %v1551_v36 = vsel %vm1532_vm8, %v1518_v8, %v5041_v6  ;;  %v1388_v6 = vsel %vm1369_vm4, %v3992_v58, %v8319_v44  ;;  %v8325_v58 = vld [vmem:[#allocation74_spill] sm:$0xff]  ;;  %v8335_v8 = vld [vmem:[#allocation51_spill] sm:$0xff] }
 0x2f9   : > { %v1584_v32 = vsel %vm1565_vm10, %v1551_v36, %v5201_v61  ;;  %v1408_v61 = vsel %vm1401_vm6, %v1376_v9, %v8320_v17  ;;  %v1420_v60 = vsel %vm1401_vm6, %v1388_v6, %v8321_v5  ;;  %v8336_v36 = vld [vmem:[#allocation61_spill] sm:$0xff]  ;;  %v8341_v9 = vld [vmem:[#allocation112_spill] sm:$0xff]  ;;  %v8343_v17 = vld [vmem:[#allocation134_spill] sm:$0xff] }
 0x2fa   : > { %v5393_v7 = vpop.permute.xlu1 %1306  ;;  %v1311_v10 = vpop.permute.xlu0 %1310  ;;  %v1441_v35 = vsel %vm1433_vm5, %v1408_v61, %v8322_v14  ;;  %v1453_v24 = vsel %vm1433_vm5, %v1420_v60, %v8323_v57  ;;  %v8342_v6 = vld [vmem:[#allocation124_spill] sm:$0xff]  ;;  %v8344_v5 = vld [vmem:[#allocation31_spill] sm:$0xff]  ;;  %v8345_v14 = vld [vmem:[#allocation78_spill] sm:$0xff] }
 0x2fb   : > { %v1616_v2 = vsel %vm1598_vm12, %v1583_v4, %v1311_v10  ;;  %v1474_v28 = vsel %vm1466_vm7, %v1441_v35, %v8324_v34  ;;  %v1486_v41 = vsel %vm1466_vm7, %v1453_v24, %v8325_v58  ;;  %v1315_v10 = vpop.permute.xlu2 %1314  ;;  %v8346_v57 = vld [vmem:[#allocation175_spill] sm:$0xff]  ;;  %v8347_v34 = vld [vmem:[#allocation184_spill] sm:$0xff] }
 0x2fc   : > { %3614 = vmatmul.msk.f32.gmra.mxu0 %vm1640_vm11, %v1604_v38  ;;  %3626 = vmatmul.msk.f32.gmra.mxu2 %vm1640_vm11, %v1616_v2  ;;  %v1507_v23 = vsel %vm1499_vm9, %v1474_v28, %v4911_v31  ;;  %v1519_v4 = vsel %vm1499_vm9, %v1486_v41, %v4959_v62  ;;  %v1377_v62 = vsel %vm1369_vm4, %v3887_v49, %v8326_v47  ;;  %v8348_v58 = vld [vmem:[#allocation192_spill] sm:$0xff] }
 0x2fd   : > { %v1540_v38 = vsel %vm1532_vm8, %v1507_v23, %v5033_v1  ;;  %v1552_v2 = vsel %vm1532_vm8, %v1519_v4, %v5081_v54  ;;  %v1389_v1 = vsel %vm1369_vm4, %v4030_v52, %v8327_v51  ;;  %v8328_v54 = vld [vmem:[#allocation101_spill] sm:$0xff]  ;;  %v8349_v4 = vld [vmem:[#allocation15_spill] sm:$0xff] }
 0x2fe   : > { %v1573_v29 = vsel %vm1565_vm10, %v1540_v38, %v5163_v22  ;;  %v1585_v43 = vsel %vm1565_vm10, %v1552_v2, %v5221_v55  ;;  %v1409_v22 = vsel %vm1401_vm6, %v1377_v62, %v8328_v54  ;;  %v8329_v55 = vld [vmem:[#allocation113_spill] sm:$0xff] }
 0x2ff   : > { %v1606_v20 = vsel %vm1598_vm12, %v1573_v29, %v5238_v11  ;;  %v1618_v31 = vsel %vm1598_vm12, %v1585_v43, %v1315_v10  ;;  %v1421_v11 = vsel %vm1401_vm6, %v1389_v1, %v8329_v55  ;;  %v1442_v18 = vsel %vm1433_vm5, %v1409_v22, %v8330_v25  ;;  %v8333_v52 = vld [vmem:[#allocation173_spill] sm:$0xff]  ;;  %v8351_v29 = vld [vmem:[#allocation60_spill] sm:$0xff]  ;;  %v8354_v1 = vld [vmem:[#allocation7_spill] sm:$0xff] }
 0x300   : > { %v1454_v49 = vsel %vm1433_vm5, %v1421_v11, %v8331_v19  ;;  %v1475_v27 = vsel %vm1466_vm7, %v1442_v18, %v8332_v46  ;;  %v8350_v38 = vld [vmem:[#allocation21_spill] sm:$0xff]  ;;  %v8355_v22 = vld [vmem:[#allocation94_spill] sm:$0xff] }
 0x301   : > { %v1487_v45 = vsel %vm1466_vm7, %v1454_v49, %v8333_v52  ;;  %v1508_v26 = vsel %vm1499_vm9, %v1475_v27, %v4873_v21  ;;  %v8353_v51 = vld [vmem:[#allocation77_spill] sm:$0xff]  ;;  %v8357_v25 = vld [vmem:[#allocation114_spill] sm:$0xff]  ;;  %v8360_v27 = vld [vmem:[#allocation155_spill] sm:$0xff] }
 0x302   : > { %v1313_v16 = vpop.permute.xlu1 %1312  ;;  %v1520_v42 = vsel %vm1499_vm9, %v1487_v45, %v4921_v30  ;;  %v1317_v48 = vpop.permute.xlu0 %1316  ;;  %v1541_v59 = vsel %vm1532_vm8, %v1508_v26, %v5043_v40  ;;  %v8338_v30 = vld [vmem:[#allocation5_spill] sm:$0xff]  ;;  %v8340_v40 = vld [vmem:[#allocation23_spill] sm:$0xff]  ;;  %v1379_v54 = vsel %vm1369_vm4, %v8354_v1, %v8353_v51  ;;  %v8358_v19 = vld [vmem:[#allocation126_spill] sm:$0xff] }
 0x303   : > { %v1617_v63 = vsel %vm1598_vm12, %v1584_v32, %v1313_v16  ;;  %v1553_v33 = vsel %vm1532_vm8, %v1520_v42, %v8334_v3  ;;  %v1574_v0 = vsel %vm1565_vm10, %v1541_v59, %v8335_v8  ;;  %v8337_v16 = vld [vmem:[#allocation59_spill] sm:$0xff]  ;;  %v8356_v55 = vld [vmem:[#allocation25_spill] sm:$0xff]  ;;  %v1411_v18 = vsel %vm1401_vm6, %v1379_v54, %v8357_v25  ;;  %v8361_v45 = vld [vmem:[#allocation160_spill] sm:$0xff] }
 0x304   : > { %3615 = vmatmul.msk.f32.gmra.mxu0 %vm1640_vm11, %v1605_v39  ;;  %3627 = vmatmul.msk.f32.gmra.mxu2 %vm1640_vm11, %v1617_v63  ;;  %v1586_v13 = vsel %vm1565_vm10, %v1553_v33, %v8336_v36  ;;  %v1607_v32 = vsel %vm1598_vm12, %v1574_v0, %v5314_v53  ;;  %v1378_v39 = vsel %vm1369_vm4, %v8338_v30, %v8337_v16  ;;  %v8339_v63 = vld [vmem:[#allocation81_spill] sm:$0xff]  ;;  %v8362_v42 = vld [vmem:[#allocation80_spill] sm:$0xff]  ;;  %v1321_v0 = vpop.permute.xlu2 %1320  ;;  %v8367_v16 = vld [vmem:[#allocation67_spill] sm:$0xff] }
 0x305   : > { %v1619_v21 = vsel %vm1598_vm12, %v1586_v13, %v1317_v48  ;;  %v1390_v15 = vsel %vm1369_vm4, %v8340_v40, %v8339_v63  ;;  %v1410_v44 = vsel %vm1401_vm6, %v1378_v39, %v8341_v9  ;;  %v1391_v11 = vsel %vm1369_vm4, %v8356_v55, %v8355_v22  ;;  %v8359_v49 = vld [vmem:[#allocation145_spill] sm:$0xff]  ;;  %v8365_v36 = vld [vmem:[#allocation20_spill] sm:$0xff] }
 0x306   : > { %v1422_v53 = vsel %vm1401_vm6, %v1390_v15, %v8342_v6  ;;  %v1443_v61 = vsel %vm1433_vm5, %v1410_v44, %v8343_v17  ;;  %v1444_v46 = vsel %vm1433_vm5, %v1411_v18, %v8359_v49  ;;  %v8363_v59 = vld [vmem:[#allocation185_spill] sm:$0xff]  ;;  %v8368_v39 = vld [vmem:[#allocation196_spill] sm:$0xff]  ;;  %v8370_v44 = vld [vmem:[#allocation82_spill] sm:$0xff] }
 0x307   : > { %v1455_v60 = vsel %vm1433_vm5, %v1422_v53, %v8344_v5  ;;  %v1476_v35 = vsel %vm1466_vm7, %v1443_v61, %v8345_v14  ;;  %v1477_v26 = vsel %vm1466_vm7, %v1444_v46, %v8361_v45  ;;  %v8364_v33 = vld [vmem:[#allocation193_spill] sm:$0xff]  ;;  %v8371_v6 = vld [vmem:[#allocation6_spill] sm:$0xff]  ;;  %v8372_v17 = vld [vmem:[#allocation96_spill] sm:$0xff] }
 0x308   : > { %v1488_v24 = vsel %vm1466_vm7, %v1455_v60, %v8346_v57  ;;  %v1509_v28 = vsel %vm1499_vm9, %v1476_v35, %v8347_v34  ;;  %v1510_v3 = vsel %vm1499_vm9, %v1477_v26, %v8363_v59  ;;  %v8369_v40 = vld [vmem:[#allocation105_spill] sm:$0xff]  ;;  %v1380_v53 = vsel %vm1369_vm4, %v8371_v6, %v8370_v44  ;;  %v8373_v61 = vld [vmem:[#allocation24_spill] sm:$0xff]  ;;  %v8386_v18 = vld [vmem:[#allocation63_spill] sm:$0xff] }
 0x309   : > { %v1521_v41 = vsel %vm1499_vm9, %v1488_v24, %v8348_v58  ;;  %v1542_v10 = vsel %vm1532_vm8, %v1509_v28, %v8349_v4  ;;  %v1543_v13 = vsel %vm1532_vm8, %v1510_v3, %v8365_v36  ;;  %v1392_v5 = vsel %vm1369_vm4, %v8373_v61, %v8372_v17  ;;  %v8374_v60 = vld [vmem:[#allocation104_spill] sm:$0xff]  ;;  %v8377_v28 = vld [vmem:[#allocation47_spill] sm:$0xff]  ;;  %v8385_v22 = vld [vmem:[#allocation73_spill] sm:$0xff] }
 0x30a   : > { %v1319_v23 = vpop.permute.xlu1 %1318  ;;  %v1554_v2 = vsel %vm1532_vm8, %v1521_v41, %v8350_v38  ;;  %v1575_v43 = vsel %vm1565_vm10, %v1542_v10, %v8351_v29  ;;  %v1576_v30 = vsel %vm1565_vm10, %v1543_v13, %v8367_v16  ;;  %v1412_v14 = vsel %vm1401_vm6, %v1380_v53, %v8374_v60  ;;  %v8375_v35 = vld [vmem:[#allocation116_spill] sm:$0xff]  ;;  %v8378_v41 = vld [vmem:[#allocation166_spill] sm:$0xff]  ;;  %v8381_v29 = vld [vmem:[#allocation187_spill] sm:$0xff] }
 0x30b   : > { %v1608_v47 = vsel %vm1598_vm12, %v1575_v43, %v5335_v37  ;;  %v1423_v37 = vsel %vm1401_vm6, %v1391_v11, %v8358_v19  ;;  %v1609_v15 = vsel %vm1598_vm12, %v1576_v30, %v8369_v40  ;;  %v1424_v57 = vsel %vm1401_vm6, %v1392_v5, %v8375_v35  ;;  %v8376_v24 = vld [vmem:[#allocation32_spill] sm:$0xff]  ;;  %v8380_v38 = vld [vmem:[#allocation182_spill] sm:$0xff]  ;;  %v8387_v19 = vld [vmem:[#allocation11_spill] sm:$0xff] }
 0x30c   : > { %3616 = vmatmul.msk.f32.gmra.mxu0 %vm1640_vm11, %v1606_v20  ;;  %3628 = vmatmul.msk.f32.gmra.mxu2 %vm1640_vm11, %v1618_v31  ;;  %v8352_v20 = vld [vmem:[#allocation195_spill] sm:$0xff]  ;;  %v1456_v52 = vsel %vm1433_vm5, %v1423_v37, %v8360_v27  ;;  %v1445_v34 = vsel %vm1433_vm5, %v1412_v14, %v8376_v24  ;;  %v1457_v58 = vsel %vm1433_vm5, %v1424_v57, %v8377_v28  ;;  %v8379_v4 = vld [vmem:[#allocation176_spill] sm:$0xff]  ;;  %v8389_v46 = vld [vmem:[#allocation30_spill] sm:$0xff] }
 0x30d   : > { %v1587_v31 = vsel %vm1565_vm10, %v1554_v2, %v8352_v20  ;;  %v1489_v48 = vsel %vm1466_vm7, %v1456_v52, %v8362_v42  ;;  %v1490_v10 = vsel %vm1466_vm7, %v1457_v58, %v8379_v4  ;;  %v1323_v20 = vpop.permute.xlu0 %1322  ;;  %v8384_v1 = vld [vmem:[#allocation56_spill] sm:$0xff]  ;;  %v1381_v37 = vsel %vm1369_vm4, %v8387_v19, %v8386_v18  ;;  %v8390_v52 = vld [vmem:[#allocation115_spill] sm:$0xff]  ;;  %v8392_v42 = vld [vmem:[#allocation137_spill] sm:$0xff] }
 0x30e   : > { %v1620_v62 = vsel %vm1598_vm12, %v1587_v31, %v1319_v23  ;;  %v1522_v8 = vsel %vm1499_vm9, %v1489_v48, %v8364_v33  ;;  %v1478_v23 = vsel %vm1466_vm7, %v1445_v34, %v8378_v41  ;;  %v1523_v43 = vsel %vm1499_vm9, %v1490_v10, %v8381_v29  ;;  %v8382_v31 = vld [vmem:[#allocation22_spill] sm:$0xff]  ;;  %v8388_v49 = vld [vmem:[#allocation84_spill] sm:$0xff]  ;;  %v8391_v26 = vld [vmem:[#allocation127_spill] sm:$0xff] }
 0x30f   : > { %v1511_v2 = vsel %vm1499_vm9, %v1478_v23, %v8380_v38  ;;  %v1393_v27 = vsel %vm1369_vm4, %v8389_v46, %v8388_v49  ;;  %v1413_v45 = vsel %vm1401_vm6, %v1381_v37, %v8390_v52  ;;  %v8393_v59 = vld [vmem:[#allocation146_spill] sm:$0xff]  ;;  %v8394_v33 = vld [vmem:[#allocation167_spill] sm:$0xff]  ;;  %v8401_v6 = vld [vmem:[#allocation197_spill] sm:$0xff] }
 0x310   : > { %v1446_v48 = vsel %vm1433_vm5, %v1413_v45, %v8392_v42  ;;  %v8396_v13 = vld [vmem:[#allocation186_spill] sm:$0xff]  ;;  %v8399_v40 = vld [vmem:[#allocation27_spill] sm:$0xff]  ;;  %v8404_v35 = vld [vmem:[#allocation97_spill] sm:$0xff] }
 0x311   : > { %v8402_v5 = vld [vmem:[#allocation83_spill] sm:$0xff]  ;;  %v8403_v60 = vld [vmem:[#allocation10_spill] sm:$0xff]  ;;  %v8405_v57 = vld [vmem:[#allocation29_spill] sm:$0xff] }
 0x312   : > { %v1325_v30 = vpop.permute.xlu1 %1324  ;;  %v1382_v14 = vsel %vm1369_vm4, %v8403_v60, %v8402_v5  ;;  %v1394_v24 = vsel %vm1369_vm4, %v8405_v57, %v8404_v35  ;;  %v8406_v34 = vld [vmem:[#allocation117_spill] sm:$0xff]  ;;  %v8409_v4 = vld [vmem:[#allocation48_spill] sm:$0xff]  ;;  %v8410_v38 = vld [vmem:[#allocation62_spill] sm:$0xff] }
 0x313   : > { %v1414_v28 = vsel %vm1401_vm6, %v1382_v14, %v8406_v34  ;;  %v8407_v58 = vld [vmem:[#allocation129_spill] sm:$0xff]  ;;  %v8417_v18 = vld [vmem:[#allocation198_spill] sm:$0xff]  ;;  %v8434_v60 = vld [vmem:[#allocation88_spill] sm:$0xff] }
 0x314   : > { %3617 = vmatmul.msk.f32.gmra.mxu0 %vm1640_vm11, %v1607_v32  ;;  %3629 = vmatmul.msk.f32.gmra.mxu2 %vm1640_vm11, %v1619_v21  ;;  %v8366_v32 = vld [vmem:[#allocation43_spill] sm:$0xff]  ;;  %v8408_v41 = vld [vmem:[#allocation33_spill] sm:$0xff]  ;;  %v8436_v34 = vld [vmem:[#allocation16_spill] sm:$0xff] }
 0x315   : > { %v1555_v21 = vsel %vm1532_vm8, %v1522_v8, %v8366_v32  ;;  %v1479_v8 = vsel %vm1466_vm7, %v1446_v48, %v8394_v33  ;;  %v1447_v23 = vsel %vm1433_vm5, %v1414_v28, %v8408_v41  ;;  %v8411_v29 = vld [vmem:[#allocation169_spill] sm:$0xff]  ;;  %v8423_v48 = vld [vmem:[#allocation107_spill] sm:$0xff] }
 0x316   : > { %v1588_v63 = vsel %vm1565_vm10, %v1555_v21, %v8368_v39  ;;  %v1512_v32 = vsel %vm1499_vm9, %v1479_v8, %v8396_v13  ;;  %v8397_v21 = vld [vmem:[#allocation194_spill] sm:$0xff]  ;;  %v8418_v37 = vld [vmem:[#allocation125_spill] sm:$0xff]  ;;  %v8425_v8 = vld [vmem:[#allocation147_spill] sm:$0xff] }
 0x317   : > { %v1621_v9 = vsel %vm1598_vm12, %v1588_v63, %v1321_v0  ;;  %v8395_v0 = vld [vmem:[#allocation177_spill] sm:$0xff]  ;;  %v8398_v39 = vld [vmem:[#allocation18_spill] sm:$0xff] }
 0x318   : > { %v1545_v63 = vsel %vm1532_vm8, %v1512_v32, %v8398_v39  ;;  %v8420_v52 = vld [vmem:[#allocation13_spill] sm:$0xff]  ;;  %v8427_v32 = vld [vmem:[#allocation168_spill] sm:$0xff]  ;;  %v8429_v39 = vld [vmem:[#allocation183_spill] sm:$0xff] }
 0x31c   : > { %3618 = vmatmul.msk.f32.gmra.mxu0 %vm1640_vm11, %v1608_v47  ;;  %3630 = vmatmul.msk.f32.gmra.mxu2 %vm1640_vm11, %v1620_v62  ;;  %v1544_v47 = vsel %vm1532_vm8, %v1511_v2, %v8382_v31  ;;  %v8383_v62 = vld [vmem:[#allocation44_spill] sm:$0xff]  ;;  %v1480_v2 = vsel %vm1466_vm7, %v1447_v23, %v8410_v38  ;;  %v8439_v23 = vld [vmem:[#allocation118_spill] sm:$0xff] }
 0x31d   : > { %v1556_v51 = vsel %vm1532_vm8, %v1523_v43, %v8383_v62  ;;  %v1577_v54 = vsel %vm1565_vm10, %v1544_v47, %v8384_v1  ;;  %v8413_v47 = vld [vmem:[#allocation8_spill] sm:$0xff]  ;;  %v8414_v1 = vld [vmem:[#allocation26_spill] sm:$0xff] }
 0x31e   : > { %v1589_v55 = vsel %vm1565_vm10, %v1556_v51, %v8385_v22  ;;  %v1610_v11 = vsel %vm1598_vm12, %v1577_v54, %v5337_v50  ;;  %v1425_v50 = vsel %vm1401_vm6, %v1393_v27, %v8391_v26  ;;  %v1327_v51 = vpop.permute.xlu2 %1326  ;;  %v8415_v22 = vld [vmem:[#allocation152_spill] sm:$0xff]  ;;  %v8419_v27 = vld [vmem:[#allocation85_spill] sm:$0xff]  ;;  %v8421_v26 = vld [vmem:[#allocation99_spill] sm:$0xff] }
 0x31f   : > { %v1622_v25 = vsel %vm1598_vm12, %v1589_v55, %v1323_v20  ;;  %v1458_v3 = vsel %vm1433_vm5, %v1425_v50, %v8393_v59  ;;  %v8412_v20 = vld [vmem:[#allocation188_spill] sm:$0xff]  ;;  %v1383_v45 = vsel %vm1369_vm4, %v8420_v52, %v8419_v27  ;;  %v8422_v50 = vld [vmem:[#allocation35_spill] sm:$0xff] }
 0x320   : > { %v1491_v36 = vsel %vm1466_vm7, %v1458_v3, %v8395_v0  ;;  %v1513_v31 = vsel %vm1499_vm9, %v1480_v2, %v8412_v20  ;;  %v1395_v42 = vsel %vm1369_vm4, %v8422_v50, %v8421_v26  ;;  %v1415_v59 = vsel %vm1401_vm6, %v1383_v45, %v8423_v48  ;;  %v8424_v3 = vld [vmem:[#allocation119_spill] sm:$0xff]  ;;  %v8441_v38 = vld [vmem:[#allocation140_spill] sm:$0xff]  ;;  %v8443_v20 = vld [vmem:[#allocation170_spill] sm:$0xff] }
 0x321   : > { %v1524_v16 = vsel %vm1499_vm9, %v1491_v36, %v8397_v21  ;;  %v1546_v54 = vsel %vm1532_vm8, %v1513_v31, %v8414_v1  ;;  %v1427_v33 = vsel %vm1401_vm6, %v1395_v42, %v8424_v3  ;;  %v1448_v0 = vsel %vm1433_vm5, %v1415_v59, %v8425_v8  ;;  %v8426_v36 = vld [vmem:[#allocation157_spill] sm:$0xff]  ;;  %v8451_v26 = vld [vmem:[#allocation100_spill] sm:$0xff]  ;;  %v8454_v3 = vld [vmem:[#allocation158_spill] sm:$0xff] }
 0x322   : > { %v1460_v13 = vsel %vm1433_vm5, %v1427_v33, %v8426_v36  ;;  %v1481_v21 = vsel %vm1466_vm7, %v1448_v0, %v8427_v32  ;;  %v8452_v50 = vld [vmem:[#allocation37_spill] sm:$0xff]  ;;  %v8453_v48 = vld [vmem:[#allocation132_spill] sm:$0xff]  ;;  %v8455_v8 = vld [vmem:[#allocation171_spill] sm:$0xff] }
 0x323   : > { %v1397_v42 = vsel %vm1369_vm4, %v8452_v50, %v8451_v26  ;;  %v8456_v36 = vld [vmem:[#allocation12_spill] sm:$0xff] }
 0x324   : > { %3619 = vmatmul.msk.f32.gmra.mxu0 %vm1640_vm11, %v1609_v15  ;;  %3631 = vmatmul.msk.f32.gmra.mxu2 %vm1640_vm11, %v1621_v9  ;;  %v1557_v15 = vsel %vm1532_vm8, %v1524_v16, %v8399_v40  ;;  %v8400_v9 = vld [vmem:[#allocation72_spill] sm:$0xff]  ;;  %v8428_v16 = vld [vmem:[#allocation178_spill] sm:$0xff]  ;;  %v1429_v59 = vsel %vm1401_vm6, %v1397_v42, %v8453_v48  ;;  %v8477_v48 = vld [vmem:[#allocation201_spill] sm:$0xff] }
 0x325   : > { %v1578_v44 = vsel %vm1565_vm10, %v1545_v63, %v8400_v9  ;;  %v1590_v53 = vsel %vm1565_vm10, %v1557_v15, %v8401_v6  ;;  %v1514_v63 = vsel %vm1499_vm9, %v1481_v21, %v8429_v39  ;;  %v8430_v40 = vld [vmem:[#allocation190_spill] sm:$0xff]  ;;  %v1329_v9 = vpop.permute.xlu0 %1328  ;;  %v1462_v33 = vsel %vm1433_vm5, %v1429_v59, %v8454_v3  ;;  %v8458_v39 = vld [vmem:[#allocation200_spill] sm:$0xff] }
 0x326   : > { %v1611_v17 = vsel %vm1598_vm12, %v1578_v44, %v5356_v12  ;;  %v1623_v61 = vsel %vm1598_vm12, %v1590_v53, %v1325_v30  ;;  %v1426_v12 = vsel %vm1401_vm6, %v1394_v24, %v8407_v58  ;;  %v1493_v30 = vsel %vm1466_vm7, %v1460_v13, %v8428_v16  ;;  %v8431_v44 = vld [vmem:[#allocation28_spill] sm:$0xff]  ;;  %v8432_v53 = vld [vmem:[#allocation153_spill] sm:$0xff]  ;;  %v1333_v32 = vpop.permute.xlu2 %1332  ;;  %v8457_v21 = vld [vmem:[#allocation2_spill] sm:$0xff] }
 0x327   : > { %v1459_v10 = vsel %vm1433_vm5, %v1426_v12, %v8409_v4  ;;  %v1526_v15 = vsel %vm1499_vm9, %v1493_v30, %v8430_v40  ;;  %v1547_v6 = vsel %vm1532_vm8, %v1514_v63, %v8431_v44  ;;  %v8435_v24 = vld [vmem:[#allocation69_spill] sm:$0xff]  ;;  %v8438_v12 = vld [vmem:[#allocation34_spill] sm:$0xff]  ;;  %v1495_v0 = vsel %vm1466_vm7, %v1462_v33, %v8455_v8  ;;  %v8460_v44 = vld [vmem:[#allocation36_spill] sm:$0xff] }
 0x328   : > { %v1492_v43 = vsel %vm1466_vm7, %v1459_v10, %v8411_v29  ;;  %v1384_v28 = vsel %vm1369_vm4, %v8436_v34, %v8435_v24  ;;  %v8437_v58 = vld [vmem:[#allocation89_spill] sm:$0xff]  ;;  %v8440_v10 = vld [vmem:[#allocation130_spill] sm:$0xff]  ;;  %v1528_v13 = vsel %vm1499_vm9, %v1495_v0, %v8456_v36  ;;  %v8478_v33 = vld [vmem:[#allocation103_spill] sm:$0xff] }
 0x329   : > { %v1525_v62 = vsel %vm1499_vm9, %v1492_v43, %v8413_v47  ;;  %v1396_v41 = vsel %vm1369_vm4, %v8438_v12, %v8437_v58  ;;  %v1416_v4 = vsel %vm1401_vm6, %v1384_v28, %v8439_v23  ;;  %v8442_v29 = vld [vmem:[#allocation149_spill] sm:$0xff]  ;;  %v8444_v47 = vld [vmem:[#allocation179_spill] sm:$0xff]  ;;  %v1561_v16 = vsel %vm1532_vm8, %v1528_v13, %v8457_v21  ;;  %v8465_v28 = vld [vmem:[#allocation52_spill] sm:$0xff] }
 0x32a   : > { %v1558_v55 = vsel %vm1532_vm8, %v1525_v62, %v8415_v22  ;;  %v1449_v2 = vsel %vm1433_vm5, %v1416_v4, %v8441_v38  ;;  %v1594_v63 = vsel %vm1565_vm10, %v1561_v16, %v8458_v39  ;;  %v8479_v8 = vld [vmem:[#allocation40_spill] sm:$0xff]  ;;  %v8480_v36 = vld [vmem:[#allocation135_spill] sm:$0xff] }
 0x32b   : > { %v1591_v19 = vsel %vm1565_vm10, %v1558_v55, %v8417_v18  ;;  %v1482_v31 = vsel %vm1466_vm7, %v1449_v2, %v8443_v20  ;;  %v1331_v55 = vpop.permute.xlu1 %1330  ;;  %v8448_v18 = vld [vmem:[#allocation38_spill] sm:$0xff]  ;;  %v8467_v2 = vld [vmem:[#allocation92_spill] sm:$0xff]  ;;  %v8469_v20 = vld [vmem:[#allocation133_spill] sm:$0xff]  ;;  %v1400_v0 = vsel %vm1369_vm4, %v8479_v8, %v8478_v33 }
 0x32c   : > { %3620 = vmatmul.msk.f32.gmra.mxu0 %vm1640_vm11, %v1610_v11  ;;  %3632 = vmatmul.msk.f32.gmra.mxu2 %vm1640_vm11, %v1622_v25  ;;  %v8416_v11 = vld [vmem:[#allocation79_spill] sm:$0xff]  ;;  %v1624_v46 = vsel %vm1598_vm12, %v1591_v19, %v1327_v51  ;;  %v8445_v51 = vld [vmem:[#allocation189_spill] sm:$0xff]  ;;  %v1432_v13 = vsel %vm1401_vm6, %v1400_v0, %v8480_v36 }
 0x32d   : > { %v1579_v25 = vsel %vm1565_vm10, %v1546_v54, %v8416_v11  ;;  %v1515_v1 = vsel %vm1499_vm9, %v1482_v31, %v8445_v51  ;;  %v8446_v54 = vld [vmem:[#allocation9_spill] sm:$0xff]  ;;  %v8447_v11 = vld [vmem:[#allocation19_spill] sm:$0xff]  ;;  %v1335_v34 = vpop.permute.xlu0 %1334 }
 0x32e   : > { %v1612_v49 = vsel %vm1598_vm12, %v1579_v25, %v8418_v37  ;;  %v1548_v25 = vsel %vm1532_vm8, %v1515_v1, %v8447_v11  ;;  %v8449_v37 = vld [vmem:[#allocation87_spill] sm:$0xff]  ;;  %v8471_v51 = vld [vmem:[#allocation45_spill] sm:$0xff] }
 0x32f   : > { %v8481_v21 = vld [vmem:[#allocation159_spill] sm:$0xff] }
 0x330   : > { %v1465_v16 = vsel %vm1433_vm5, %v1432_v13, %v8481_v21 }
 0x334   : > { %3621 = vmatmul.msk.f32.gmra.mxu0 %vm1640_vm11, %v1611_v17  ;;  %3633 = vmatmul.msk.f32.gmra.mxu2 %vm1640_vm11, %v1623_v61  ;;  %v1559_v17 = vsel %vm1532_vm8, %v1526_v15, %v8432_v53  ;;  %v8433_v61 = vld [vmem:[#allocation57_spill] sm:$0xff]  ;;  %v1627_v15 = vsel %vm1598_vm12, %v1594_v63, %v1333_v32  ;;  %v8461_v53 = vld [vmem:[#allocation122_spill] sm:$0xff] }
 0x335   : > { %v1580_v5 = vsel %vm1565_vm10, %v1547_v6, %v8433_v61  ;;  %v1592_v14 = vsel %vm1565_vm10, %v1559_v17, %v8434_v60  ;;  %v8462_v61 = vld [vmem:[#allocation55_spill] sm:$0xff]  ;;  %v8483_v63 = vld [vmem:[#allocation17_spill] sm:$0xff] }
 0x336   : > { %v1613_v35 = vsel %vm1598_vm12, %v1580_v5, %v5358_v56  ;;  %v1625_v57 = vsel %vm1598_vm12, %v1592_v14, %v1329_v9  ;;  %v1428_v56 = vsel %vm1401_vm6, %v1396_v41, %v8440_v10  ;;  %v8459_v9 = vld [vmem:[#allocation102_spill] sm:$0xff]  ;;  %v8463_v14 = vld [vmem:[#allocation180_spill] sm:$0xff] }
 0x337   : > { %v1461_v43 = vsel %vm1433_vm5, %v1428_v56, %v8442_v29  ;;  %v1398_v6 = vsel %vm1369_vm4, %v8460_v44, %v8459_v9  ;;  %v8466_v41 = vld [vmem:[#allocation46_spill] sm:$0xff]  ;;  %v8468_v29 = vld [vmem:[#allocation41_spill] sm:$0xff] }
 0x338   : > { %v1494_v62 = vsel %vm1466_vm7, %v1461_v43, %v8444_v47  ;;  %v1430_v17 = vsel %vm1401_vm6, %v1398_v6, %v8461_v53  ;;  %v1399_v43 = vsel %vm1369_vm4, %v8468_v29, %v8467_v2 }
 0x339   : > { %v1527_v22 = vsel %vm1499_vm9, %v1494_v62, %v8446_v54  ;;  %v1463_v5 = vsel %vm1433_vm5, %v1430_v17, %v8462_v61  ;;  %v1431_v31 = vsel %vm1401_vm6, %v1399_v43, %v8469_v20  ;;  %v8472_v54 = vld [vmem:[#allocation181_spill] sm:$0xff] }
 0x33a   : > { %v1560_v19 = vsel %vm1532_vm8, %v1527_v22, %v8448_v18  ;;  %v1464_v1 = vsel %vm1433_vm5, %v1431_v31, %v8471_v51 }
 0x33b   : > { %v1497_v22 = vsel %vm1466_vm7, %v1464_v1, %v8472_v54 }
 0x33c   : > { %3622 = vmatmul.msk.f32.gmra.mxu0 %vm1640_vm11, %v1612_v49  ;;  %3634 = vmatmul.msk.f32.gmra.mxu2 %vm1640_vm11, %v1624_v46  ;;  %v1581_v49 = vsel %vm1565_vm10, %v1548_v25, %v8449_v37  ;;  %v8450_v46 = vld [vmem:[#allocation199_spill] sm:$0xff]  ;;  %v8474_v25 = vld [vmem:[#allocation14_spill] sm:$0xff] }
 0x33d   : > { %v1593_v27 = vsel %vm1565_vm10, %v1560_v19, %v8450_v46  ;;  %v1614_v52 = vsel %vm1598_vm12, %v1581_v49, %v5393_v7  ;;  %v5760_v7 = vld [vmem:[%s7722_s2] ss:$0 sm:$0xff]  ;;  %v1530_v18 = vsel %vm1499_vm9, %v1497_v22, %v8474_v25  ;;  %v5811_v19 = vpop.permute.xlu1 %1336 }
 0x33e   : > { %v1626_v45 = vsel %vm1598_vm12, %v1593_v27, %v1331_v55  ;;  %8475 = vst [vmem:[#allocation49_spill] sm:$0xff] %v5811_v19 }
 0x344   : > { %3623 = vmatmul.msk.f32.gmra.mxu0 %vm1640_vm11, %v1613_v35  ;;  %3635 = vmatmul.msk.f32.gmra.mxu2 %vm1640_vm11, %v1625_v57  ;;  %v1496_v35 = vsel %vm1466_vm7, %v1463_v5, %v8463_v14  ;;  %v8464_v57 = vld [vmem:[#allocation191_spill] sm:$0xff] }
 0x345   : > { %v1529_v24 = vsel %vm1499_vm9, %v1496_v35, %v8464_v57 }
 0x346   : > { %v1562_v58 = vsel %vm1532_vm8, %v1529_v24, %v8465_v28 }
 0x347   : > { %v1595_v23 = vsel %vm1565_vm10, %v1562_v58, %v8466_v41 }
 0x348   : > { %v1628_v56 = vsel %vm1598_vm12, %v1595_v23, %v1335_v34 }
 0x34c   : > { %3624 = vmatmul.msk.f32.gmra.mxu0 %vm1640_vm11, %v1614_v52  ;;  %3636 = vmatmul.msk.f32.gmra.mxu2 %vm1640_vm11, %v1626_v45  ;;  %v8476_v45 = vld [vmem:[#allocation39_spill] sm:$0xff] }
 0x34d   : > { %v1563_v26 = vsel %vm1532_vm8, %v1530_v18, %v8476_v45 }
 0x34e   : > { %v1596_v59 = vsel %vm1565_vm10, %v1563_v26, %v8477_v48 }
 0x34f   : > { %v1629_v3 = vsel %vm1598_vm12, %v1596_v59, %v5811_v19 }
 0x351   : > { %v1758_v30 = vpop.f32.mrf.mxu0 }
 0x352   : > { %v1759_v40 = vadd.f32 %v5760_v7, %v1758_v30  ;;  %v8482_v30 = vld [vmem:[#allocation174_spill] sm:$0xff] }
 0x353   : > { %v1498_v39 = vsel %vm1466_vm7, %v1465_v16, %v8482_v30 }
 0x354   : > { %3637 = vmatmul.msk.f32.gmra.mxu2 %vm1640_vm11, %v1627_v15  ;;  %v1854_v60 = vmax.f32 %v1759_v40, 0.0  ;;  %v1531_v40 = vsel %vm1499_vm9, %v1498_v39, %v8483_v63 }
 0x355   : > { %v1564_v6 = vsel %vm1532_vm8, %v1531_v40, %v8476_v45 }
 0x356   : > { %v1918_v4 = vrot.slane %v1854_v60, 7  ;;  %v1597_v53 = vsel %vm1565_vm10, %v1564_v6, %v8477_v48 }
 0x357   : > { %v1630_v61 = vsel %vm1598_vm12, %v1597_v53, %v5811_v19 }
 0x358   : > { %v5797_v47 = vsel %vm289_vm0, 0.0, %v1918_v4 }
 0x359   : > { %v1761_v12 = vpop.f32.mrf.mxu0  ;;  %8470 = vst [vmem:[#allocation161_spill] sm:$0xff] %v5797_v47  ;;  %v2075_v37 = vrot.slane %v5797_v47, 1 }
 0x35a   : > { %v1762_v10 = vadd.f32 %v5760_v7, %v1761_v12 }
 0x35c   : > { %v1855_v38 = vmax.f32 %v1762_v10, 0.0  ;;  %3638 = vmatmul.msk.f32.gmra.mxu2 %vm1640_vm11, %v1628_v56 }
 0x35e   : > { %v1919_v62 = vrot.slane %v1855_v38, 7 }
 0x360   : > { %v5804_v55 = vsel %vm289_vm0, %v1918_v4, %v1919_v62  ;;  %v5807_v11 = vsel %vm289_vm0, %v1919_v62, 0.0 }
 0x361   : > { %8473 = vst [vmem:[#allocation136_spill] sm:$0xff] %v5804_v55  ;;  %v2078_v49 = vrot.slane %v5807_v11, 1  ;;  %v1764_v46 = vpop.f32.mrf.mxu0  ;;  %v2076_v27 = vrot.slane %v5804_v55, 1 }
 0x362   : > { %v1765_v52 = vadd.f32 %v5760_v7, %v1764_v46 }
 0x363   : > { %v5820_v50 = vsel %vm448_vm1, %v2076_v27, %v2078_v49  ;;  %v5823_v42 = vsel %vm448_vm1, %v2075_v37, %v2076_v27 }
 0x364   : > { %2239 = vrot.lane.b32.xlu0 %v5820_v50, %s3748_s20  ;;  %2237 = vrot.lane.b32.xlu2 %v5823_v42, %s3748_s20  ;;  %v1856_v32 = vmax.f32 %v1765_v52, 0.0 }
 0x365   : > { %3639 = vmatmul.msk.f32.gmra.mxu2 %vm1640_vm11, %v1629_v3 }
 0x366   : > { %v1921_v9 = vrot.slane %v1856_v32, 7  ;;  %v5876_v4 = vpop.f32.mrf.mxu2 }
 0x368   : > { %v5854_v5 = vsel %vm289_vm0, 0.0, %v1921_v9 }
 0x369   : > { %v1767_v15 = vpop.f32.mrf.mxu0  ;;  %v2080_v28 = vrot.slane %v5854_v5, 1 }
 0x36a   : > { %v1768_v44 = vadd.f32 %v5760_v7, %v1767_v15 }
 0x36c   : > { %v1857_v17 = vmax.f32 %v1768_v44, 0.0 }
 0x36d   : > { %3640 = vmatmul.msk.f32.gmra.mxu2 %vm1640_vm11, %v1630_v61 }
 0x36e   : > { %v1922_v60 = vrot.slane %v1857_v17, 7 }
 0x370   : > { %v5857_v14 = vsel %vm289_vm0, %v1921_v9, %v1922_v60  ;;  %v5860_v35 = vsel %vm289_vm0, %v1922_v60, 0.0 }
 0x371   : > { %v2083_v57 = vrot.slane %v5860_v35, 1  ;;  %v1770_v24 = vpop.f32.mrf.mxu0  ;;  %v2081_v34 = vrot.slane %v5857_v14, 1 }
 0x372   : > { %v1771_v58 = vadd.f32 %v5760_v7, %v1770_v24 }
 0x373   : > { %v5867_v12 = vsel %vm448_vm1, %v2081_v34, %v2083_v57  ;;  %v5870_v41 = vsel %vm448_vm1, %v2080_v28, %v2081_v34 }
 0x374   : > { %2243 = vrot.lane.b32.xlu2 %v5867_v12, %s3748_s20  ;;  %2241 = vrot.lane.b32.xlu1 %v5870_v41, %s3748_s20  ;;  %v1858_v23 = vmax.f32 %v1771_v58, 0.0 }
 0x376   : > { %v1924_v56 = vrot.slane %v1858_v23, 7 }
 0x378   : > { %v5880_v29 = vsel %vm289_vm0, 0.0, %v1924_v56 }
 0x379   : > { %v1773_v10 = vpop.f32.mrf.mxu0  ;;  %v2085_v22 = vrot.slane %v5880_v29, 1 }
 0x37a   : > { %v1774_v38 = vadd.f32 %v5760_v7, %v1773_v10 }
 0x37c   : > { %v1859_v2 = vmax.f32 %v1774_v38, 0.0 }
 0x37e   : > { %v1925_v43 = vrot.slane %v1859_v2, 7 }
 0x37f   : > { %v5882_v20 = vpop.f32.mrf.mxu2 }
 0x380   : > { %v5885_v31 = vsel %vm289_vm0, %v1924_v56, %v1925_v43  ;;  %v5888_v62 = vsel %vm289_vm0, %v1925_v43, 0.0 }
 0x381   : > { %v2088_v51 = vrot.slane %v5888_v62, 1  ;;  %v1776_v1 = vpop.f32.mrf.mxu0  ;;  %v2086_v54 = vrot.slane %v5885_v31, 1 }
 0x382   : > { %v1777_v25 = vadd.f32 %v5760_v7, %v1776_v1 }
 0x383   : > { %v5895_v18 = vsel %vm448_vm1, %v2086_v54, %v2088_v51  ;;  %v5898_v37 = vsel %vm448_vm1, %v2085_v22, %v2086_v54 }
 0x384   : > { %2247 = vrot.lane.b32.xlu1 %v5895_v18, %s3748_s20  ;;  %2245 = vrot.lane.b32.xlu0 %v5898_v37, %s3748_s20  ;;  %v1860_v49 = vmax.f32 %v1777_v25, 0.0 }
 0x386   : > { %v1927_v52 = vrot.slane %v1860_v49, 7 }
 0x387   : > { %v5904_v46 = vpop.f32.mrf.mxu2 }
 0x388   : > { %v5908_v3 = vsel %vm289_vm0, 0.0, %v1927_v52 }
 0x389   : > { %v1779_v27 = vpop.f32.mrf.mxu0  ;;  %v2090_v21 = vrot.slane %v5908_v3, 1 }
 0x38a   : > { %v1780_v26 = vadd.f32 %v5760_v7, %v1779_v27 }
 0x38c   : > { %v1861_v59 = vmax.f32 %v1780_v26, 0.0 }
 0x38e   : > { %v1928_v33 = vrot.slane %v1861_v59, 7 }
 0x38f   : > { %v5910_v8 = vpop.f32.mrf.mxu2 }
 0x390   : > { %v5913_v0 = vsel %vm289_vm0, %v1927_v52, %v1928_v33  ;;  %v5916_v36 = vsel %vm289_vm0, %v1928_v33, 0.0 }
 0x391   : > { %v2093_v13 = vrot.slane %v5916_v36, 1  ;;  %v1782_v32 = vpop.f32.mrf.mxu0  ;;  %v2091_v16 = vrot.slane %v5913_v0, 1 }
 0x392   : > { %v1783_v30 = vadd.f32 %v5760_v7, %v1782_v32 }
 0x393   : > { %v5923_v39 = vsel %vm448_vm1, %v2090_v21, %v2091_v16  ;;  %v5926_v63 = vsel %vm448_vm1, %v2091_v16, %v2093_v13 }
 0x394   : > { %8484 = vst [vmem:[#allocation86_spill] sm:$0xff] %v5923_v39  ;;  %2249 = vrot.lane.b32.xlu2 %v5923_v39, %s3748_s20  ;;  %2251 = vrot.lane.b32.xlu0 %v5926_v63, %s3748_s20  ;;  %v1862_v40 = vmax.f32 %v1783_v30, 0.0 }
 0x395   : > { %8485 = vst [vmem:[#allocation65_spill] sm:$0xff] %v5926_v63 }
 0x396   : > { %v1930_v44 = vrot.slane %v1862_v40, 7 }
 0x397   : > { %v5932_v15 = vpop.f32.mrf.mxu2 }
 0x398   : > { %v5936_v17 = vsel %vm289_vm0, 0.0, %v1930_v44 }
 0x399   : > { %v1785_v9 = vpop.f32.mrf.mxu0  ;;  %v2095_v23 = vrot.slane %v5936_v17, 1 }
 0x39a   : > { %v1786_v6 = vadd.f32 %v5760_v7, %v1785_v9 }
 0x39c   : > { %v1863_v53 = vmax.f32 %v1786_v6, 0.0 }
 0x39e   : > { %v1931_v61 = vrot.slane %v1863_v53, 7  ;;  %v1807_v53 = vadd.f32 %v5760_v7, %v5876_v4 }
 0x39f   : > { %v5938_v60 = vpop.f32.mrf.mxu2 }
 0x3a0   : > { %v5941_v57 = vsel %vm289_vm0, %v1930_v44, %v1931_v61  ;;  %v5944_v24 = vsel %vm289_vm0, %v1931_v61, 0.0  ;;  %v1810_v44 = vadd.f32 %v5760_v7, %v5882_v20  ;;  %v1822_v48 = vadd.f32 %v5760_v7, %v5938_v60 }
 0x3a1   : > { %v2098_v34 = vrot.slane %v5944_v24, 1  ;;  %v1788_v28 = vpop.f32.mrf.mxu0  ;;  %v2096_v58 = vrot.slane %v5941_v57, 1 }
 0x3a2   : > { %v1789_v10 = vadd.f32 %v5760_v7, %v1788_v28  ;;  %v1871_v28 = vmax.f32 %v1810_v44, 0.0 }
 0x3a3   : > { %v5951_v56 = vsel %vm448_vm1, %v2096_v58, %v2098_v34  ;;  %v5954_v38 = vsel %vm448_vm1, %v2095_v23, %v2096_v58  ;;  %v1870_v23 = vmax.f32 %v1807_v53, 0.0 }
 0x3a4   : > { %8486 = vst [vmem:[#allocation3_spill] sm:$0xff] %v5951_v56  ;;  %2255 = vrot.lane.b32.xlu2 %v5951_v56, %s3748_s20  ;;  %2253 = vrot.lane.b32.xlu1 %v5954_v38, %s3748_s20  ;;  %v1864_v2 = vmax.f32 %v1789_v10, 0.0 }
 0x3a5   : > { %8487 = vst [vmem:[#allocation120_spill] sm:$0xff] %v5954_v38 }
 0x3a6   : > { %v1933_v1 = vrot.slane %v1864_v2, 7 }
 0x3a7   : > { %v1824_v43 = vpop.f32.mrf.mxu2 }
 0x3a8   : > { %v5962_v25 = vsel %vm289_vm0, 0.0, %v1933_v1 }
 0x3a9   : > { %v1791_v51 = vpop.f32.mrf.mxu0  ;;  %v2100_v32 = vrot.slane %v5962_v25, 1 }
 0x3aa   : > { %v1792_v54 = vadd.f32 %v5760_v7, %v1791_v51 }
 0x3ac   : > { %v1865_v22 = vmax.f32 %v1792_v54, 0.0  ;;  %v1816_v54 = vadd.f32 %v5760_v7, %v5910_v8 }
 0x3ae   : > { %v1934_v49 = vrot.slane %v1865_v22, 7 }
 0x3af   : > { %v1827_v27 = vpop.f32.mrf.mxu2 }
 0x3b0   : > { %v5965_v52 = vsel %vm289_vm0, %v1933_v1, %v1934_v49  ;;  %v5968_v26 = vsel %vm289_vm0, %v1934_v49, 0.0  ;;  %v1943_v1 = vrot.slane %v1871_v28, 7 }
 0x3b1   : > { %8488 = vst [vmem:[#allocation95_spill] sm:$0xff] %v5965_v52  ;;  %v2103_v59 = vrot.slane %v5968_v26, 1  ;;  %v1794_v33 = vpop.f32.mrf.mxu0  ;;  %v2101_v13 = vrot.slane %v5965_v52, 1 }
 0x3b2   : > { %v1795_v21 = vadd.f32 %v5760_v7, %v1794_v33 }
 0x3b3   : > { %v5975_v16 = vsel %vm448_vm1, %v2101_v13, %v2103_v59  ;;  %v5978_v30 = vsel %vm448_vm1, %v2100_v32, %v2101_v13  ;;  %v1942_v13 = vrot.slane %v1870_v23, 7  ;;  %v1813_v32 = vadd.f32 %v5760_v7, %v5904_v46 }
 0x3b4   : > { %8489 = vst [vmem:[#allocation148_spill] sm:$0xff] %v5975_v16  ;;  %2259 = vrot.lane.b32.xlu1 %v5975_v16, %s3748_s20  ;;  %2257 = vrot.lane.b32.xlu0 %v5978_v30, %s3748_s20  ;;  %v1866_v40 = vmax.f32 %v1795_v21, 0.0  ;;  %v1828_v23 = vadd.f32 %v5760_v7, %v1827_v27 }
 0x3b5   : > { %8490 = vst [vmem:[#allocation138_spill] sm:$0xff] %v5978_v30  ;;  %v6015_v44 = vsel %vm289_vm0, %v1942_v13, %v1943_v1  ;;  %v6022_v46 = vsel %vm289_vm0, 0.0, %v1942_v13  ;;  %v1872_v53 = vmax.f32 %v1813_v32, 0.0 }
 0x3b6   : > { %v1936_v61 = vrot.slane %v1866_v40, 7  ;;  %8493 = vst [vmem:[#allocation64_spill] sm:$0xff] %v6015_v44  ;;  %v2116_v28 = vrot.slane %v6015_v44, 1 }
 0x3b7   : > { %v5984_v9 = vpop.f32.mrf.mxu2  ;;  %8494 = vst [vmem:[#allocation4_spill] sm:$0xff] %v6022_v46 }
 0x3b8   : > { %v5992_v10 = vsel %vm289_vm0, 0.0, %v1936_v61  ;;  %v1831_v60 = vadd.f32 %v5760_v7, %v5984_v9 }
 0x3b9   : > { %v1797_v6 = vpop.f32.mrf.mxu0  ;;  %v2105_v59 = vrot.slane %v5992_v10, 1 }
 0x3ba   : > { %v1798_v34 = vadd.f32 %v5760_v7, %v1797_v6  ;;  %v1873_v6 = vmax.f32 %v1816_v54, 0.0  ;;  %v2115_v54 = vrot.slane %v6022_v46, 1 }
 0x3bc   : > { %v1867_v58 = vmax.f32 %v1798_v34, 0.0  ;;  %v6032_v13 = vsel %vm448_vm1, %v2115_v54, %v2116_v28 }
 0x3bd   : > { %8495 = vst [vmem:[#allocation106_spill] sm:$0xff] %v6032_v13 }
 0x3be   : > { %v1937_v2 = vrot.slane %v1867_v58, 7  ;;  %v1946_v58 = vrot.slane %v1873_v6, 7  ;;  %v1877_v6 = vmax.f32 %v1828_v23, 0.0 }
 0x3bf   : > { %v1833_v51 = vpop.f32.mrf.mxu2 }
 0x3c0   : > { %v5997_v20 = vsel %vm289_vm0, %v1936_v61, %v1937_v2  ;;  %v6000_v4 = vsel %vm289_vm0, %v1937_v2, 0.0  ;;  %v1834_v45 = vadd.f32 %v5760_v7, %v1833_v51  ;;  %v6070_v51 = vsel %vm289_vm0, %v1943_v1, 0.0 }
 0x3c1   : > { %v2108_v22 = vrot.slane %v6000_v4, 1  ;;  %v1800_v49 = vpop.f32.mrf.mxu0  ;;  %v2106_v33 = vrot.slane %v5997_v20, 1 }
 0x3c2   : > { %v1801_v21 = vadd.f32 %v5760_v7, %v1800_v49 }
 0x3c3   : > { %v6009_v8 = vsel %vm448_vm1, %v2105_v59, %v2106_v33  ;;  %v6012_v40 = vsel %vm448_vm1, %v2106_v33, %v2108_v22  ;;  %v1945_v22 = vrot.slane %v1872_v53, 7  ;;  %v1825_v33 = vadd.f32 %v5760_v7, %v1824_v43 }
 0x3c4   : > { %8491 = vst [vmem:[#allocation68_spill] sm:$0xff] %v6009_v8  ;;  %2261 = vrot.lane.b32.xlu2 %v6009_v8, %s3748_s20  ;;  %2263 = vrot.lane.b32.xlu0 %v6012_v40, %s3748_s20  ;;  %v1868_v61 = vmax.f32 %v1801_v21, 0.0  ;;  %v6038_v21 = vsel %vm289_vm0, %v1946_v58, 0.0  ;;  %v1819_v8 = vadd.f32 %v5760_v7, %v5932_v15 }
 0x3c5   : > { %8492 = vst [vmem:[#allocation162_spill] sm:$0xff] %v6012_v40  ;;  %v6035_v32 = vsel %vm289_vm0, %v1945_v22, %v1946_v58  ;;  %v2123_v43 = vrot.slane %v6038_v21, 1  ;;  %v1952_v58 = vrot.slane %v1877_v6, 7  ;;  %v6085_v1 = vsel %vm289_vm0, 0.0, %v1945_v22 }
 0x3c6   : > { %v1939_v49 = vrot.slane %v1868_v61, 7  ;;  %v2121_v19 = vrot.slane %v6035_v32, 1 }
 0x3c7   : > { %v6024_v34 = vpop.f32.mrf.mxu2  ;;  %v6141_v38 = vsel %vm289_vm0, %v1952_v58, 0.0 }
 0x3c8   : > { %v6043_v53 = vsel %vm289_vm0, 0.0, %v1939_v49  ;;  %v6077_v15 = vsel %vm448_vm1, %v2121_v19, %v2123_v43 }
 0x3c9   : > { %v1803_v2 = vpop.f32.mrf.mxu0  ;;  %8496 = vst [vmem:[#allocation128_spill] sm:$0xff] %v6043_v53 }
 0x3ca   : > { %v1804_v59 = vadd.f32 %v5760_v7, %v1803_v2  ;;  %v1876_v2 = vmax.f32 %v1825_v33, 0.0  ;;  %v2110_v33 = vrot.slane %v6043_v53, 1  ;;  %8500 = vst [vmem:[#allocation139_spill] sm:$0xff] %v6077_v15 }
 0x3cc   : > { %v1869_v27 = vmax.f32 %v1804_v59, 0.0  ;;  %2269 = vrot.lane.b32.xlu0 %v6032_v13, %s3748_s20  ;;  %v1951_v40 = vrot.slane %v1876_v2, 7  ;;  %v1879_v2 = vmax.f32 %v1834_v45, 0.0  ;;  %v2120_v45 = vrot.slane %v6085_v1, 1 }
 0x3ce   : > { %v1940_v61 = vrot.slane %v1869_v27, 7  ;;  %v6080_v9 = vsel %vm289_vm0, %v1951_v40, %v1952_v58  ;;  %v1955_v56 = vrot.slane %v1879_v2, 7 }
 0x3cf   : > { %v1839_v54 = vpop.f32.mrf.mxu2 }
 0x3d0   : > { %v6050_v23 = vsel %vm289_vm0, %v1939_v49, %v1940_v61  ;;  %v6053_v59 = vsel %vm289_vm0, %v1940_v61, 0.0  ;;  %v1875_v61 = vmax.f32 %v1822_v48, 0.0  ;;  %v1874_v48 = vmax.f32 %v1819_v8, 0.0 }
 0x3d1   : > { %8497 = vst [vmem:[#allocation66_spill] sm:$0xff] %v6050_v23  ;;  %v2113_v27 = vrot.slane %v6053_v59, 1  ;;  %v2111_v13 = vrot.slane %v6050_v23, 1  ;;  %v6096_v8 = vsel %vm448_vm1, %v2120_v45, %v2121_v19  ;;  %v1840_v45 = vadd.f32 %v5760_v7, %v1839_v54 }
 0x3d2   : > { %v1949_v43 = vrot.slane %v1875_v61, 7  ;;  %v1948_v30 = vrot.slane %v1874_v48, 7  ;;  %8501 = vst [vmem:[#allocation156_spill] sm:$0xff] %v6096_v8 }
 0x3d3   : > { %v6064_v49 = vsel %vm448_vm1, %v2111_v13, %v2113_v27  ;;  %v6067_v6 = vsel %vm448_vm1, %v2110_v33, %v2111_v13  ;;  %v2118_v13 = vrot.slane %v6070_v51, 1  ;;  %v6089_v27 = vsel %vm289_vm0, 0.0, %v1951_v40 }
 0x3d4   : > { %8498 = vst [vmem:[#allocation70_spill] sm:$0xff] %v6064_v49  ;;  %2267 = vrot.lane.b32.xlu2 %v6064_v49, %s3748_s20  ;;  %2265 = vrot.lane.b32.xlu1 %v6067_v6, %s3748_s20  ;;  %v1878_v33 = vmax.f32 %v1831_v60, 0.0  ;;  %v6102_v60 = vsel %vm289_vm0, %v1948_v30, %v1949_v43  ;;  %v6105_v61 = vsel %vm289_vm0, %v1949_v43, 0.0  ;;  %v6123_v2 = vsel %vm289_vm0, 0.0, %v1948_v30 }
 0x3d5   : > { %8499 = vst [vmem:[#allocation108_spill] sm:$0xff] %v6067_v6  ;;  %2275 = vrot.lane.b32.xlu0 %v6077_v15, %s3748_s20  ;;  %v2131_v6 = vrot.slane %v6080_v9, 1  ;;  %v2130_v15 = vrot.slane %v6089_v27, 1  ;;  %v6099_v40 = vsel %vm448_vm1, %v2116_v28, %v2118_v13  ;;  %v6118_v28 = vsel %vm289_vm0, %v1955_v56, 0.0 }
 0x3d6   : > { %v1954_v16 = vrot.slane %v1878_v33, 7  ;;  %8502 = vst [vmem:[#allocation50_spill] sm:$0xff] %v6099_v40  ;;  %v2128_v48 = vrot.slane %v6105_v61, 1  ;;  %v2126_v43 = vrot.slane %v6102_v60, 1  ;;  %v1837_v30 = vadd.f32 %v5760_v7, %v6024_v34 }
 0x3d7   : > { %v1842_v49 = vpop.f32.mrf.mxu2  ;;  %v1881_v54 = vmax.f32 %v1840_v45, 0.0 }
 0x3d8   : > { %v1843_v22 = vadd.f32 %v5760_v7, %v1842_v49  ;;  %v6112_v49 = vsel %vm448_vm1, %v2130_v15, %v2131_v6  ;;  %v6115_v19 = vsel %vm289_vm0, %v1954_v16, %v1955_v56  ;;  %v2138_v15 = vrot.slane %v6118_v28, 1 }
 0x3d9   : > { %8503 = vst [vmem:[#allocation90_spill] sm:$0xff] %v6112_v49  ;;  %v2136_v56 = vrot.slane %v6115_v19, 1 }
 0x3da   : > { %8504 = vst [vmem:[#allocation98_spill] sm:$0xff] %v6115_v19  ;;  %v1882_v13 = vmax.f32 %v1843_v22, 0.0  ;;  %v6135_v22 = vsel %vm448_vm1, %v2126_v43, %v2128_v48 }
 0x3db   : > { %8505 = vst [vmem:[#allocation110_spill] sm:$0xff] %v6135_v22  ;;  %v6148_v34 = vsel %vm448_vm1, %v2136_v56, %v2138_v15 }
 0x3dc   : > { %2273 = vrot.lane.b32.xlu2 %v6096_v8, %s3748_s20  ;;  %2271 = vrot.lane.b32.xlu1 %v6099_v40, %s3748_s20  ;;  %v2125_v40 = vrot.slane %v6123_v2, 1  ;;  %v1960_v39 = vrot.slane %v1882_v13, 7  ;;  %8506 = vst [vmem:[#allocation141_spill] sm:$0xff] %v6148_v34  ;;  %v1958_v13 = vrot.slane %v1881_v54, 7 }
 0x3dd   : > { %2281 = vrot.lane.b32.xlu0 %v6112_v49, %s3748_s20 }
 0x3de   : > { %v6138_v63 = vsel %vm448_vm1, %v2125_v40, %v2126_v43  ;;  %v1880_v40 = vmax.f32 %v1837_v30, 0.0  ;;  %v6160_v48 = vsel %vm289_vm0, 0.0, %v1960_v39 }
 0x3df   : > { %v1845_v33 = vpop.f32.mrf.mxu2  ;;  %8509 = vst [vmem:[#allocation54_spill] sm:$0xff] %v6160_v48 }
 0x3e0   : > { %v1846_v8 = vadd.f32 %v5760_v7, %v1845_v33  ;;  %v1957_v45 = vrot.slane %v1880_v40, 7 }
 0x3e2   : > { %v1883_v49 = vmax.f32 %v1846_v8, 0.0  ;;  %v6153_v8 = vsel %vm289_vm0, 0.0, %v1954_v16 }
 0x3e3   : > { %8507 = vst [vmem:[#allocation150_spill] sm:$0xff] %v6153_v8  ;;  %v2135_v15 = vrot.slane %v6153_v8, 1 }
 0x3e4   : > { %v1961_v33 = vrot.slane %v1883_v49, 7  ;;  %2279 = vrot.lane.b32.xlu2 %v6135_v22, %s3748_s20  ;;  %2277 = vrot.lane.b32.xlu1 %v6138_v63, %s3748_s20  ;;  %v2133_v49 = vrot.slane %v6141_v38, 1  ;;  %v6172_v22 = vsel %vm289_vm0, %v1957_v45, %v1958_v13 }
 0x3e5   : > { %2287 = vrot.lane.b32.xlu0 %v6148_v34, %s3748_s20  ;;  %v2145_v34 = vrot.slane %v6160_v48, 1  ;;  %v6166_v16 = vsel %vm448_vm1, %v2135_v15, %v2136_v56  ;;  %8512 = vst [vmem:[#allocation121_spill] sm:$0xff] %v6172_v22  ;;  %v2141_v40 = vrot.slane %v6172_v22, 1 }
 0x3e6   : > { %v6156_v58 = vsel %vm289_vm0, %v1960_v39, %v1961_v33  ;;  %8510 = vst [vmem:[#allocation75_spill] sm:$0xff] %v6166_v16  ;;  %v6169_v30 = vsel %vm448_vm1, %v2131_v6, %v2133_v49  ;;  %v6175_v39 = vsel %vm289_vm0, %v1958_v13, 0.0  ;;  %v6187_v6 = vsel %vm289_vm0, 0.0, %v1957_v45 }
 0x3e7   : > { %8508 = vst [vmem:[#allocation163_spill] sm:$0xff] %v6156_v58  ;;  %v2146_v43 = vrot.slane %v6156_v58, 1  ;;  %v2143_v56 = vrot.slane %v6175_v39, 1  ;;  %v2153_v49 = vrot.slane %v5807_v11, 2  ;;  %v2151_v13 = vrot.slane %v5804_v55, 2 }
 0x3e8   : > { %8511 = vst [vmem:[#allocation109_spill] sm:$0xff] %v6169_v30  ;;  %v2140_v15 = vrot.slane %v6187_v6, 1 }
 0x3e9   : > { %v6182_v54 = vsel %vm448_vm1, %v2145_v34, %v2146_v43  ;;  %8514 = vst [vmem:[#allocation143_spill] sm:$0xff] %v6187_v6  ;;  %v6208_v11 = vsel %vm526_vm2, %v2151_v13, %v2153_v49 }
 0x3ea   : > { %8513 = vst [vmem:[#allocation131_spill] sm:$0xff] %v6182_v54  ;;  %v6198_v34 = vsel %vm448_vm1, %v2140_v15, %v2141_v40 }
 0x3eb   : > { %8516 = vst [vmem:[#allocation172_spill] sm:$0xff] %v6198_v34 }
 0x3ec   : > { %2285 = vrot.lane.b32.xlu2 %v6166_v16, %s3748_s20  ;;  %2283 = vrot.lane.b32.xlu1 %v6169_v30, %s3748_s20  ;;  %v6195_v16 = vsel %vm448_vm1, %v2141_v40, %v2143_v56  ;;  %8517 = vst [vmem:[#allocation71_spill] sm:$0xff] %v6208_v11  ;;  %v2161_v56 = vrot.slane %v5885_v31, 2  ;;  %v2150_v40 = vrot.slane %v5797_v47, 2 }
 0x3ed   : > { %2293 = vrot.lane.b32.xlu0 %v6182_v54, %s3748_s20  ;;  %8515 = vst [vmem:[#allocation164_spill] sm:$0xff] %v6195_v16  ;;  %v6201_v54 = vsel %vm289_vm0, %v1961_v33, 0.0  ;;  %v2160_v33 = vrot.slane %v5880_v29, 2 }
 0x3ee   : > { %v2148_v45 = vrot.slane %v6201_v54, 1  ;;  %v6217_v15 = vsel %vm526_vm2, %v2150_v40, %v2151_v13  ;;  %v2156_v13 = vrot.slane %v5857_v14, 2  ;;  %v2168_v40 = vrot.slane %v5916_v36, 2  ;;  %v6251_v36 = vpop.permute.xlu2 %2237 }
 0x3ef   : > { %8518 = vst [vmem:[#allocation91_spill] sm:$0xff] %v6217_v15  ;;  %v6227_v49 = vsel %vm526_vm2, %v2160_v33, %v2161_v56  ;;  %v2176_v33 = vrot.slane %v5965_v52, 2 }
 0x3f0   : > { %8520 = vst [vmem:[#allocation123_spill] sm:$0xff] %v6227_v49 }
 0x3f1   : > { %8523 = vst [vmem:[#allocation53_spill] sm:$0xff] %v6251_v36  ;;  %v2170_v36 = vrot.slane %v5936_v17, 2 }
 0x3f4   : > { %2291 = vrot.lane.b32.xlu2 %v6195_v16, %s3748_s20  ;;  %2289 = vrot.lane.b32.xlu1 %v6198_v34, %s3748_s20  ;;  %v6220_v16 = vsel %vm448_vm1, %v2146_v43, %v2148_v45  ;;  %v2166_v43 = vrot.slane %v5913_v0, 2  ;;  %v2155_v45 = vrot.slane %v5854_v5, 2 }
 0x3f5   : > { %2329 = vrot.lane.b32.xlu0 %v6208_v11, %s3749_s25  ;;  %8519 = vst [vmem:[#allocation111_spill] sm:$0xff] %v6220_v16  ;;  %v2158_v11 = vrot.slane %v5860_v35, 2 }
 0x3f6   : > { %v6247_v35 = vsel %vm526_vm2, %v2166_v43, %v2168_v40  ;;  %v6272_v40 = vpop.permute.xlu2 %2243 }
 0x3f7   : > { %8522 = vst [vmem:[#allocation151_spill] sm:$0xff] %v6247_v35 }
 0x3f8   : > { %8525 = vst [vmem:[#allocation76_spill] sm:$0xff] %v6272_v40 }
 0x3fc   : > { %2327 = vrot.lane.b32.xlu2 %v6217_v15, %s3749_s25  ;;  %2295 = vrot.lane.b32.xlu1 %v6220_v16, %s3748_s20  ;;  %v6237_v15 = vsel %vm526_vm2, %v2156_v13, %v2158_v11  ;;  %v6240_v16 = vsel %vm526_vm2, %v2155_v45, %v2156_v13  ;;  %v2163_v11 = vrot.slane %v5888_v62, 2  ;;  %v2165_v13 = vrot.slane %v5908_v3, 2 }
 0x3fd   : > { %2335 = vrot.lane.b32.xlu0 %v6227_v49, %s3749_s25  ;;  %8521 = vst [vmem:[#allocation142_spill] sm:$0xff] %v6240_v16  ;;  %v2175_v45 = vrot.slane %v5962_v25, 2 }
 0x3fe   : > { %v6258_v49 = vsel %vm526_vm2, %v2165_v13, %v2166_v43  ;;  %v2173_v43 = vrot.slane %v5944_v24, 2  ;;  %v2171_v13 = vrot.slane %v5941_v57, 2  ;;  %v6296_v40 = vpop.permute.xlu2 %2249 }
 0x3ff   : > { %v6268_v62 = vsel %vm526_vm2, %v2175_v45, %v2176_v33  ;;  %8530 = vst [vmem:[#allocation154_spill] sm:$0xff] %v6296_v40 }
 0x400   : > { %8524 = vst [vmem:[#allocation74_spill] sm:$0xff] %v6268_v62  ;;  %v6283_v45 = vsel %vm526_vm2, %v2170_v36, %v2171_v13  ;;  %v2191_v36 = vrot.slane %v6015_v44, 2 }
 0x401   : > { %8527 = vst [vmem:[#allocation101_spill] sm:$0xff] %v6283_v45 }
 0x404   : > { %2333 = vrot.lane.b32.xlu2 %v6237_v15, %s3749_s25  ;;  %2331 = vrot.lane.b32.xlu1 %v6240_v16, %s3749_s25  ;;  %v6261_v16 = vsel %vm526_vm2, %v2161_v56, %v2163_v11  ;;  %v2183_v56 = vrot.slane %v6000_v4, 2  ;;  %v2181_v11 = vrot.slane %v5997_v20, 2  ;;  %v6294_v4 = vpop.permute.xlu0 %2239 }
 0x405   : > { %2341 = vrot.lane.b32.xlu0 %v6247_v35, %s3749_s25  ;;  %v6280_v35 = vsel %vm526_vm2, %v2171_v13, %v2173_v43  ;;  %8529 = vst [vmem:[#allocation144_spill] sm:$0xff] %v6294_v4  ;;  %v2178_v43 = vrot.slane %v5968_v26, 2  ;;  %v2180_v13 = vrot.slane %v5992_v10, 2 }
 0x406   : > { %8526 = vst [vmem:[#allocation93_spill] sm:$0xff] %v6280_v35  ;;  %v6290_v24 = vsel %vm526_vm2, %v2181_v11, %v2183_v56  ;;  %v6319_v40 = vpop.permute.xlu2 %2255 }
 0x407   : > { %8528 = vst [vmem:[#allocation113_spill] sm:$0xff] %v6290_v24  ;;  %v6306_v56 = vsel %vm526_vm2, %v2176_v33, %v2178_v43  ;;  %v2186_v33 = vrot.slane %v6050_v23, 2  ;;  %v2198_v43 = vrot.slane %v6038_v21, 2  ;;  %v6339_v21 = vpop.permute.xlu1 %2241 }
 0x408   : > { %8532 = vst [vmem:[#allocation173_spill] sm:$0xff] %v6306_v56 }
 0x409   : > { %8535 = vst [vmem:[#allocation61_spill] sm:$0xff] %v6319_v40  ;;  %v2195_v40 = vrot.slane %v6085_v1, 2 }
 0x40a   : > { %8539 = vst [vmem:[#allocation23_spill] sm:$0xff] %v6339_v21 }
 0x40c   : > { %2339 = vrot.lane.b32.xlu2 %v6258_v49, %s3749_s25  ;;  %2337 = vrot.lane.b32.xlu1 %v6261_v16, %s3749_s25  ;;  %v6317_v4 = vpop.permute.xlu0 %2245 }
 0x40d   : > { %2347 = vrot.lane.b32.xlu0 %v6268_v62, %s3749_s25  ;;  %v2190_v62 = vrot.slane %v6022_v46, 2  ;;  %8534 = vst [vmem:[#allocation51_spill] sm:$0xff] %v6317_v4 }
 0x40f   : > { %v6313_v26 = vsel %vm526_vm2, %v2190_v62, %v2191_v36 }
 0x410   : > { %8533 = vst [vmem:[#allocation42_spill] sm:$0xff] %v6313_v26 }
 0x414   : > { %2345 = vrot.lane.b32.xlu2 %v6280_v35, %s3749_s25  ;;  %2343 = vrot.lane.b32.xlu1 %v6283_v45, %s3749_s25  ;;  %v6303_v45 = vsel %vm526_vm2, %v2180_v13, %v2181_v11  ;;  %v2188_v11 = vrot.slane %v6053_v59, 2  ;;  %v2196_v13 = vrot.slane %v6035_v32, 2  ;;  %v6343_v4 = vpop.permute.xlu0 %2251 }
 0x415   : > { %2353 = vrot.lane.b32.xlu0 %v6290_v24, %s3749_s25  ;;  %8531 = vst [vmem:[#allocation165_spill] sm:$0xff] %v6303_v45  ;;  %v2185_v24 = vrot.slane %v6043_v53, 2 }
 0x416   : > { %v6327_v62 = vsel %vm526_vm2, %v2186_v33, %v2188_v11  ;;  %v6337_v59 = vsel %vm526_vm2, %v2196_v13, %v2198_v43  ;;  %8540 = vst [vmem:[#allocation112_spill] sm:$0xff] %v6343_v4  ;;  %v6352_v43 = vsel %vm526_vm2, %v2195_v40, %v2196_v13  ;;  %v6364_v4 = vpop.permute.xlu1 %2247  ;;  %v2201_v13 = vrot.slane %v6102_v60, 2 }
 0x417   : > { %8536 = vst [vmem:[#allocation59_spill] sm:$0xff] %v6327_v62 }
 0x418   : > { %8538 = vst [vmem:[#allocation81_spill] sm:$0xff] %v6337_v59 }
 0x419   : > { %8544 = vst [vmem:[#allocation78_spill] sm:$0xff] %v6364_v4 }
 0x41c   : > { %2351 = vrot.lane.b32.xlu2 %v6303_v45, %s3749_s25  ;;  %2349 = vrot.lane.b32.xlu1 %v6306_v56, %s3749_s25  ;;  %v6330_v56 = vsel %vm526_vm2, %v2185_v24, %v2186_v33  ;;  %v2193_v24 = vrot.slane %v6070_v51, 2  ;;  %v2206_v33 = vrot.slane %v6080_v9, 2 }
 0x41d   : > { %2359 = vrot.lane.b32.xlu0 %v6313_v26, %s3749_s25  ;;  %8537 = vst [vmem:[#allocation5_spill] sm:$0xff] %v6330_v56  ;;  %v2205_v26 = vrot.slane %v6089_v27, 2 }
 0x41e   : > { %v6345_v11 = vpop.permute.xlu2 %2261  ;;  %v6355_v21 = vsel %vm526_vm2, %v2191_v36, %v2193_v24  ;;  %v2203_v36 = vrot.slane %v6105_v61, 2  ;;  %v2213_v24 = vrot.slane %v6118_v28, 2  ;;  %v6390_v28 = vpop.permute.xlu1 %2253 }
 0x41f   : > { %8541 = vst [vmem:[#allocation124_spill] sm:$0xff] %v6345_v11  ;;  %v6362_v51 = vsel %vm526_vm2, %v2205_v26, %v2206_v33  ;;  %v2200_v26 = vrot.slane %v6123_v2, 2 }
 0x420   : > { %8542 = vst [vmem:[#allocation134_spill] sm:$0xff] %v6355_v21 }
 0x421   : > { %8543 = vst [vmem:[#allocation31_spill] sm:$0xff] %v6362_v51  ;;  %v6381_v4 = vsel %vm526_vm2, %v2200_v26, %v2201_v13  ;;  %v2221_v26 = vrot.slane %v6156_v58, 2 }
 0x422   : > { %8548 = vst [vmem:[#allocation15_spill] sm:$0xff] %v6390_v28 }
 0x424   : > { %2357 = vrot.lane.b32.xlu2 %v6327_v62, %s3749_s25  ;;  %2355 = vrot.lane.b32.xlu1 %v6330_v56, %s3749_s25 }
 0x425   : > { %2365 = vrot.lane.b32.xlu0 %v6337_v59, %s3749_s25  ;;  %v2211_v59 = vrot.slane %v6115_v19, 2 }
 0x426   : > { %v6368_v11 = vpop.permute.xlu0 %2257 }
 0x427   : > { %8545 = vst [vmem:[#allocation175_spill] sm:$0xff] %v6368_v11  ;;  %v6388_v61 = vsel %vm526_vm2, %v2211_v59, %v2213_v24  ;;  %v2210_v11 = vrot.slane %v6153_v8, 2 }
 0x428   : > { %8547 = vst [vmem:[#allocation192_spill] sm:$0xff] %v6388_v61 }
 0x429   : > { %v6403_v24 = vsel %vm526_vm2, %v2210_v11, %v2211_v59  ;;  %v2218_v11 = vrot.slane %v6175_v39, 2 }
 0x42a   : > { %8550 = vst [vmem:[#allocation60_spill] sm:$0xff] %v6403_v24 }
 0x42c   : > { %2363 = vrot.lane.b32.xlu2 %v6352_v43, %s3749_s25  ;;  %2361 = vrot.lane.b32.xlu1 %v6355_v21, %s3749_s25  ;;  %v6378_v21 = vsel %vm526_vm2, %v2201_v13, %v2203_v36  ;;  %v2208_v13 = vrot.slane %v6141_v38, 2 }
 0x42d   : > { %2371 = vrot.lane.b32.xlu0 %v6362_v51, %s3749_s25  ;;  %v2220_v51 = vrot.slane %v6160_v48, 2 }
 0x42e   : > { %v6370_v40 = vpop.permute.xlu2 %2267  ;;  %v6406_v28 = vsel %vm526_vm2, %v2206_v33, %v2208_v13  ;;  %v2216_v33 = vrot.slane %v6172_v22, 2  ;;  %v2215_v13 = vrot.slane %v6187_v6, 2 }
 0x42f   : > { %8546 = vst [vmem:[#allocation184_spill] sm:$0xff] %v6370_v40  ;;  %v6413_v38 = vsel %vm526_vm2, %v2220_v51, %v2221_v26 }
 0x430   : > { %8551 = vst [vmem:[#allocation195_spill] sm:$0xff] %v6413_v38  ;;  %v6430_v51 = vsel %vm526_vm2, %v2215_v13, %v2216_v33 }
 0x431   : > { %8556 = vst [vmem:[#allocation114_spill] sm:$0xff] %v6430_v51 }
 0x434   : > { %2369 = vrot.lane.b32.xlu2 %v6378_v21, %s3749_s25  ;;  %2367 = vrot.lane.b32.xlu1 %v6381_v4, %s3749_s25 }
 0x435   : > { %2377 = vrot.lane.b32.xlu0 %v6388_v61, %s3749_s25  ;;  %v6415_v61 = vpop.permute.xlu1 %2259 }
 0x436   : > { %v6394_v40 = vpop.permute.xlu2 %2273  ;;  %v6396_v36 = vpop.permute.xlu0 %2263  ;;  %8552 = vst [vmem:[#allocation77_spill] sm:$0xff] %v6415_v61 }
 0x437   : > { %8549 = vst [vmem:[#allocation21_spill] sm:$0xff] %v6396_v36 }
 0x43c   : > { %2375 = vrot.lane.b32.xlu2 %v6403_v24, %s3749_s25  ;;  %2373 = vrot.lane.b32.xlu1 %v6406_v28, %s3749_s25  ;;  %v6427_v24 = vsel %vm526_vm2, %v2216_v33, %v2218_v11 }
 0x43d   : > { %2383 = vrot.lane.b32.xlu0 %v6413_v38, %s3749_s25  ;;  %8555 = vst [vmem:[#allocation25_spill] sm:$0xff] %v6427_v24  ;;  %v2223_v38 = vrot.slane %v6201_v54, 2 }
 0x43e   : > { %v6419_v36 = vpop.permute.xlu2 %2279  ;;  %v6421_v59 = vpop.permute.xlu0 %2269 }
 0x43f   : > { %8553 = vst [vmem:[#allocation7_spill] sm:$0xff] %v6419_v36  ;;  %v6446_v33 = vsel %vm526_vm2, %v2221_v26, %v2223_v38 }
 0x440   : > { %8554 = vst [vmem:[#allocation94_spill] sm:$0xff] %v6421_v59 }
 0x441   : > { %8560 = vst [vmem:[#allocation160_spill] sm:$0xff] %v6446_v33 }
 0x444   : > { %2381 = vrot.lane.b32.xlu2 %v6427_v24, %s3749_s25  ;;  %2379 = vrot.lane.b32.xlu1 %v6430_v51, %s3749_s25 }
 0x445   : > { %2419 = vrot.lane.b32.xlu0 %v5804_v55, %s3750_s26 }
 0x446   : > { %v6438_v39 = vpop.permute.xlu1 %2265  ;;  %v6440_v36 = vpop.permute.xlu2 %2285 }
 0x447   : > { %8557 = vst [vmem:[#allocation126_spill] sm:$0xff] %v6438_v39  ;;  %v6443_v11 = vpop.permute.xlu0 %2275 }
 0x448   : > { %8558 = vst [vmem:[#allocation145_spill] sm:$0xff] %v6440_v36 }
 0x449   : > { %8559 = vst [vmem:[#allocation155_spill] sm:$0xff] %v6443_v11 }
 0x44c   : > { %2417 = vrot.lane.b32.xlu2 %v5797_v47, %s3750_s26  ;;  %2385 = vrot.lane.b32.xlu1 %v6446_v33, %s3749_s25  ;;  %v1848_v47 = vpop.f32.mrf.mxu2 }
 0x44d   : > { %2425 = vrot.lane.b32.xlu0 %v5880_v29, %s3750_s26 }
 0x44e   : > { %v6454_v13 = vpop.permute.xlu1 %2271  ;;  %v6456_v55 = vpop.permute.xlu2 %2291 }
 0x44f   : > { %8561 = vst [vmem:[#allocation80_spill] sm:$0xff] %v6454_v13  ;;  %v6458_v36 = vpop.permute.xlu0 %2281 }
 0x450   : > { %8562 = vst [vmem:[#allocation185_spill] sm:$0xff] %v6456_v55 }
 0x451   : > { %8563 = vst [vmem:[#allocation193_spill] sm:$0xff] %v6458_v36 }
 0x454   : > { %2423 = vrot.lane.b32.xlu2 %v5857_v14, %s3750_s26  ;;  %2421 = vrot.lane.b32.xlu1 %v5854_v5, %s3750_s26 }
 0x455   : > { %2431 = vrot.lane.b32.xlu0 %v5913_v0, %s3750_s26 }
 0x456   : > { %v6466_v54 = vpop.permute.xlu1 %2277  ;;  %v6468_v26 = vpop.permute.xlu2 %2327 }
 0x457   : > { %8564 = vst [vmem:[#allocation20_spill] sm:$0xff] %v6466_v54  ;;  %v6470_v38 = vpop.permute.xlu0 %2287 }
 0x458   : > { %8565 = vst [vmem:[#allocation43_spill] sm:$0xff] %v6468_v26 }
 0x459   : > { %8566 = vst [vmem:[#allocation67_spill] sm:$0xff] %v6470_v38 }
 0x45c   : > { %2429 = vrot.lane.b32.xlu2 %v5908_v3, %s3750_s26  ;;  %2427 = vrot.lane.b32.xlu1 %v5885_v31, %s3750_s26 }
 0x45d   : > { %2437 = vrot.lane.b32.xlu0 %v5962_v25, %s3750_s26 }
 0x45e   : > { %v6478_v55 = vpop.permute.xlu1 %2283  ;;  %v6480_v36 = vpop.permute.xlu2 %2333 }
 0x45f   : > { %8567 = vst [vmem:[#allocation196_spill] sm:$0xff] %v6478_v55  ;;  %v6482_v33 = vpop.permute.xlu0 %2293 }
 0x460   : > { %8568 = vst [vmem:[#allocation105_spill] sm:$0xff] %v6480_v36 }
 0x461   : > { %8569 = vst [vmem:[#allocation82_spill] sm:$0xff] %v6482_v33 }
 0x464   : > { %2435 = vrot.lane.b32.xlu2 %v5941_v57, %s3750_s26  ;;  %2433 = vrot.lane.b32.xlu1 %v5936_v17, %s3750_s26 }
 0x465   : > { %2443 = vrot.lane.b32.xlu0 %v5997_v20, %s3750_s26 }
 0x466   : > { %v6490_v38 = vpop.permute.xlu2 %2339  ;;  %v6492_v54 = vpop.permute.xlu1 %2289 }
 0x467   : > { %8570 = vst [vmem:[#allocation6_spill] sm:$0xff] %v6492_v54  ;;  %v6494_v24 = vpop.permute.xlu0 %2329 }
 0x468   : > { %8571 = vst [vmem:[#allocation96_spill] sm:$0xff] %v6494_v24 }
 0x46c   : > { %2441 = vrot.lane.b32.xlu2 %v5992_v10, %s3750_s26  ;;  %2439 = vrot.lane.b32.xlu1 %v5965_v52, %s3750_s26 }
 0x46d   : > { %2449 = vrot.lane.b32.xlu0 %v6022_v46, %s3750_s26 }
 0x46e   : > { %v6502_v33 = vpop.permute.xlu2 %2345  ;;  %v6504_v55 = vpop.permute.xlu1 %2295 }
 0x46f   : > { %8572 = vst [vmem:[#allocation24_spill] sm:$0xff] %v6504_v55  ;;  %v6506_v36 = vpop.permute.xlu0 %2335 }
 0x470   : > { %8573 = vst [vmem:[#allocation104_spill] sm:$0xff] %v6506_v36 }
 0x474   : > { %2447 = vrot.lane.b32.xlu2 %v6050_v23, %s3750_s26  ;;  %2445 = vrot.lane.b32.xlu1 %v6043_v53, %s3750_s26 }
 0x475   : > { %2455 = vrot.lane.b32.xlu0 %v6035_v32, %s3750_s26 }
 0x476   : > { %v6514_v54 = vpop.permute.xlu2 %2351  ;;  %v6516_v24 = vpop.permute.xlu1 %2331 }
 0x477   : > { %8574 = vst [vmem:[#allocation116_spill] sm:$0xff] %v6516_v24  ;;  %v6518_v26 = vpop.permute.xlu0 %2341  ;;  %v1851_v24 = vpop.f32.mrf.mxu2 }
 0x478   : > { %v1852_v51 = vadd.f32 %v5760_v7, %v1851_v24 }
 0x47a   : > { %v1885_v23 = vmax.f32 %v1852_v51, 0.0 }
 0x47c   : > { %2453 = vrot.lane.b32.xlu2 %v6085_v1, %s3750_s26  ;;  %2451 = vrot.lane.b32.xlu1 %v6015_v44, %s3750_s26  ;;  %v6558_v24 = vrot.slane %v1885_v23, 7 }
 0x47d   : > { %2461 = vrot.lane.b32.xlu0 %v6089_v27, %s3750_s26 }
 0x47e   : > { %v6526_v55 = vpop.permute.xlu2 %2357  ;;  %v6528_v36 = vpop.permute.xlu1 %2337 }
 0x47f   : > { %8575 = vst [vmem:[#allocation32_spill] sm:$0xff] %v6526_v55  ;;  %v6530_v13 = vpop.permute.xlu0 %2347  ;;  %v1849_v55 = vadd.f32 %v5760_v7, %v1848_v47 }
 0x484   : > { %2459 = vrot.lane.b32.xlu2 %v6102_v60, %s3750_s26  ;;  %2457 = vrot.lane.b32.xlu1 %v6123_v2, %s3750_s26 }
 0x485   : > { %2467 = vrot.lane.b32.xlu0 %v6115_v19, %s3750_s26  ;;  %v1884_v19 = vmax.f32 %v1849_v55, 0.0 }
 0x486   : > { %v6538_v44 = vpop.permute.xlu2 %2363  ;;  %v6540_v46 = vpop.permute.xlu1 %2343 }
 0x487   : > { %8576 = vst [vmem:[#allocation47_spill] sm:$0xff] %v6540_v46  ;;  %v6542_v59 = vpop.permute.xlu0 %2353  ;;  %v1963_v7 = vrot.slane %v1884_v19, 7 }
 0x488   : > { %8577 = vst [vmem:[#allocation166_spill] sm:$0xff] %v6542_v59 }
 0x489   : > { %v6566_v47 = vsel %vm289_vm0, %v1963_v7, %v6558_v24  ;;  %v6577_v19 = vsel %vm289_vm0, 0.0, %v1963_v7 }
 0x48a   : > { %8581 = vst [vmem:[#allocation22_spill] sm:$0xff] %v6566_v47 }
 0x48b   : > { %8585 = vst [vmem:[#allocation63_spill] sm:$0xff] %v6577_v19 }
 0x48c   : > { %2465 = vrot.lane.b32.xlu2 %v6153_v8, %s3750_s26  ;;  %2463 = vrot.lane.b32.xlu1 %v6080_v9, %s3750_s26 }
 0x48d   : > { %2473 = vrot.lane.b32.xlu0 %v6160_v48, %s3750_s26 }
 0x48e   : > { %v6552_v53 = vpop.permute.xlu2 %2369  ;;  %v6554_v39 = vpop.permute.xlu1 %2349 }
 0x48f   : > { %8578 = vst [vmem:[#allocation176_spill] sm:$0xff] %v6552_v53  ;;  %v6556_v11 = vpop.permute.xlu0 %2359 }
 0x490   : > { %8579 = vst [vmem:[#allocation182_spill] sm:$0xff] %v6554_v39  ;;  %v8620_v39 = vld [vmem:[#allocation90_spill] sm:$0xff] }
 0x491   : > { %8580 = vst [vmem:[#allocation187_spill] sm:$0xff] %v6556_v11 }
 0x494   : > { %2471 = vrot.lane.b32.xlu2 %v6172_v22, %s3750_s26  ;;  %2469 = vrot.lane.b32.xlu1 %v6187_v6, %s3750_s26 }
 0x495   : > { %2479 = vrot.lane.b32.xlu0 %v6566_v47, %s3750_s26 }
 0x496   : > { %v6570_v55 = vpop.permute.xlu2 %2375  ;;  %v6572_v51 = vpop.permute.xlu1 %2355 }
 0x497   : > { %8582 = vst [vmem:[#allocation44_spill] sm:$0xff] %v6570_v55  ;;  %v6574_v23 = vpop.permute.xlu0 %2365 }
 0x498   : > { %8583 = vst [vmem:[#allocation56_spill] sm:$0xff] %v6572_v51 }
 0x499   : > { %8584 = vst [vmem:[#allocation73_spill] sm:$0xff] %v6574_v23  ;;  %v8611_v23 = vld [vmem:[#allocation106_spill] sm:$0xff] }
 0x49c   : > { %2477 = vrot.lane.b32.xlu2 %v6577_v19, %s3750_s26  ;;  %2475 = vrot.lane.b32.xlu1 %v6156_v58, %s3750_s26 }
 0x49d   : > { %2517 = vrot.lane.b32.xlu0 %v5870_v41, %s3751_s27 }
 0x49e   : > { %v6585_v53 = vpop.permute.xlu2 %2381  ;;  %v6587_v48 = vpop.permute.xlu1 %2361 }
 0x49f   : > { %8586 = vst [vmem:[#allocation11_spill] sm:$0xff] %v6585_v53  ;;  %v6589_v55 = vpop.permute.xlu0 %2371 }
 0x4a0   : > { %8587 = vst [vmem:[#allocation84_spill] sm:$0xff] %v6587_v48  ;;  %v8596_v48 = vld [vmem:[#allocation65_spill] sm:$0xff] }
 0x4a1   : > { %8588 = vst [vmem:[#allocation30_spill] sm:$0xff] %v6589_v55 }
 0x4a4   : > { %2515 = vrot.lane.b32.xlu2 %v5820_v50, %s3751_s27  ;;  %2513 = vrot.lane.b32.xlu1 %v5823_v42, %s3751_s27  ;;  %v8592_v50 = vld [vmem:[#allocation120_spill] sm:$0xff] }
 0x4a5   : > { %2523 = vrot.lane.b32.xlu0 %v5895_v18, %s3751_s27 }
 0x4a6   : > { %v6597_v7 = vpop.permute.xlu2 %2417  ;;  %v6599_v58 = vpop.permute.xlu1 %2367 }
 0x4a7   : > { %8589 = vst [vmem:[#allocation115_spill] sm:$0xff] %v6597_v7  ;;  %v6601_v22 = vpop.permute.xlu0 %2377 }
 0x4a8   : > { %8590 = vst [vmem:[#allocation127_spill] sm:$0xff] %v6599_v58  ;;  %v8598_v58 = vld [vmem:[#allocation148_spill] sm:$0xff] }
 0x4a9   : > { %8591 = vst [vmem:[#allocation137_spill] sm:$0xff] %v6601_v22  ;;  %v8597_v22 = vld [vmem:[#allocation86_spill] sm:$0xff] }
 0x4ac   : > { %2521 = vrot.lane.b32.xlu2 %v5898_v37, %s3751_s27  ;;  %2519 = vrot.lane.b32.xlu1 %v5867_v12, %s3751_s27 }
 0x4ad   : > { %2529 = vrot.lane.b32.xlu0 %v8592_v50, %s3751_s27 }
 0x4ae   : > { %v6609_v53 = vpop.permute.xlu2 %2423  ;;  %v6611_v42 = vpop.permute.xlu1 %2373 }
 0x4af   : > { %8593 = vst [vmem:[#allocation146_spill] sm:$0xff] %v6609_v53  ;;  %v6613_v55 = vpop.permute.xlu0 %2383  ;;  %v8602_v53 = vld [vmem:[#allocation138_spill] sm:$0xff] }
 0x4b0   : > { %8594 = vst [vmem:[#allocation167_spill] sm:$0xff] %v6611_v42  ;;  %v8604_v42 = vld [vmem:[#allocation108_spill] sm:$0xff] }
 0x4b1   : > { %8595 = vst [vmem:[#allocation177_spill] sm:$0xff] %v6613_v55  ;;  %v8603_v55 = vld [vmem:[#allocation3_spill] sm:$0xff] }
 0x4b4   : > { %2527 = vrot.lane.b32.xlu2 %v8596_v48, %s3751_s27  ;;  %2525 = vrot.lane.b32.xlu1 %v8597_v22, %s3751_s27  ;;  %v8626_v48 = vld [vmem:[#allocation111_spill] sm:$0xff] }
 0x4b5   : > { %2535 = vrot.lane.b32.xlu0 %v8598_v58, %s3751_s27 }
 0x4b6   : > { %v6621_v11 = vpop.permute.xlu2 %2429  ;;  %v6623_v7 = vpop.permute.xlu1 %2379 }
 0x4b7   : > { %8599 = vst [vmem:[#allocation186_spill] sm:$0xff] %v6621_v11  ;;  %v6625_v6 = vpop.permute.xlu0 %2419  ;;  %v8607_v11 = vld [vmem:[#allocation162_spill] sm:$0xff] }
 0x4b8   : > { %8600 = vst [vmem:[#allocation194_spill] sm:$0xff] %v6623_v7  ;;  %v8608_v7 = vld [vmem:[#allocation68_spill] sm:$0xff] }
 0x4b9   : > { %8601 = vst [vmem:[#allocation18_spill] sm:$0xff] %v6625_v6  ;;  %v8609_v6 = vld [vmem:[#allocation50_spill] sm:$0xff] }
 0x4bc   : > { %2533 = vrot.lane.b32.xlu2 %v8602_v53, %s3751_s27  ;;  %2531 = vrot.lane.b32.xlu1 %v8603_v55, %s3751_s27 }
 0x4bd   : > { %2541 = vrot.lane.b32.xlu0 %v8604_v42, %s3751_s27 }
 0x4be   : > { %v6633_v50 = vpop.permute.xlu2 %2435  ;;  %v6635_v51 = vpop.permute.xlu1 %2385 }
 0x4bf   : > { %8605 = vst [vmem:[#allocation27_spill] sm:$0xff] %v6635_v51  ;;  %v6637_v58 = vpop.permute.xlu0 %2425  ;;  %v8612_v51 = vld [vmem:[#allocation70_spill] sm:$0xff] }
 0x4c0   : > { %8606 = vst [vmem:[#allocation72_spill] sm:$0xff] %v6637_v58 }
 0x4c4   : > { %2539 = vrot.lane.b32.xlu2 %v8607_v11, %s3751_s27  ;;  %2537 = vrot.lane.b32.xlu1 %v8608_v7, %s3751_s27  ;;  %v8616_v7 = vld [vmem:[#allocation139_spill] sm:$0xff] }
 0x4c5   : > { %2547 = vrot.lane.b32.xlu0 %v8609_v6, %s3751_s27 }
 0x4c6   : > { %v6645_v53 = vpop.permute.xlu2 %2441  ;;  %v6647_v55 = vpop.permute.xlu1 %2421 }
 0x4c7   : > { %8610 = vst [vmem:[#allocation197_spill] sm:$0xff] %v6647_v55  ;;  %v6649_v42 = vpop.permute.xlu0 %2431  ;;  %v8617_v55 = vld [vmem:[#allocation156_spill] sm:$0xff] }
 0x4cc   : > { %2545 = vrot.lane.b32.xlu2 %v8611_v23, %s3751_s27  ;;  %2543 = vrot.lane.b32.xlu1 %v8612_v51, %s3751_s27 }
 0x4cd   : > { %2553 = vrot.lane.b32.xlu0 %v6138_v63, %s3751_s27 }
 0x4ce   : > { %v6657_v11 = vpop.permute.xlu2 %2447  ;;  %v6659_v58 = vpop.permute.xlu1 %2427 }
 0x4cf   : > { %8613 = vst [vmem:[#allocation83_spill] sm:$0xff] %v6657_v11  ;;  %v6661_v6 = vpop.permute.xlu0 %2437 }
 0x4d0   : > { %8614 = vst [vmem:[#allocation10_spill] sm:$0xff] %v6659_v58  ;;  %v8621_v58 = vld [vmem:[#allocation110_spill] sm:$0xff] }
 0x4d1   : > { %8615 = vst [vmem:[#allocation97_spill] sm:$0xff] %v6661_v6 }
 0x4d4   : > { %2551 = vrot.lane.b32.xlu2 %v8616_v7, %s3751_s27  ;;  %2549 = vrot.lane.b32.xlu1 %v8617_v55, %s3751_s27 }
 0x4d5   : > { %2559 = vrot.lane.b32.xlu0 %v6169_v30, %s3751_s27 }
 0x4d6   : > { %v6669_v23 = vpop.permute.xlu2 %2453  ;;  %v6671_v51 = vpop.permute.xlu1 %2433 }
 0x4d7   : > { %8618 = vst [vmem:[#allocation29_spill] sm:$0xff] %v6669_v23  ;;  %v6673_v8 = vpop.permute.xlu0 %2443  ;;  %v8624_v23 = vld [vmem:[#allocation141_spill] sm:$0xff] }
 0x4d8   : > { %8619 = vst [vmem:[#allocation117_spill] sm:$0xff] %v6673_v8  ;;  %v8625_v8 = vld [vmem:[#allocation75_spill] sm:$0xff] }
 0x4dc   : > { %2557 = vrot.lane.b32.xlu2 %v8620_v39, %s3751_s27  ;;  %2555 = vrot.lane.b32.xlu1 %v8621_v58, %s3751_s27 }
 0x4dd   : > { %2565 = vrot.lane.b32.xlu0 %v6198_v34, %s3751_s27 }
 0x4de   : > { %v6681_v52 = vpop.permute.xlu2 %2459  ;;  %v6683_v61 = vpop.permute.xlu1 %2439 }
 0x4df   : > { %8622 = vst [vmem:[#allocation129_spill] sm:$0xff] %v6681_v52  ;;  %v6685_v11 = vpop.permute.xlu0 %2449  ;;  %v6701_v52 = vsel %vm289_vm0, %v6558_v24, 0.0  ;;  %v2227_v24 = vrot.slane %v6577_v19, 1  ;;  %v8649_v19 = vld [vmem:[#allocation151_spill] sm:$0xff] }
 0x4e0   : > { %8623 = vst [vmem:[#allocation33_spill] sm:$0xff] %v6685_v11  ;;  %v8630_v11 = vld [vmem:[#allocation164_spill] sm:$0xff]  ;;  %v2230_v30 = vrot.slane %v6701_v52, 1 }
 0x4e1   : > { %8629 = vst [vmem:[#allocation169_spill] sm:$0xff] %v6701_v52 }
 0x4e4   : > { %2563 = vrot.lane.b32.xlu2 %v8624_v23, %s3751_s27  ;;  %2561 = vrot.lane.b32.xlu1 %v8625_v8, %s3751_s27  ;;  %v8631_v23 = vld [vmem:[#allocation131_spill] sm:$0xff] }
 0x4e5   : > { %2571 = vrot.lane.b32.xlu0 %v8626_v48, %s3751_s27  ;;  %v8632_v8 = vld [vmem:[#allocation91_spill] sm:$0xff] }
 0x4e6   : > { %v6693_v6 = vpop.permute.xlu2 %2465  ;;  %v6695_v59 = vpop.permute.xlu1 %2445 }
 0x4e7   : > { %8627 = vst [vmem:[#allocation48_spill] sm:$0xff] %v6693_v6  ;;  %v6697_v34 = vpop.permute.xlu0 %2455 }
 0x4e8   : > { %8628 = vst [vmem:[#allocation62_spill] sm:$0xff] %v6697_v34  ;;  %v2228_v34 = vrot.slane %v6566_v47, 1 }
 0x4ec   : > { %2567 = vrot.lane.b32.xlu1 %v8630_v11, %s3751_s27  ;;  %2569 = vrot.lane.b32.xlu2 %v8631_v23, %s3751_s27  ;;  %v6719_v11 = vsel %vm448_vm1, %v2227_v24, %v2228_v34  ;;  %v6722_v23 = vsel %vm448_vm1, %v2228_v34, %v2230_v30  ;;  %v8640_v24 = vld [vmem:[#allocation71_spill] sm:$0xff]  ;;  %v8641_v30 = vld [vmem:[#allocation142_spill] sm:$0xff] }
 0x4ed   : > { %2609 = vrot.lane.b32.xlu0 %v8632_v8, %s3752_s28  ;;  %8636 = vst [vmem:[#allocation152_spill] sm:$0xff] %v6719_v11 }
 0x4ee   : > { %v6709_v48 = vpop.permute.xlu2 %2471  ;;  %v6711_v6 = vpop.permute.xlu1 %2451  ;;  %8637 = vst [vmem:[#allocation79_spill] sm:$0xff] %v6722_v23 }
 0x4ef   : > { %8633 = vst [vmem:[#allocation188_spill] sm:$0xff] %v6709_v48  ;;  %v6715_v46 = vpop.permute.xlu0 %2461 }
 0x4f0   : > { %8634 = vst [vmem:[#allocation8_spill] sm:$0xff] %v6711_v6  ;;  %v8657_v6 = vld [vmem:[#allocation113_spill] sm:$0xff] }
 0x4f1   : > { %8635 = vst [vmem:[#allocation26_spill] sm:$0xff] %v6715_v46 }
 0x4f4   : > { %2573 = vrot.lane.b32.xlu1 %v6719_v11, %s3751_s27  ;;  %2575 = vrot.lane.b32.xlu2 %v6722_v23, %s3751_s27 }
 0x4f5   : > { %2615 = vrot.lane.b32.xlu0 %v6237_v15, %s3752_s28 }
 0x4f6   : > { %v6730_v8 = vpop.permute.xlu2 %2477  ;;  %v6732_v48 = vpop.permute.xlu1 %2457 }
 0x4f7   : > { %8638 = vst [vmem:[#allocation198_spill] sm:$0xff] %v6730_v8  ;;  %v6734_v52 = vpop.permute.xlu0 %2467  ;;  %v8645_v8 = vld [vmem:[#allocation123_spill] sm:$0xff] }
 0x4f8   : > { %8639 = vst [vmem:[#allocation125_spill] sm:$0xff] %v6734_v52 }
 0x4fc   : > { %2611 = vrot.lane.b32.xlu1 %v8640_v24, %s3752_s28  ;;  %2613 = vrot.lane.b32.xlu2 %v8641_v30, %s3752_s28 }
 0x4fd   : > { %2621 = vrot.lane.b32.xlu0 %v6258_v49, %s3752_s28 }
 0x4fe   : > { %v6742_v34 = vpop.permute.xlu2 %2515  ;;  %v6744_v23 = vpop.permute.xlu1 %2463 }
 0x4ff   : > { %8642 = vst [vmem:[#allocation85_spill] sm:$0xff] %v6742_v34  ;;  %v6746_v46 = vpop.permute.xlu0 %2473 }
 0x500   : > { %8643 = vst [vmem:[#allocation13_spill] sm:$0xff] %v6744_v23 }
 0x501   : > { %8644 = vst [vmem:[#allocation99_spill] sm:$0xff] %v6746_v46  ;;  %v8650_v46 = vld [vmem:[#allocation101_spill] sm:$0xff] }
 0x504   : > { %2617 = vrot.lane.b32.xlu1 %v8645_v8, %s3752_s28  ;;  %2619 = vrot.lane.b32.xlu2 %v6261_v16, %s3752_s28 }
 0x505   : > { %2627 = vrot.lane.b32.xlu0 %v6280_v35, %s3752_s28 }
 0x506   : > { %v6754_v24 = vpop.permute.xlu2 %2521  ;;  %v6756_v52 = vpop.permute.xlu1 %2469 }
 0x507   : > { %8646 = vst [vmem:[#allocation35_spill] sm:$0xff] %v6754_v24  ;;  %v6758_v47 = vpop.permute.xlu0 %2479  ;;  %v8653_v24 = vld [vmem:[#allocation74_spill] sm:$0xff] }
 0x508   : > { %8647 = vst [vmem:[#allocation107_spill] sm:$0xff] %v6756_v52 }
 0x509   : > { %8648 = vst [vmem:[#allocation119_spill] sm:$0xff] %v6758_v47  ;;  %v8654_v47 = vld [vmem:[#allocation173_spill] sm:$0xff] }
 0x50c   : > { %2623 = vrot.lane.b32.xlu1 %v8649_v19, %s3752_s28  ;;  %2625 = vrot.lane.b32.xlu2 %v8650_v46, %s3752_s28 }
 0x50d   : > { %2633 = vrot.lane.b32.xlu0 %v6303_v45, %s3752_s28 }
 0x50e   : > { %v6766_v23 = vpop.permute.xlu2 %2527  ;;  %v6768_v11 = vpop.permute.xlu1 %2475 }
 0x50f   : > { %8651 = vst [vmem:[#allocation147_spill] sm:$0xff] %v6768_v11  ;;  %v6770_v34 = vpop.permute.xlu0 %2517 }
 0x510   : > { %8652 = vst [vmem:[#allocation157_spill] sm:$0xff] %v6770_v34  ;;  %v8659_v34 = vld [vmem:[#allocation42_spill] sm:$0xff] }
 0x514   : > { %2629 = vrot.lane.b32.xlu1 %v8653_v24, %s3752_s28  ;;  %2631 = vrot.lane.b32.xlu2 %v8654_v47, %s3752_s28  ;;  %v8660_v24 = vld [vmem:[#allocation134_spill] sm:$0xff] }
 0x515   : > { %2639 = vrot.lane.b32.xlu0 %v6327_v62, %s3752_s28 }
 0x516   : > { %v6778_v52 = vpop.permute.xlu2 %2533  ;;  %v6780_v35 = vpop.permute.xlu1 %2513 }
 0x517   : > { %8655 = vst [vmem:[#allocation168_spill] sm:$0xff] %v6780_v35  ;;  %v6782_v45 = vpop.permute.xlu0 %2523  ;;  %v8663_v35 = vld [vmem:[#allocation81_spill] sm:$0xff] }
 0x518   : > { %8656 = vst [vmem:[#allocation178_spill] sm:$0xff] %v6782_v45 }
 0x51c   : > { %2635 = vrot.lane.b32.xlu1 %v8657_v6, %s3752_s28  ;;  %2637 = vrot.lane.b32.xlu2 %v6330_v56, %s3752_s28 }
 0x51d   : > { %2645 = vrot.lane.b32.xlu0 %v6352_v43, %s3752_s28 }
 0x51e   : > { %v6790_v11 = vpop.permute.xlu2 %2539  ;;  %v6792_v47 = vpop.permute.xlu1 %2519 }
 0x51f   : > { %8658 = vst [vmem:[#allocation183_spill] sm:$0xff] %v6792_v47  ;;  %v2530_v62 = vpop.permute.xlu0 %2529 }
 0x524   : > { %2641 = vrot.lane.b32.xlu1 %v8659_v34, %s3752_s28  ;;  %2643 = vrot.lane.b32.xlu2 %v8660_v24, %s3752_s28 }
 0x525   : > { %2651 = vrot.lane.b32.xlu0 %v6378_v21, %s3752_s28 }
 0x526   : > { %v6800_v6 = vpop.permute.xlu2 %2545  ;;  %v6802_v56 = vpop.permute.xlu1 %2525 }
 0x527   : > { %8661 = vst [vmem:[#allocation190_spill] sm:$0xff] %v6800_v6  ;;  %v2536_v45 = vpop.permute.xlu0 %2535 }
 0x528   : > { %8662 = vst [vmem:[#allocation28_spill] sm:$0xff] %v6802_v56 }
 0x52c   : > { %2647 = vrot.lane.b32.xlu1 %v8663_v35, %s3752_s28  ;;  %2649 = vrot.lane.b32.xlu2 %v6381_v4, %s3752_s28 }
 0x52d   : > { %2917 = vrot.lane.b32.xlu0 %v6352_v43, %s3755_s6 }
 0x52e   : > { %v6810_v34 = vpop.permute.xlu2 %2551  ;;  %v6812_v24 = vpop.permute.xlu1 %2531 }
 0x52f   : > { %8664 = vst [vmem:[#allocation153_spill] sm:$0xff] %v6810_v34  ;;  %v6814_v47 = vpop.permute.xlu0 %2541 }
 0x534   : > { %2737 = vrot.lane.b32.xlu1 %v6085_v1, %s3753_s29  ;;  %2827 = vrot.lane.b32.xlu2 %v8617_v55, %s3754_s30 }
 0x535   : > { %2739 = vrot.lane.b32.xlu0 %v6035_v32, %s3753_s29 }
 0x536   : > { %v6822_v56 = vpop.permute.xlu2 %2557  ;;  %v6824_v6 = vpop.permute.xlu1 %2537 }
 0x537   : > { %8665 = vst [vmem:[#allocation57_spill] sm:$0xff] %v6822_v56  ;;  %v6826_v43 = vpop.permute.xlu0 %2547 }
 0x53c   : > { %2705 = vrot.lane.b32.xlu1 %v5854_v5, %s3753_s29  ;;  %2795 = vrot.lane.b32.xlu2 %v5870_v41, %s3754_s30 }
 0x53d   : > { %2919 = vrot.lane.b32.xlu0 %v8663_v35, %s3755_s6 }
 0x53e   : > { %v6834_v34 = vpop.permute.xlu2 %2563  ;;  %v6836_v55 = vpop.permute.xlu1 %2543 }
 0x53f   : > { %8666 = vst [vmem:[#allocation88_spill] sm:$0xff] %v6834_v34  ;;  %v6838_v46 = vpop.permute.xlu0 %2553 }
 0x544   : > { %2885 = vrot.lane.b32.xlu1 %v8641_v30, %s3755_s6  ;;  %2829 = vrot.lane.b32.xlu2 %v8616_v7, %s3754_s30 }
 0x545   : > { %2741 = vrot.lane.b32.xlu0 %v6123_v2, %s3753_s29 }
 0x546   : > { %v6846_v56 = vpop.permute.xlu1 %2549  ;;  %v6848_v41 = vpop.permute.xlu2 %2569 }
 0x547   : > { %8667 = vst [vmem:[#allocation69_spill] sm:$0xff] %v6848_v41  ;;  %v6850_v35 = vpop.permute.xlu0 %2559 }
 0x548   : > { %8668 = vst [vmem:[#allocation16_spill] sm:$0xff] %v6850_v35 }
 0x54c   : > { %2707 = vrot.lane.b32.xlu1 %v5857_v14, %s3753_s29  ;;  %2797 = vrot.lane.b32.xlu2 %v5867_v12, %s3754_s30 }
 0x54d   : > { %2921 = vrot.lane.b32.xlu0 %v6381_v4, %s3755_s6 }
 0x54e   : > { %v6858_v30 = vpop.permute.xlu1 %2555  ;;  %v6860_v7 = vpop.permute.xlu2 %2575 }
 0x54f   : > { %8669 = vst [vmem:[#allocation89_spill] sm:$0xff] %v6860_v7  ;;  %v6862_v34 = vpop.permute.xlu0 %2565 }
 0x550   : > { %8670 = vst [vmem:[#allocation34_spill] sm:$0xff] %v6862_v34  ;;  %v8674_v34 = vld [vmem:[#allocation154_spill] sm:$0xff] }
 0x554   : > { %2887 = vrot.lane.b32.xlu1 %v6237_v15, %s3755_s6  ;;  %2831 = vrot.lane.b32.xlu2 %v6138_v63, %s3754_s30 }
 0x555   : > { %2743 = vrot.lane.b32.xlu0 %v6102_v60, %s3753_s29 }
 0x556   : > { %v6870_v41 = vpop.permute.xlu1 %2561  ;;  %v6872_v12 = vpop.permute.xlu2 %2613 }
 0x557   : > { %8671 = vst [vmem:[#allocation118_spill] sm:$0xff] %v6870_v41  ;;  %v6874_v4 = vpop.permute.xlu0 %2571  ;;  %v2981_v41 = vsel %vm1369_vm4, %v5908_v3, %v8674_v34 }
 0x558   : > { %8672 = vst [vmem:[#allocation130_spill] sm:$0xff] %v6874_v4  ;;  %v3011_v4 = vsel %vm1401_vm6, %v2981_v41, %v6490_v38  ;;  %v8676_v41 = vld [vmem:[#allocation31_spill] sm:$0xff] }
 0x55c   : > { %2709 = vrot.lane.b32.xlu1 %v5880_v29, %s3753_s29  ;;  %2799 = vrot.lane.b32.xlu2 %v5898_v37, %s3754_s30  ;;  %v3043_v37 = vsel %vm1433_vm5, %v3011_v4, %v6671_v51 }
 0x55d   : > { %2923 = vrot.lane.b32.xlu0 %v6378_v21, %s3755_s6  ;;  %v3075_v21 = vsel %vm1466_vm7, %v3043_v37, %v2530_v62 }
 0x55e   : > { %v6882_v15 = vpop.permute.xlu1 %2567  ;;  %v6884_v63 = vpop.permute.xlu2 %2619 }
 0x55f   : > { %8673 = vst [vmem:[#allocation140_spill] sm:$0xff] %v6882_v15  ;;  %v6886_v7 = vpop.permute.xlu0 %2609 }
 0x564   : > { %2889 = vrot.lane.b32.xlu1 %v8645_v8, %s3755_s6  ;;  %2833 = vrot.lane.b32.xlu2 %v8621_v58, %s3754_s30  ;;  %v8675_v8 = vld [vmem:[#allocation61_spill] sm:$0xff] }
 0x565   : > { %2745 = vrot.lane.b32.xlu0 %v6089_v27, %s3753_s29  ;;  %v2984_v58 = vsel %vm1369_vm4, %v5941_v57, %v8675_v8  ;;  %v8677_v8 = vld [vmem:[#allocation124_spill] sm:$0xff] }
 0x566   : > { %v6902_v15 = vpop.permute.xlu1 %2573  ;;  %v2626_v34 = vpop.permute.xlu2 %2625  ;;  %v3014_v51 = vsel %vm1401_vm6, %v2984_v58, %v6502_v33  ;;  %v8678_v58 = vld [vmem:[#allocation112_spill] sm:$0xff] }
 0x567   : > { %v6905_v35 = vsel %vm1499_vm9, %v3075_v21, %v2626_v34  ;;  %v6907_v38 = vpop.permute.xlu0 %2615  ;;  %v3046_v62 = vsel %vm1433_vm5, %v3014_v51, %v6683_v61  ;;  %v2982_v61 = vsel %vm1369_vm4, %v5913_v0, %v8678_v58  ;;  %v8680_v58 = vld [vmem:[#allocation175_spill] sm:$0xff] }
 0x568   : > { %v3078_v4 = vsel %vm1466_vm7, %v3046_v62, %v2536_v45  ;;  %v3012_v45 = vsel %vm1401_vm6, %v2982_v61, %v6518_v26 }
 0x56c   : > { %2711 = vrot.lane.b32.xlu1 %v5885_v31, %s3753_s29  ;;  %2801 = vrot.lane.b32.xlu2 %v5895_v18, %s3754_s30  ;;  %v2987_v18 = vsel %vm1369_vm4, %v5992_v10, %v8677_v8 }
 0x56d   : > { %2925 = vrot.lane.b32.xlu0 %v8676_v41, %s3755_s6  ;;  %v3017_v51 = vsel %vm1401_vm6, %v2987_v18, %v6514_v54  ;;  %v8679_v18 = vld [vmem:[#allocation78_spill] sm:$0xff] }
 0x56e   : > { %v6923_v37 = vpop.permute.xlu1 %2611  ;;  %v2632_v21 = vpop.permute.xlu2 %2631  ;;  %v3049_v62 = vsel %vm1433_vm5, %v3017_v51, %v6695_v59 }
 0x56f   : > { %v6926_v34 = vsel %vm1499_vm9, %v3078_v4, %v2632_v21  ;;  %v6928_v33 = vpop.permute.xlu0 %2621  ;;  %v3044_v4 = vsel %vm1433_vm5, %v3012_v45, %v6633_v50  ;;  %v3081_v54 = vsel %vm1466_vm7, %v3049_v62, %v6814_v47  ;;  %v2980_v50 = vsel %vm1369_vm4, %v5885_v31, %v8679_v18  ;;  %v8683_v18 = vld [vmem:[#allocation47_spill] sm:$0xff] }
 0x570   : > { %v2985_v47 = vsel %vm1369_vm4, %v5962_v25, %v8680_v58  ;;  %v3010_v61 = vsel %vm1401_vm6, %v2980_v50, %v6528_v36  ;;  %v8684_v58 = vld [vmem:[#allocation109_spill] sm:$0xff] }
 0x571   : > { %v3042_v51 = vsel %vm1433_vm5, %v3010_v61, %v6649_v42  ;;  %v3231_v42 = vld [vmem:[%s7723_s3 + $0x20] sm:$0xf] }
 0x572   : > { %v3074_v36 = vsel %vm1466_vm7, %v3042_v51, %v6766_v23  ;;  %3683 = vmatpush.msk.msra.mxu3 %vm1737_vm3, %v3231_v42  ;;  %3641 = vmatpush.msk.msra.mxu1 %vm1737_vm3, %v3231_v42  ;;  %v3229_v51 = vld [vmem:[%s7723_s3 + $0x10] sm:$0xff] }
 0x574   : > { %2891 = vrot.lane.b32.xlu1 %v6261_v16, %s3755_s6  ;;  %2835 = vrot.lane.b32.xlu2 %v8620_v39, %s3754_s30  ;;  %v3076_v39 = vsel %vm1466_vm7, %v3044_v4, %v6812_v24  ;;  %v3015_v24 = vsel %vm1401_vm6, %v2985_v47, %v6530_v13  ;;  %v8685_v47 = vld [vmem:[#allocation166_spill] sm:$0xff] }
 0x575   : > { %2747 = vrot.lane.b32.xlu0 %v6080_v9, %s3753_s29  ;;  %v3047_v31 = vsel %vm1433_vm5, %v3015_v24, %v6645_v53  ;;  %v3230_v53 = vld [vmem:[%s7723_s3 + $0x18] sm:$0xff] }
 0x576   : > { %v6952_v21 = vpop.permute.xlu1 %2617  ;;  %v2638_v16 = vpop.permute.xlu2 %2637  ;;  %3684 = vmatpush.msra.mxu3 %v3230_v53  ;;  %3347 = vmatpush.msra.mxu1 %v3230_v53 }
 0x577   : > { %v6957_v26 = vsel %vm1499_vm9, %v3081_v54, %v2638_v16  ;;  %v2628_v8 = vpop.permute.xlu0 %2627  ;;  %v2993_v54 = vsel %vm1369_vm4, %v6085_v1, %v6394_v40  ;;  %v8682_v16 = vld [vmem:[#allocation21_spill] sm:$0xff] }
 0x578   : > { %v6960_v59 = vsel %vm1499_vm9, %v3076_v39, %v2628_v8  ;;  %v2988_v39 = vsel %vm1369_vm4, %v5997_v20, %v8682_v16  ;;  %v3023_v8 = vsel %vm1401_vm6, %v2993_v54, %v6538_v44  ;;  %v8686_v1 = vld [vmem:[#allocation97_spill] sm:$0xff]  ;;  %3685 = vmatpush.msra.mxu3 %v3229_v51  ;;  %3348 = vmatpush.msra.mxu1 %v3229_v51  ;;  %v8690_v54 = vld [vmem:[#allocation95_spill] sm:$0xff] }
 0x579   : > { %v3018_v61 = vsel %vm1401_vm6, %v2988_v39, %v8685_v47  ;;  %v3055_v24 = vsel %vm1433_vm5, %v3023_v8, %v6732_v48  ;;  %v8687_v44 = vld [vmem:[#allocation65_spill] sm:$0xff]  ;;  %v8691_v39 = vld [vmem:[#allocation182_spill] sm:$0xff] }
 0x57a   : > { %v8696_v51 = vld [vmem:[#allocation73_spill] sm:$0xff] }
 0x57c   : > { %2713 = vrot.lane.b32.xlu1 %v5908_v3, %s3753_s29  ;;  %2803 = vrot.lane.b32.xlu2 %v8597_v22, %s3754_s30  ;;  %v3079_v22 = vsel %vm1466_vm7, %v3047_v31, %v6824_v6  ;;  %v8681_v6 = vld [vmem:[#allocation15_spill] sm:$0xff] }
 0x57d   : > { %2927 = vrot.lane.b32.xlu0 %v6406_v28, %s3755_s6  ;;  %v2983_v4 = vsel %vm1369_vm4, %v5936_v17, %v8681_v6 }
 0x57e   : > { %v2624_v45 = vpop.permute.xlu1 %2623  ;;  %v6984_v3 = vpop.permute.xlu2 %2643  ;;  %v3013_v50 = vsel %vm1401_vm6, %v2983_v4, %v8683_v18  ;;  %v3227_v4 = vld [vmem:[%s7723_s3] sm:$0xff]  ;;  %v8692_v18 = vld [vmem:[#allocation117_spill] sm:$0xff] }
 0x57f   : > { %v6989_v13 = vsel %vm1499_vm9, %v3074_v36, %v2624_v45  ;;  %v2634_v62 = vpop.permute.xlu0 %2633  ;;  %v3045_v40 = vsel %vm1433_vm5, %v3013_v50, %v8686_v1  ;;  %v3087_v45 = vsel %vm1466_vm7, %v3055_v24, %v6838_v46 }
 0x580   : > { %v6998_v23 = vsel %vm1499_vm9, %v3079_v22, %v2634_v62  ;;  %v3077_v36 = vsel %vm1466_vm7, %v3045_v40, %v6778_v52  ;;  %v3228_v52 = vld [vmem:[%s7723_s3 + $0x8] sm:$0xff] }
 0x581   : > { %3686 = vmatpush.msra.mxu3 %v3228_v52  ;;  %3349 = vmatpush.msra.mxu1 %v3228_v52 }
 0x583   : > { %3687 = vmatpush.msra.mxu3 %v3227_v4  ;;  %3350 = vmatpush.msra.mxu1 %v3227_v4  ;;  %v8700_v4 = vld [vmem:[#allocation126_spill] sm:$0xff] }
 0x584   : > { %2893 = vrot.lane.b32.xlu1 %v6258_v49, %s3755_s6  ;;  %2837 = vrot.lane.b32.xlu2 %v8684_v58, %s3754_s30  ;;  %v8688_v49 = vld [vmem:[#allocation83_spill] sm:$0xff] }
 0x585   : > { %2805 = vrot.lane.b32.xlu0 %v8687_v44, %s3754_s30  ;;  %v3050_v31 = vsel %vm1433_vm5, %v3018_v61, %v8688_v49  ;;  %v8693_v58 = vld [vmem:[#allocation75_spill] sm:$0xff]  ;;  %v8695_v44 = vld [vmem:[#allocation150_spill] sm:$0xff]  ;;  %v8697_v49 = vld [vmem:[#allocation129_spill] sm:$0xff] }
 0x586   : > { %v2630_v22 = vpop.permute.xlu1 %2629  ;;  %v2650_v62 = vpop.permute.xlu2 %2649  ;;  %v3082_v48 = vsel %vm1466_vm7, %v3050_v31, %v6836_v55  ;;  %v8689_v55 = vld [vmem:[#allocation77_spill] sm:$0xff] }
 0x587   : > { %v7039_v42 = vsel %vm1499_vm9, %v3077_v36, %v2630_v22  ;;  %v7042_v53 = vsel %vm1499_vm9, %v3087_v45, %v2650_v62  ;;  %v2640_v6 = vpop.permute.xlu0 %2639  ;;  %v2986_v16 = vsel %vm1369_vm4, %v8690_v54, %v8689_v55  ;;  %v8701_v55 = vld [vmem:[#allocation128_spill] sm:$0xff] }
 0x588   : > { %v7048_v46 = vsel %vm1499_vm9, %v3082_v48, %v2640_v6  ;;  %v3016_v8 = vsel %vm1401_vm6, %v2986_v16, %v8691_v39  ;;  %v8702_v16 = vld [vmem:[#allocation56_spill] sm:$0xff] }
 0x589   : > { %v3048_v50 = vsel %vm1433_vm5, %v3016_v8, %v8692_v18  ;;  %v8703_v8 = vld [vmem:[#allocation33_spill] sm:$0xff] }
 0x58a   : > { %v3080_v47 = vsel %vm1466_vm7, %v3048_v50, %v6790_v11  ;;  %v8704_v50 = vld [vmem:[#allocation120_spill] sm:$0xff] }
 0x58c   : > { %2715 = vrot.lane.b32.xlu1 %v5913_v0, %s3753_s29  ;;  %2653 = vrot.lane.b32.xlu2 %v8676_v41, %s3752_s28  ;;  %v8694_v0 = vld [vmem:[#allocation155_spill] sm:$0xff] }
 0x58d   : > { %2839 = vrot.lane.b32.xlu0 %v8693_v58, %s3754_s30  ;;  %v2994_v41 = vsel %vm1369_vm4, %v6035_v32, %v8694_v0  ;;  %v8706_v58 = vld [vmem:[#allocation190_spill] sm:$0xff] }
 0x58e   : > { %v2636_v61 = vpop.permute.xlu1 %2635  ;;  %v2828_v1 = vpop.permute.xlu2 %2827  ;;  %v3024_v11 = vsel %vm1401_vm6, %v2994_v41, %v8696_v51 }
 0x58f   : > { %v7069_v40 = vsel %vm1499_vm9, %v3080_v47, %v2636_v61  ;;  %v7071_v24 = vpop.permute.xlu0 %2645  ;;  %v3056_v31 = vsel %vm1433_vm5, %v3024_v11, %v8697_v49  ;;  %v8707_v49 = vld [vmem:[#allocation184_spill] sm:$0xff] }
 0x590   : > { %v3088_v32 = vsel %vm1466_vm7, %v3056_v31, %v6858_v30  ;;  %v2989_v30 = vsel %vm1369_vm4, %v8701_v55, %v8700_v4  ;;  %v8708_v31 = vld [vmem:[#allocation66_spill] sm:$0xff] }
 0x591   : > { %v3019_v39 = vsel %vm1401_vm6, %v2989_v30, %v8702_v16  ;;  %v8710_v16 = vld [vmem:[#allocation8_spill] sm:$0xff] }
 0x592   : > { %v3051_v18 = vsel %vm1433_vm5, %v3019_v39, %v8703_v8  ;;  %v8711_v8 = vld [vmem:[#allocation141_spill] sm:$0xff] }
 0x593   : > { %v3083_v47 = vsel %vm1466_vm7, %v3051_v18, %v8706_v58 }
 0x594   : > { %2749 = vrot.lane.b32.xlu1 %v8695_v44, %s3753_s29  ;;  %2895 = vrot.lane.b32.xlu2 %v8649_v19, %s3755_s6  ;;  %v8698_v19 = vld [vmem:[#allocation60_spill] sm:$0xff] }
 0x595   : > { %2655 = vrot.lane.b32.xlu0 %v6406_v28, %s3752_s28  ;;  %v8699_v28 = vld [vmem:[#allocation101_spill] sm:$0xff] }
 0x596   : > { %v2642_v36 = vpop.permute.xlu1 %2641  ;;  %v2796_v45 = vpop.permute.xlu2 %2795 }
 0x597   : > { %v2652_v22 = vpop.permute.xlu0 %2651  ;;  %v3115_v61 = vsel %vm1499_vm9, %v3083_v47, %v2642_v36 }
 0x598   : > { %v7089_v62 = vsel %vm1499_vm9, %v3088_v32, %v2652_v22  ;;  %v2990_v32 = vsel %vm1369_vm4, %v8708_v31, %v8707_v49 }
 0x59c   : > { %2929 = vrot.lane.b32.xlu1 %v8698_v19, %s3755_s6  ;;  %2717 = vrot.lane.b32.xlu2 %v5936_v17, %s3753_s29  ;;  %v8705_v17 = vld [vmem:[#allocation98_spill] sm:$0xff] }
 0x59d   : > { %2897 = vrot.lane.b32.xlu0 %v8699_v28, %s3755_s6  ;;  %v8709_v28 = vld [vmem:[#allocation32_spill] sm:$0xff] }
 0x59e   : > { %v7097_v48 = vpop.permute.xlu1 %2647  ;;  %v2830_v6 = vpop.permute.xlu2 %2829  ;;  %v3020_v4 = vsel %vm1401_vm6, %v2990_v32, %v8709_v28  ;;  %v8717_v28 = vld [vmem:[#allocation3_spill] sm:$0xff] }
 0x59f   : > { %v2918_v52 = vpop.permute.xlu0 %2917 }
 0x5a4   : > { %2807 = vrot.lane.b32.xlu1 %v8704_v50, %s3754_s30  ;;  %2751 = vrot.lane.b32.xlu2 %v8705_v17, %s3753_s29 }
 0x5a5   : > { %2719 = vrot.lane.b32.xlu0 %v5941_v57, %s3753_s29  ;;  %v3052_v57 = vsel %vm1433_vm5, %v3020_v4, %v8710_v16 }
 0x5a6   : > { %v2738_v0 = vpop.permute.xlu1 %2737  ;;  %v2798_v41 = vpop.permute.xlu2 %2797  ;;  %v3084_v36 = vsel %vm1466_vm7, %v3052_v57, %v6826_v43  ;;  %v8719_v57 = vld [vmem:[#allocation94_spill] sm:$0xff] }
 0x5a7   : > { %v3147_v51 = vsel %vm1532_vm8, %v3115_v61, %v2738_v0  ;;  %v2740_v11 = vpop.permute.xlu0 %2739  ;;  %v3116_v39 = vsel %vm1499_vm9, %v3084_v36, %v6984_v3  ;;  %v8714_v61 = vld [vmem:[#allocation115_spill] sm:$0xff]  ;;  %v8715_v0 = vld [vmem:[#allocation58_spill] sm:$0xff]  ;;  %v8720_v36 = vld [vmem:[#allocation4_spill] sm:$0xff] }
 0x5a8   : > { %v3179_v22 = vsel %vm1565_vm10, %v3147_v51, %v2828_v1  ;;  %v8712_v1 = vld [vmem:[#allocation192_spill] sm:$0xff]  ;;  %v3148_v18 = vsel %vm1532_vm8, %v3116_v39, %v2740_v11  ;;  %v3035_v43 = vsel %vm1433_vm5, %v8715_v0, %v8714_v61 }
 0x5a9   : > { %v3211_v30 = vsel %vm1598_vm12, %v3179_v22, %v2918_v52  ;;  %v8713_v52 = vld [vmem:[#allocation143_spill] sm:$0xff]  ;;  %v3180_v3 = vsel %vm1565_vm10, %v3148_v18, %v2830_v6  ;;  %v8716_v51 = vld [vmem:[#allocation168_spill] sm:$0xff]  ;;  %v8718_v6 = vld [vmem:[#allocation114_spill] sm:$0xff] }
 0x5aa   : > { %3658 = vmatmul.msk.f32.vlgmr.msra.gmra.mxu3 %vm1640_vm11, %v3211_v30  ;;  %v3067_v49 = vsel %vm1466_vm7, %v3035_v43, %v8716_v51  ;;  %v8721_v18 = vld [vmem:[#allocation187_spill] sm:$0xff]  ;;  %v8724_v51 = vld [vmem:[#allocation172_spill] sm:$0xff] }
 0x5ab   : > { %v3099_v11 = vsel %vm1499_vm9, %v3067_v49, %v6886_v7  ;;  %v2991_v7 = vsel %vm1369_vm4, %v8720_v36, %v8719_v57  ;;  %v8725_v49 = vld [vmem:[#allocation138_spill] sm:$0xff] }
 0x5ac   : > { %2841 = vrot.lane.b32.xlu1 %v8711_v8, %s3754_s30  ;;  %2931 = vrot.lane.b32.xlu2 %v8712_v1, %s3755_s6 }
 0x5ad   : > { %2753 = vrot.lane.b32.xlu0 %v8713_v52, %s3753_s29 }
 0x5ae   : > { %v2706_v50 = vpop.permute.xlu1 %2705  ;;  %v2832_v58 = vpop.permute.xlu2 %2831 }
 0x5af   : > { %v2920_v47 = vpop.permute.xlu0 %2919  ;;  %v3131_v22 = vsel %vm1532_vm8, %v3099_v11, %v2706_v50  ;;  %v8722_v50 = vld [vmem:[#allocation29_spill] sm:$0xff] }
 0x5b0   : > { %v3212_v32 = vsel %vm1598_vm12, %v3180_v3, %v2920_v47  ;;  %v3163_v16 = vsel %vm1565_vm10, %v3131_v22, %v2796_v45  ;;  %v8723_v3 = vld [vmem:[#allocation93_spill] sm:$0xff] }
 0x5b2   : > { %3659 = vmatmul.msk.f32.gmra.mxu3 %vm1640_vm11, %v3212_v32 }
 0x5b4   : > { %2657 = vrot.lane.b32.xlu1 %v8698_v19, %s3752_s28  ;;  %2809 = vrot.lane.b32.xlu2 %v8717_v28, %s3754_s30  ;;  %v3021_v19 = vsel %vm1401_vm6, %v2991_v7, %v8721_v18 }
 0x5b5   : > { %2933 = vrot.lane.b32.xlu0 %v8718_v6, %s3755_s6  ;;  %v3053_v47 = vsel %vm1433_vm5, %v3021_v19, %v8722_v50  ;;  %v8729_v19 = vld [vmem:[#allocation80_spill] sm:$0xff] }
 0x5b6   : > { %v2886_v4 = vpop.permute.xlu1 %2885  ;;  %v2800_v30 = vpop.permute.xlu2 %2799  ;;  %v3085_v61 = vsel %vm1466_vm7, %v3053_v47, %v6846_v56  ;;  %v8726_v56 = vld [vmem:[#allocation18_spill] sm:$0xff]  ;;  %v8730_v50 = vld [vmem:[#allocation64_spill] sm:$0xff] }
 0x5b7   : > { %v2742_v39 = vpop.permute.xlu0 %2741  ;;  %v3195_v8 = vsel %vm1598_vm12, %v3163_v16, %v2886_v4  ;;  %v3117_v45 = vsel %vm1499_vm9, %v3085_v61, %v7071_v24  ;;  %v3036_v24 = vsel %vm1433_vm5, %v8715_v0, %v8726_v56  ;;  %v8727_v16 = vld [vmem:[#allocation85_spill] sm:$0xff]  ;;  %v2992_v47 = vsel %vm1369_vm4, %v8730_v50, %v8729_v19 }
 0x5b8   : > { %3642 = vmatmul.msk.f32.vlgmr.msra.gmra.mxu1 %vm1640_vm11, %v3195_v8  ;;  %v3149_v43 = vsel %vm1532_vm8, %v3117_v45, %v2742_v39  ;;  %v3068_v57 = vsel %vm1466_vm7, %v3036_v24, %v8727_v16  ;;  %v8731_v45 = vld [vmem:[#allocation84_spill] sm:$0xff]  ;;  %v8737_v56 = vld [vmem:[#allocation161_spill] sm:$0xff] }
 0x5b9   : > { %v3181_v28 = vsel %vm1565_vm10, %v3149_v43, %v2832_v58  ;;  %v3100_v7 = vsel %vm1499_vm9, %v3068_v57, %v6923_v37  ;;  %v8728_v58 = vld [vmem:[#allocation164_spill] sm:$0xff]  ;;  %v8738_v57 = vld [vmem:[#allocation43_spill] sm:$0xff]  ;;  %v8740_v19 = vld [vmem:[#allocation157_spill] sm:$0xff] }
 0x5bc   : > { %2899 = vrot.lane.b32.xlu1 %v8723_v3, %s3755_s6  ;;  %2843 = vrot.lane.b32.xlu2 %v8724_v51, %s3754_s30  ;;  %v8733_v3 = vld [vmem:[#allocation153_spill] sm:$0xff] }
 0x5bd   : > { %2811 = vrot.lane.b32.xlu0 %v8725_v49, %s3754_s30 }
 0x5be   : > { %v2708_v32 = vpop.permute.xlu1 %2707  ;;  %v2834_v11 = vpop.permute.xlu2 %2833 }
 0x5bf   : > { %v2922_v22 = vpop.permute.xlu0 %2921  ;;  %v3132_v39 = vsel %vm1532_vm8, %v3100_v7, %v2708_v32  ;;  %v8734_v32 = vld [vmem:[#allocation121_spill] sm:$0xff] }
 0x5c0   : > { %v3213_v4 = vsel %vm1598_vm12, %v3181_v28, %v2922_v22  ;;  %v3164_v18 = vsel %vm1565_vm10, %v3132_v39, %v2798_v41  ;;  %v8735_v22 = vld [vmem:[#allocation74_spill] sm:$0xff]  ;;  %v8736_v28 = vld [vmem:[#allocation53_spill] sm:$0xff] }
 0x5c1   : > { %3660 = vmatmul.msk.f32.gmra.mxu3 %vm1640_vm11, %v3213_v4  ;;  %v2975_v24 = vsel %vm1369_vm4, %v8737_v56, %v8736_v28  ;;  %v8747_v56 = vld [vmem:[#allocation96_spill] sm:$0xff] }
 0x5c4   : > { %2721 = vrot.lane.b32.xlu1 %v5962_v25, %s3753_s29  ;;  %2659 = vrot.lane.b32.xlu2 %v8712_v1, %s3752_s28  ;;  %v3022_v25 = vsel %vm1401_vm6, %v2992_v47, %v8731_v45  ;;  %v8732_v1 = vld [vmem:[#allocation62_spill] sm:$0xff] }
 0x5c5   : > { %2845 = vrot.lane.b32.xlu0 %v8728_v58, %s3754_s30  ;;  %v3054_v43 = vsel %vm1433_vm5, %v3022_v25, %v8732_v1  ;;  %v8739_v58 = vld [vmem:[#allocation197_spill] sm:$0xff] }
 0x5c6   : > { %v2888_v0 = vpop.permute.xlu1 %2887  ;;  %v2802_v8 = vpop.permute.xlu2 %2801  ;;  %v3086_v51 = vsel %vm1466_vm7, %v3054_v43, %v8733_v3 }
 0x5c7   : > { %v2744_v37 = vpop.permute.xlu0 %2743  ;;  %v3196_v61 = vsel %vm1598_vm12, %v3164_v18, %v2888_v0  ;;  %v3118_v41 = vsel %vm1499_vm9, %v3086_v51, %v7097_v48  ;;  %v3005_v48 = vsel %vm1401_vm6, %v2975_v24, %v8738_v57  ;;  %v8743_v51 = vld [vmem:[#allocation148_spill] sm:$0xff]  ;;  %v8748_v57 = vld [vmem:[#allocation146_spill] sm:$0xff] }
 0x5c8   : > { %3643 = vmatmul.msk.f32.gmra.mxu1 %vm1640_vm11, %v3196_v61  ;;  %v3150_v49 = vsel %vm1532_vm8, %v3118_v41, %v2744_v37  ;;  %v3037_v0 = vsel %vm1433_vm5, %v3005_v48, %v8739_v58  ;;  %v8741_v61 = vld [vmem:[#allocation25_spill] sm:$0xff]  ;;  %v8745_v41 = vld [vmem:[#allocation144_spill] sm:$0xff] }
 0x5c9   : > { %v3182_v39 = vsel %vm1565_vm10, %v3150_v49, %v2834_v11  ;;  %v8742_v11 = vld [vmem:[#allocation173_spill] sm:$0xff]  ;;  %v8746_v49 = vld [vmem:[#allocation136_spill] sm:$0xff] }
 0x5cc   : > { %2755 = vrot.lane.b32.xlu1 %v8734_v32, %s3753_s29  ;;  %2901 = vrot.lane.b32.xlu2 %v8735_v22, %s3755_s6 }
 0x5cd   : > { %2661 = vrot.lane.b32.xlu0 %v8718_v6, %s3752_s28  ;;  %v3069_v6 = vsel %vm1466_vm7, %v3037_v0, %v8740_v19  ;;  %v8752_v19 = vld [vmem:[#allocation163_spill] sm:$0xff] }
 0x5ce   : > { %v2710_v4 = vpop.permute.xlu1 %2709  ;;  %v2836_v16 = vpop.permute.xlu2 %2835  ;;  %v3101_v47 = vsel %vm1499_vm9, %v3069_v6, %v6872_v12 }
 0x5cf   : > { %v2924_v7 = vpop.permute.xlu0 %2923  ;;  %v3133_v37 = vsel %vm1532_vm8, %v3101_v47, %v2710_v4 }
 0x5d0   : > { %v3214_v18 = vsel %vm1598_vm12, %v3182_v39, %v2924_v7  ;;  %v3165_v1 = vsel %vm1565_vm10, %v3133_v37, %v2800_v30  ;;  %v2976_v30 = vsel %vm1369_vm4, %v8746_v49, %v8745_v41  ;;  %v8749_v39 = vld [vmem:[#allocation183_spill] sm:$0xff]  ;;  %v8756_v41 = vld [vmem:[#allocation116_spill] sm:$0xff] }
 0x5d1   : > { %3661 = vmatmul.msk.f32.gmra.mxu3 %vm1640_vm11, %v3214_v18  ;;  %v3006_v24 = vsel %vm1401_vm6, %v2976_v30, %v8747_v56  ;;  %v8750_v18 = vld [vmem:[#allocation131_spill] sm:$0xff] }
 0x5d2   : > { %v3038_v48 = vsel %vm1433_vm5, %v3006_v24, %v8748_v57  ;;  %v8758_v24 = vld [vmem:[#allocation35_spill] sm:$0xff]  ;;  %v8759_v57 = vld [vmem:[#allocation165_spill] sm:$0xff] }
 0x5d4   : > { %2935 = vrot.lane.b32.xlu1 %v8741_v61, %s3755_s6  ;;  %2723 = vrot.lane.b32.xlu2 %v8690_v54, %s3753_s29  ;;  %v8744_v54 = vld [vmem:[#allocation54_spill] sm:$0xff] }
 0x5d5   : > { %2903 = vrot.lane.b32.xlu0 %v8742_v11, %s3755_s6 }
 0x5d6   : > { %v2890_v45 = vpop.permute.xlu1 %2889  ;;  %v2804_v25 = vpop.permute.xlu2 %2803 }
 0x5d7   : > { %v2746_v43 = vpop.permute.xlu0 %2745  ;;  %v3197_v3 = vsel %vm1598_vm12, %v3165_v1, %v2890_v45  ;;  %v8753_v1 = vld [vmem:[#allocation68_spill] sm:$0xff] }
 0x5d8   : > { %3644 = vmatmul.msk.f32.gmra.mxu1 %vm1640_vm11, %v3197_v3  ;;  %v3151_v12 = vsel %vm1532_vm8, %v7042_v53, %v2746_v43  ;;  %v8754_v43 = vld [vmem:[#allocation160_spill] sm:$0xff]  ;;  %v8755_v3 = vld [vmem:[#allocation23_spill] sm:$0xff] }
 0x5d9   : > { %v3183_v53 = vsel %vm1565_vm10, %v3151_v12, %v2836_v16  ;;  %v8751_v16 = vld [vmem:[#allocation195_spill] sm:$0xff] }
 0x5dc   : > { %2813 = vrot.lane.b32.xlu1 %v8743_v51, %s3754_s30  ;;  %2757 = vrot.lane.b32.xlu2 %v8744_v54, %s3753_s29 }
 0x5dd   : > { %2725 = vrot.lane.b32.xlu0 %v5992_v10, %s3753_s29  ;;  %v3070_v10 = vsel %vm1466_vm7, %v3038_v48, %v8749_v39  ;;  %v8761_v48 = vld [vmem:[#allocation162_spill] sm:$0xff] }
 0x5de   : > { %v2712_v22 = vpop.permute.xlu1 %2711  ;;  %v2838_v28 = vpop.permute.xlu2 %2837  ;;  %v3102_v58 = vsel %vm1499_vm9, %v3070_v10, %v6907_v38 }
 0x5df   : > { %v2926_v4 = vpop.permute.xlu0 %2925  ;;  %v3134_v0 = vsel %vm1532_vm8, %v3102_v58, %v2712_v22  ;;  %v8757_v22 = vld [vmem:[#allocation72_spill] sm:$0xff] }
 0x5e0   : > { %v3215_v7 = vsel %vm1598_vm12, %v3183_v53, %v2926_v4  ;;  %v3166_v37 = vsel %vm1565_vm10, %v3134_v0, %v2802_v8  ;;  %v2977_v8 = vsel %vm1369_vm4, %v5854_v5, %v8755_v3 }
 0x5e1   : > { %3662 = vmatmul.msk.f32.gmra.mxu3 %vm1640_vm11, %v3215_v7  ;;  %v3007_v49 = vsel %vm1401_vm6, %v2977_v8, %v8756_v41 }
 0x5e4   : > { %2847 = vrot.lane.b32.xlu1 %v8750_v18, %s3754_s30  ;;  %2937 = vrot.lane.b32.xlu2 %v8751_v16, %s3755_s6 }
 0x5e5   : > { %2759 = vrot.lane.b32.xlu0 %v8752_v19, %s3753_s29 }
 0x5e6   : > { %v2892_v6 = vpop.permute.xlu1 %2891  ;;  %v2654_v47 = vpop.permute.xlu2 %2653 }
 0x5e7   : > { %v2748_v11 = vpop.permute.xlu0 %2747  ;;  %v3198_v45 = vsel %vm1598_vm12, %v3166_v37, %v2892_v6  ;;  %v8763_v6 = vld [vmem:[#allocation105_spill] sm:$0xff] }
 0x5e8   : > { %3645 = vmatmul.msk.f32.gmra.mxu1 %vm1640_vm11, %v3198_v45  ;;  %v3152_v38 = vsel %vm1532_vm8, %v7089_v62, %v2748_v11  ;;  %v8764_v11 = vld [vmem:[#allocation10_spill] sm:$0xff] }
 0x5e9   : > { %v3184_v62 = vsel %vm1565_vm10, %v3152_v38, %v2838_v28  ;;  %v8760_v28 = vld [vmem:[#allocation111_spill] sm:$0xff] }
 0x5ec   : > { %2663 = vrot.lane.b32.xlu1 %v8741_v61, %s3752_s28  ;;  %2815 = vrot.lane.b32.xlu2 %v8753_v1, %s3754_s30  ;;  %v3039_v61 = vsel %vm1433_vm5, %v3007_v49, %v8757_v22  ;;  %v8766_v1 = vld [vmem:[#allocation152_spill] sm:$0xff] }
 0x5ed   : > { %2939 = vrot.lane.b32.xlu0 %v8754_v43, %s3755_s6  ;;  %v3071_v4 = vsel %vm1466_vm7, %v3039_v61, %v8758_v24 }
 0x5ee   : > { %v2714_v12 = vpop.permute.xlu1 %2713  ;;  %v2896_v51 = vpop.permute.xlu2 %2895  ;;  %v3103_v5 = vsel %vm1499_vm9, %v3071_v4, %v6952_v21  ;;  %v8762_v21 = vld [vmem:[#allocation76_spill] sm:$0xff] }
 0x5ef   : > { %v2928_v30 = vpop.permute.xlu0 %2927  ;;  %v3135_v53 = vsel %vm1532_vm8, %v3103_v5, %v2714_v12  ;;  %v2978_v18 = vsel %vm1369_vm4, %v5857_v14, %v8762_v21 }
 0x5f0   : > { %v3216_v56 = vsel %vm1598_vm12, %v3184_v62, %v2928_v30  ;;  %v3167_v10 = vsel %vm1565_vm10, %v3135_v53, %v2804_v25  ;;  %v3008_v37 = vsel %vm1401_vm6, %v2978_v18, %v8763_v6  ;;  %v8765_v25 = vld [vmem:[#allocation178_spill] sm:$0xff]  ;;  %v8768_v30 = vld [vmem:[#allocation113_spill] sm:$0xff] }
 0x5f1   : > { %3663 = vmatmul.msk.f32.gmra.mxu3 %vm1640_vm11, %v3216_v56  ;;  %v3040_v45 = vsel %vm1433_vm5, %v3008_v37, %v8764_v11  ;;  %v8770_v56 = vld [vmem:[#allocation22_spill] sm:$0xff] }
 0x5f2   : > { %v3072_v38 = vsel %vm1466_vm7, %v3040_v45, %v8765_v25  ;;  %v2233_v24 = vrot.slane %v8770_v56, 2  ;;  %v8772_v53 = vld [vmem:[#allocation26_spill] sm:$0xff]  ;;  %v8776_v45 = vld [vmem:[#allocation104_spill] sm:$0xff] }
 0x5f3   : > { %v3104_v14 = vsel %vm1499_vm9, %v3072_v38, %v6884_v63  ;;  %v8769_v63 = vld [vmem:[#allocation20_spill] sm:$0xff] }
 0x5f4   : > { %2905 = vrot.lane.b32.xlu1 %v8759_v57, %s3755_s6  ;;  %2849 = vrot.lane.b32.xlu2 %v8760_v28, %s3754_s30  ;;  %v2995_v62 = vsel %vm1369_vm4, %v6123_v2, %v8769_v63 }
 0x5f5   : > { %2817 = vrot.lane.b32.xlu0 %v8761_v48, %s3754_s30  ;;  %v8773_v48 = vld [vmem:[#allocation57_spill] sm:$0xff] }
 0x5f6   : > { %v2894_v7 = vpop.permute.xlu1 %2893  ;;  %v2718_v39 = vpop.permute.xlu2 %2717 }
 0x5f7   : > { %v2806_v58 = vpop.permute.xlu0 %2805  ;;  %v3199_v0 = vsel %vm1598_vm12, %v3167_v10, %v2894_v7 }
 0x5f8   : > { %3646 = vmatmul.msk.f32.gmra.mxu1 %vm1640_vm11, %v3199_v0 }
 0x5fc   : > { %2727 = vrot.lane.b32.xlu1 %v5997_v20, %s3753_s29  ;;  %2665 = vrot.lane.b32.xlu2 %v8751_v16, %s3752_s28  ;;  %v8767_v16 = vld [vmem:[#allocation63_spill] sm:$0xff] }
 0x5fd   : > { %2851 = vrot.lane.b32.xlu0 %v8766_v1, %s3754_s30  ;;  %v2232_v28 = vrot.slane %v8767_v16, 2  ;;  %v8778_v1 = vld [vmem:[#allocation28_spill] sm:$0xff] }
 0x5fe   : > { %v2716_v3 = vpop.permute.xlu1 %2715  ;;  %v2752_v8 = vpop.permute.xlu2 %2751 }
 0x5ff   : > { %v3136_v12 = vsel %vm1532_vm8, %v3104_v14, %v2716_v3  ;;  %v2840_v41 = vpop.permute.xlu0 %2839  ;;  %v2234_v10 = vsel %vm526_vm2, %v2232_v28, %v2233_v24  ;;  %v8779_v3 = vld [vmem:[#allocation108_spill] sm:$0xff]  ;;  %v8785_v28 = vld [vmem:[#allocation79_spill] sm:$0xff] }
 0x600   : > { %v3168_v49 = vsel %vm1565_vm10, %v3136_v12, %v2806_v58  ;;  %v8774_v58 = vld [vmem:[#allocation5_spill] sm:$0xff] }
 0x601   : > { %v3200_v20 = vsel %vm1598_vm12, %v3168_v49, %v2896_v51  ;;  %v8771_v51 = vld [vmem:[#allocation127_spill] sm:$0xff] }
 0x602   : > { %3647 = vmatmul.msk.f32.gmra.mxu1 %vm1640_vm11, %v3200_v20  ;;  %v3025_v4 = vsel %vm1401_vm6, %v2995_v62, %v8771_v51  ;;  %v8780_v20 = vld [vmem:[#allocation169_spill] sm:$0xff] }
 0x603   : > { %v3057_v57 = vsel %vm1433_vm5, %v3025_v4, %v8772_v53  ;;  %v8783_v4 = vld [vmem:[#allocation13_spill] sm:$0xff] }
 0x604   : > { %2761 = vrot.lane.b32.xlu1 %v8767_v16, %s3753_s29  ;;  %2907 = vrot.lane.b32.xlu2 %v8768_v30, %s3755_s6  ;;  %v2235_v16 = vrot.slane %v8780_v20, 2  ;;  %v8781_v30 = vld [vmem:[#allocation7_spill] sm:$0xff] }
 0x605   : > { %2667 = vrot.lane.b32.xlu0 %v8754_v43, %s3752_s28  ;;  %v3089_v43 = vsel %vm1466_vm7, %v3057_v57, %v8773_v48  ;;  %v2996_v63 = vsel %vm1369_vm4, %v6102_v60, %v8781_v30  ;;  %v8786_v48 = vld [vmem:[#allocation59_spill] sm:$0xff] }
 0x606   : > { %v2750_v22 = vpop.permute.xlu1 %2749  ;;  %v2932_v61 = vpop.permute.xlu2 %2931  ;;  %v3121_v7 = vsel %vm1499_vm9, %v3089_v43, %v2654_v47  ;;  %v8775_v47 = vld [vmem:[#allocation51_spill] sm:$0xff]  ;;  %v2236_v60 = vsel %vm526_vm2, %v2233_v24, %v2235_v16  ;;  %v8787_v24 = vld [vmem:[#allocation193_spill] sm:$0xff] }
 0x607   : > { %v2656_v5 = vpop.permute.xlu0 %2655  ;;  %v3153_v2 = vsel %vm1532_vm8, %v3121_v7, %v2750_v22  ;;  %v2979_v11 = vsel %vm1369_vm4, %v5880_v29, %v8775_v47  ;;  %v8790_v47 = vld [vmem:[#allocation48_spill] sm:$0xff] }
 0x608   : > { %v3185_v18 = vsel %vm1565_vm10, %v3153_v2, %v2840_v41  ;;  %v3009_v25 = vsel %vm1401_vm6, %v2979_v11, %v8776_v45  ;;  %v8791_v45 = vld [vmem:[#allocation106_spill] sm:$0xff] }
 0x60c   : > { %2941 = vrot.lane.b32.xlu1 %v2234_v10, %s3755_s6  ;;  %2729 = vrot.lane.b32.xlu2 %v8701_v55, %s3753_s29  ;;  %v8777_v55 = vld [vmem:[#allocation186_spill] sm:$0xff] }
 0x60d   : > { %2909 = vrot.lane.b32.xlu0 %v8774_v58, %s3755_s6  ;;  %v3041_v38 = vsel %vm1433_vm5, %v3009_v25, %v8777_v55 }
 0x60e   : > { %v2930_v0 = vpop.permute.xlu1 %2929  ;;  %v2810_v21 = vpop.permute.xlu2 %2809  ;;  %v3073_v14 = vsel %vm1466_vm7, %v3041_v38, %v8778_v1 }
 0x60f   : > { %v2898_v6 = vpop.permute.xlu0 %2897  ;;  %v3217_v37 = vsel %vm1598_vm12, %v3185_v18, %v2930_v0  ;;  %v3105_v12 = vsel %vm1499_vm9, %v3073_v14, %v6928_v33  ;;  %v2997_v18 = vsel %vm1369_vm4, %v6089_v27, %v8787_v24  ;;  %v8795_v24 = vld [vmem:[#allocation134_spill] sm:$0xff] }
 0x610   : > { %3664 = vmatmul.msk.f32.gmra.mxu3 %vm1640_vm11, %v3217_v37  ;;  %v3137_v29 = vsel %vm1532_vm8, %v3105_v12, %v2718_v39  ;;  %v8784_v39 = vld [vmem:[#allocation16_spill] sm:$0xff]  ;;  %v7415_v12 = vld [vmem:[%s7724_s4] ss:$0 sm:$0xff] }
 0x614   : > { %2819 = vrot.lane.b32.xlu1 %v8779_v3, %s3754_s30  ;;  %2763 = vrot.lane.b32.xlu2 %v8770_v56, %s3753_s29  ;;  %v8782_v56 = vld [vmem:[#allocation176_spill] sm:$0xff] }
 0x615   : > { %2731 = vrot.lane.b32.xlu0 %v8708_v31, %s3753_s29  ;;  %v3026_v51 = vsel %vm1401_vm6, %v2996_v63, %v8782_v56 }
 0x616   : > { %v2808_v41 = vpop.permute.xlu1 %2807  ;;  %v2844_v49 = vpop.permute.xlu2 %2843  ;;  %v3058_v31 = vsel %vm1433_vm5, %v3026_v51, %v8783_v4 }
 0x617   : > { %v3169_v62 = vsel %vm1565_vm10, %v3137_v29, %v2808_v41  ;;  %v2720_v22 = vpop.permute.xlu0 %2719  ;;  %v3090_v53 = vsel %vm1466_vm7, %v3058_v31, %v8784_v39  ;;  %v8793_v41 = vld [vmem:[#allocation50_spill] sm:$0xff] }
 0x618   : > { %v3201_v33 = vsel %vm1598_vm12, %v3169_v62, %v2898_v6  ;;  %v3122_v57 = vsel %vm1499_vm9, %v3090_v53, %v2656_v5  ;;  %v8788_v6 = vld [vmem:[#allocation30_spill] sm:$0xff]  ;;  %v3138_v29 = vsel %vm1532_vm8, %v6989_v13, %v2720_v22 }
 0x619   : > { %3648 = vmatmul.msk.f32.gmra.mxu1 %vm1640_vm11, %v3201_v33  ;;  %v3154_v7 = vsel %vm1532_vm8, %v3122_v57, %v2752_v8  ;;  %v3027_v37 = vsel %vm1401_vm6, %v2997_v18, %v8788_v6  ;;  %v8789_v8 = vld [vmem:[#allocation70_spill] sm:$0xff]  ;;  %v3170_v63 = vsel %vm1565_vm10, %v3138_v29, %v2810_v21 }
 0x61a   : > { %v3059_v11 = vsel %vm1433_vm5, %v3027_v37, %v8790_v47  ;;  %v3707_v22 = vld [vmem:[%s3807_s24 + $0x80] sm:$0xff] }
 0x61b   : > { %v8794_v21 = vld [vmem:[#allocation42_spill] sm:$0xff] }
 0x61c   : > { %2853 = vrot.lane.b32.xlu1 %v8785_v28, %s3754_s30  ;;  %2943 = vrot.lane.b32.xlu2 %v2236_v60, %s3755_s6  ;;  %v3708_v28 = vld [vmem:[%s3807_s24] sm:$0xff] }
 0x61d   : > { %2911 = vrot.lane.b32.xlu0 %v8786_v48, %s3755_s6 }
 0x61e   : > { %v2842_v43 = vpop.permute.xlu1 %2841  ;;  %v7389_v2 = vpop.permute.xlu2 %2659 }
 0x61f   : > { %v3186_v58 = vsel %vm1565_vm10, %v3154_v7, %v2842_v43  ;;  %v2754_v0 = vpop.permute.xlu0 %2753  ;;  %v3709_v43 = vld [vmem:[%s3807_s24 + $0x88] sm:$0xff] }
 0x620   : > { %v3218_v5 = vsel %vm1598_vm12, %v3186_v58, %v2932_v61  ;;  %v8792_v61 = vld [vmem:[#allocation118_spill] sm:$0xff] }
 0x621   : > { %3665 = vmatmul.msk.f32.gmra.mxu3 %vm1640_vm11, %v3218_v5  ;;  %v3091_v25 = vsel %vm1466_vm7, %v3059_v11, %v8792_v61 }
 0x624   : > { %2669 = vrot.lane.b32.xlu1 %v2234_v10, %s3752_s28  ;;  %2821 = vrot.lane.b32.xlu2 %v8789_v8, %s3754_s30  ;;  %v8797_v8 = vld [vmem:[#allocation167_spill] sm:$0xff] }
 0x625   : > { %2823 = vrot.lane.b32.xlu0 %v8791_v45, %s3754_s30  ;;  %v8798_v45 = vld [vmem:[#allocation125_spill] sm:$0xff] }
 0x626   : > { %v2658_v55 = vpop.permute.xlu1 %2657  ;;  %v2902_v38 = vpop.permute.xlu2 %2901 }
 0x627   : > { %v3123_v27 = vsel %vm1499_vm9, %v3091_v25, %v2658_v55  ;;  %v2934_v1 = vpop.permute.xlu0 %2933  ;;  %v8799_v25 = vld [vmem:[#allocation88_spill] sm:$0xff] }
 0x628   : > { %v3155_v14 = vsel %vm1532_vm8, %v3123_v27, %v2754_v0 }
 0x629   : > { %v3187_v10 = vsel %vm1565_vm10, %v3155_v14, %v2844_v49 }
 0x62a   : > { %v3219_v3 = vsel %vm1598_vm12, %v3187_v10, %v2934_v1 }
 0x62b   : > { %3666 = vmatmul.msk.f32.gmra.mxu3 %vm1640_vm11, %v3219_v3 }
 0x62c   : > { %2733 = vrot.lane.b32.xlu1 %v8720_v36, %s3753_s29  ;;  %2671 = vrot.lane.b32.xlu2 %v2236_v60, %s3752_s28 }
 0x62d   : > { %2825 = vrot.lane.b32.xlu0 %v8793_v41, %s3754_s30  ;;  %v3400_v49 = vpop.f32.mrf.mxu3  ;;  %s7435_s30 = scalar_lea.vmem %s7725_s5, %s3676_s21 }
 0x62e   : > { %v3401_v20 = vadd.f32 %v7415_v12, %v3400_v49  ;;  %v2900_v16 = vpop.permute.xlu1 %2899  ;;  %v2724_v30 = vpop.permute.xlu2 %2723  ;;  %v3710_v49 = vld [vmem:[%s3807_s24 + $0x90] sm:$0xff] }
 0x62f   : > { %v2812_v62 = vpop.permute.xlu0 %2811  ;;  %v3202_v13 = vsel %vm1598_vm12, %v3170_v63, %v2900_v16  ;;  %v3711_v63 = vld [vmem:[%s3807_s24 + $0x8] sm:$0xff] }
 0x630   : > { %v3464_v56 = vadd.f32 %v3707_v22, %v3401_v20  ;;  %3649 = vmatmul.msk.f32.gmra.mxu1 %vm1640_vm11, %v3202_v13 }
 0x632   : > { %v3496_v36 = vmax.f32 %v3464_v56, 0.0  ;;  %v3140_v56 = vsel %vm1532_vm8, %v6960_v59, %v2724_v30  ;;  %v8803_v59 = vld [vmem:[#allocation34_spill] sm:$0xff] }
 0x634   : > { %3528 = vst.msk [vmem:[%s7435_s30 + $0x80] sm:$0xff] %vm1369_vm4, %v3496_v36  ;;  %2913 = vrot.lane.b32.xlu1 %v8794_v21, %s3755_s6  ;;  %2735 = vrot.lane.b32.xlu2 %v8730_v50, %s3753_s29  ;;  %v8800_v21 = vld [vmem:[#allocation145_spill] sm:$0xff] }
 0x635   : > { %v3352_v51 = vpop.f32.mrf.mxu1  ;;  %v3403_v33 = vpop.f32.mrf.mxu3 }
 0x636   : > { %v3353_v4 = vadd.f32 %v7415_v12, %v3352_v51  ;;  %v3404_v31 = vadd.f32 %v7415_v12, %v3403_v33  ;;  %v2722_v39 = vpop.permute.xlu1 %2721  ;;  %v2758_v53 = vpop.permute.xlu2 %2757  ;;  %v2999_v51 = vsel %vm1369_vm4, %v8695_v44, %v8800_v21  ;;  %v3714_v21 = vld [vmem:[%s3807_s24 + $0xa0] sm:$0xff] }
 0x637   : > { %v3139_v57 = vsel %vm1532_vm8, %v6905_v35, %v2722_v39  ;;  %v2846_v60 = vpop.permute.xlu0 %2845  ;;  %v8796_v35 = vld [vmem:[#allocation196_spill] sm:$0xff] }
 0x638   : > { %v3448_v48 = vadd.f32 %v3708_v28, %v3353_v4  ;;  %v3465_v7 = vadd.f32 %v3709_v43, %v3404_v31  ;;  %v3171_v50 = vsel %vm1565_vm10, %v3139_v57, %v2812_v62  ;;  %v2998_v18 = vsel %vm1369_vm4, %v6080_v9, %v8796_v35  ;;  %v8801_v39 = vld [vmem:[#allocation44_spill] sm:$0xff]  ;;  %v8802_v28 = vld [vmem:[#allocation107_spill] sm:$0xff] }
 0x639   : > { %v3203_v58 = vsel %vm1598_vm12, %v3171_v50, %v2902_v38  ;;  %v3028_v47 = vsel %vm1401_vm6, %v2998_v18, %v8797_v8  ;;  %v3029_v57 = vsel %vm1401_vm6, %v2999_v51, %v8801_v39  ;;  %v3713_v8 = vld [vmem:[%s3807_s24 + $0x10] sm:$0xff] }
 0x63a   : > { %v3480_v0 = vmax.f32 %v3448_v48, 0.0  ;;  %v3497_v5 = vmax.f32 %v3465_v7, 0.0  ;;  %3650 = vmatmul.msk.f32.gmra.mxu1 %vm1640_vm11, %v3203_v58  ;;  %v3060_v61 = vsel %vm1433_vm5, %v3028_v47, %v8798_v45  ;;  %v3061_v48 = vsel %vm1433_vm5, %v3029_v57, %v8802_v28 }
 0x63b   : > { %v3092_v55 = vsel %vm1466_vm7, %v3060_v61, %v8799_v25  ;;  %v3093_v30 = vsel %vm1466_vm7, %v3061_v48, %v8803_v59 }
 0x63c   : > { %3512 = vst.msk [vmem:[%s7435_s30] sm:$0xff] %vm1369_vm4, %v3480_v0  ;;  %2915 = vrot.lane.b32.xlu1 %v8795_v24, %s3755_s6  ;;  %v3124_v38 = vsel %vm1499_vm9, %v3092_v55, %v7389_v2  ;;  %v3712_v24 = vld [vmem:[%s3807_s24 + $0x98] sm:$0xff]  ;;  %v8804_v55 = vld [vmem:[#allocation67_spill] sm:$0xff] }
 0x63d   : > { %3529 = vst.msk [vmem:[%s7435_s30 + $0x88] sm:$0xff] %vm1369_vm4, %v3497_v5 }
 0x63e   : > { %v2756_v6 = vpop.permute.xlu1 %2755  ;;  %v2938_v37 = vpop.permute.xlu2 %2937 }
 0x63f   : > { %v2662_v11 = vpop.permute.xlu0 %2661  ;;  %v3156_v27 = vsel %vm1532_vm8, %v3124_v38, %v2756_v6  ;;  %v3000_v38 = vsel %vm1369_vm4, %v8705_v17, %v8804_v55  ;;  %v8811_v55 = vld [vmem:[#allocation69_spill] sm:$0xff] }
 0x640   : > { %v3188_v41 = vsel %vm1565_vm10, %v3156_v27, %v2846_v60  ;;  %v3125_v44 = vsel %vm1499_vm9, %v3093_v30, %v2662_v11 }
 0x641   : > { %v3157_v5 = vsel %vm1532_vm8, %v3125_v44, %v2758_v53  ;;  %v8805_v53 = vld [vmem:[#allocation137_spill] sm:$0xff] }
 0x642   : > { %v3030_v27 = vsel %vm1401_vm6, %v3000_v38, %v8805_v53 }
 0x644   : > { %v3406_v9 = vpop.f32.mrf.mxu3 }
 0x645   : > { %v3407_v1 = vadd.f32 %v7415_v12, %v3406_v9  ;;  %v3355_v14 = vpop.f32.mrf.mxu1  ;;  %v8806_v9 = vld [vmem:[#allocation188_spill] sm:$0xff] }
 0x646   : > { %v3356_v10 = vadd.f32 %v7415_v12, %v3355_v14  ;;  %v2936_v3 = vpop.permute.xlu1 %2935  ;;  %v7472_v29 = vpop.permute.xlu2 %2815 }
 0x647   : > { %v3466_v20 = vadd.f32 %v3710_v49, %v3407_v1  ;;  %v2904_v16 = vpop.permute.xlu0 %2903  ;;  %v3220_v2 = vsel %vm1598_vm12, %v3188_v41, %v2936_v3  ;;  %v3062_v1 = vsel %vm1433_vm5, %v3030_v27, %v8806_v9 }
 0x648   : > { %v3449_v62 = vadd.f32 %v3711_v63, %v3356_v10  ;;  %3667 = vmatmul.msk.f32.gmra.mxu3 %vm1640_vm11, %v3220_v2 }
 0x649   : > { %v3498_v13 = vmax.f32 %v3466_v20, 0.0 }
 0x64a   : > { %v3481_v22 = vmax.f32 %v3449_v62, 0.0 }
 0x64b   : > { %3530 = vst.msk [vmem:[%s7435_s30 + $0x90] sm:$0xff] %vm1369_vm4, %v3498_v13 }
 0x64c   : > { %3513 = vst.msk [vmem:[%s7435_s30 + $0x8] sm:$0xff] %vm1369_vm4, %v3481_v22 }
 0x64e   : > { %v2814_v36 = vpop.permute.xlu1 %2813  ;;  %v2850_v4 = vpop.permute.xlu2 %2849 }
 0x64f   : > { %v3172_v33 = vsel %vm1565_vm10, %v3140_v56, %v2814_v36  ;;  %v2726_v31 = vpop.permute.xlu0 %2725 }
 0x650   : > { %v3204_v60 = vsel %vm1598_vm12, %v3172_v33, %v2904_v16  ;;  %v3141_v16 = vsel %vm1532_vm8, %v7039_v42, %v2726_v31 }
 0x651   : > { %3651 = vmatmul.msk.f32.gmra.mxu1 %vm1640_vm11, %v3204_v60  ;;  %v3173_v36 = vsel %vm1565_vm10, %v3141_v16, %v7472_v29 }
 0x654   : > { %v3409_v43 = vpop.f32.mrf.mxu3 }
 0x655   : > { %v3410_v7 = vadd.f32 %v7415_v12, %v3409_v43  ;;  %v3358_v50 = vpop.f32.mrf.mxu1 }
 0x656   : > { %v3359_v58 = vadd.f32 %v7415_v12, %v3358_v50  ;;  %v2848_v0 = vpop.permute.xlu1 %2847  ;;  %v2666_v61 = vpop.permute.xlu2 %2665  ;;  %v8808_v50 = vld [vmem:[#allocation6_spill] sm:$0xff] }
 0x657   : > { %v3467_v35 = vadd.f32 %v3712_v24, %v3410_v7  ;;  %v3189_v18 = vsel %vm1565_vm10, %v3157_v5, %v2848_v0  ;;  %v2760_v6 = vpop.permute.xlu0 %2759  ;;  %v8809_v5 = vld [vmem:[#allocation194_spill] sm:$0xff] }
 0x658   : > { %v3450_v47 = vadd.f32 %v3713_v8, %v3359_v58  ;;  %v3221_v11 = vsel %vm1598_vm12, %v3189_v18, %v2938_v37  ;;  %v8807_v37 = vld [vmem:[#allocation140_spill] sm:$0xff]  ;;  %v3001_v58 = vsel %vm1369_vm4, %v8713_v52, %v8808_v50  ;;  %v3716_v18 = vld [vmem:[%s3807_s24 + $0xa8] sm:$0xff] }
 0x659   : > { %v3499_v45 = vmax.f32 %v3467_v35, 0.0  ;;  %3668 = vmatmul.msk.f32.gmra.mxu3 %vm1640_vm11, %v3221_v11  ;;  %v3094_v14 = vsel %vm1466_vm7, %v3062_v1, %v8807_v37  ;;  %v3031_v24 = vsel %vm1401_vm6, %v3001_v58, %v8809_v5  ;;  %v8818_v58 = vld [vmem:[#allocation24_spill] sm:$0xff] }
 0x65a   : > { %v3482_v25 = vmax.f32 %v3450_v47, 0.0  ;;  %v8810_v47 = vld [vmem:[#allocation99_spill] sm:$0xff] }
 0x65b   : > { %3531 = vst.msk [vmem:[%s7435_s30 + $0x98] sm:$0xff] %vm1369_vm4, %v3499_v45  ;;  %v3063_v11 = vsel %vm1433_vm5, %v3031_v24, %v8810_v47  ;;  %v3717_v45 = vld [vmem:[%s3807_s24 + $0x20] sm:$0xff] }
 0x65c   : > { %3514 = vst.msk [vmem:[%s7435_s30 + $0x10] sm:$0xff] %vm1369_vm4, %v3482_v25  ;;  %v3095_v52 = vsel %vm1466_vm7, %v3063_v11, %v8811_v55 }
 0x65d   : > { %v3127_v53 = vsel %vm1499_vm9, %v3095_v52, %v2666_v61  ;;  %v8822_v52 = vld [vmem:[#allocation89_spill] sm:$0xff] }
 0x65e   : > { %v2664_v10 = vpop.permute.xlu1 %2663  ;;  %v2908_v2 = vpop.permute.xlu2 %2907 }
 0x65f   : > { %v3126_v3 = vsel %vm1499_vm9, %v3094_v14, %v2664_v10  ;;  %v2940_v41 = vpop.permute.xlu0 %2939 }
 0x660   : > { %v3158_v17 = vsel %vm1532_vm8, %v3126_v3, %v2760_v6 }
 0x661   : > { %v3190_v49 = vsel %vm1565_vm10, %v3158_v17, %v2850_v4  ;;  %v3715_v4 = vld [vmem:[%s3807_s24 + $0x18] sm:$0xff]  ;;  %v3718_v17 = vld [vmem:[%s3807_s24 + $0x28] sm:$0xff] }
 0x662   : > { %v3222_v20 = vsel %vm1598_vm12, %v3190_v49, %v2940_v41 }
 0x663   : > { %3669 = vmatmul.msk.f32.gmra.mxu3 %vm1640_vm11, %v3222_v20 }
 0x664   : > { %v3412_v63 = vpop.f32.mrf.mxu3 }
 0x665   : > { %v3413_v62 = vadd.f32 %v7415_v12, %v3412_v63  ;;  %v3361_v13 = vpop.f32.mrf.mxu1  ;;  %v8812_v63 = vld [vmem:[#allocation185_spill] sm:$0xff] }
 0x666   : > { %v3362_v22 = vadd.f32 %v7415_v12, %v3361_v13  ;;  %v2906_v56 = vpop.permute.xlu1 %2905  ;;  %v2730_v60 = vpop.permute.xlu2 %2729 }
 0x667   : > { %v3468_v51 = vadd.f32 %v3714_v21, %v3413_v62  ;;  %v2818_v33 = vpop.permute.xlu0 %2817  ;;  %v3205_v42 = vsel %vm1598_vm12, %v3173_v36, %v2906_v56  ;;  %v3143_v16 = vsel %vm1532_vm8, %v6998_v23, %v2730_v60  ;;  %v3002_v62 = vsel %vm1369_vm4, %v8734_v32, %v8812_v63  ;;  %v8813_v56 = vld [vmem:[#allocation11_spill] sm:$0xff]  ;;  %v8815_v23 = vld [vmem:[#allocation130_spill] sm:$0xff] }
 0x668   : > { %v3451_v31 = vadd.f32 %v3715_v4, %v3362_v22  ;;  %3652 = vmatmul.msk.f32.gmra.mxu1 %vm1640_vm11, %v3205_v42  ;;  %v3032_v36 = vsel %vm1401_vm6, %v3002_v62, %v8813_v56 }
 0x669   : > { %v3500_v39 = vmax.f32 %v3468_v51, 0.0  ;;  %v8814_v51 = vld [vmem:[#allocation147_spill] sm:$0xff] }
 0x66a   : > { %v3483_v57 = vmax.f32 %v3451_v31, 0.0 }
 0x66b   : > { %3532 = vst.msk [vmem:[%s7435_s30 + $0xa0] sm:$0xff] %vm1369_vm4, %v3500_v39 }
 0x66c   : > { %3515 = vst.msk [vmem:[%s7435_s30 + $0x18] sm:$0xff] %vm1369_vm4, %v3483_v57 }
 0x66e   : > { %v2728_v28 = vpop.permute.xlu1 %2727  ;;  %v2764_v35 = vpop.permute.xlu2 %2763 }
 0x66f   : > { %v3142_v29 = vsel %vm1532_vm8, %v6926_v34, %v2728_v28  ;;  %v2852_v48 = vpop.permute.xlu0 %2851 }
 0x670   : > { %v3174_v59 = vsel %vm1565_vm10, %v3142_v29, %v2818_v33  ;;  %v3064_v33 = vsel %vm1433_vm5, %v3032_v36, %v8814_v51  ;;  %v3721_v36 = vld [vmem:[%s3807_s24 + $0xb8] sm:$0xff] }
 0x671   : > { %v3206_v30 = vsel %vm1598_vm12, %v3174_v59, %v2908_v2  ;;  %v3096_v42 = vsel %vm1466_vm7, %v3064_v33, %v8815_v23 }
 0x672   : > { %3653 = vmatmul.msk.f32.gmra.mxu1 %vm1640_vm11, %v3206_v30  ;;  %v8816_v30 = vld [vmem:[#allocation82_spill] sm:$0xff] }
 0x674   : > { %v3415_v44 = vpop.f32.mrf.mxu3 }
 0x675   : > { %v3416_v43 = vadd.f32 %v7415_v12, %v3415_v44  ;;  %v3364_v7 = vpop.f32.mrf.mxu1 }
 0x676   : > { %v3365_v0 = vadd.f32 %v7415_v12, %v3364_v7  ;;  %v2762_v34 = vpop.permute.xlu1 %2761  ;;  %v2944_v61 = vpop.permute.xlu2 %2943 }
 0x677   : > { %v3469_v6 = vadd.f32 %v3716_v18, %v3416_v43  ;;  %v2668_v8 = vpop.permute.xlu0 %2667  ;;  %v3159_v9 = vsel %vm1532_vm8, %v3127_v53, %v2762_v34  ;;  %v8817_v43 = vld [vmem:[#allocation177_spill] sm:$0xff]  ;;  %v8819_v34 = vld [vmem:[#allocation198_spill] sm:$0xff] }
 0x678   : > { %v3452_v25 = vadd.f32 %v3717_v45, %v3365_v0  ;;  %v3191_v37 = vsel %vm1565_vm10, %v3159_v9, %v2852_v48  ;;  %v3128_v4 = vsel %vm1499_vm9, %v3096_v42, %v2668_v8  ;;  %v3004_v0 = vsel %vm1369_vm4, %v8752_v19, %v8818_v58  ;;  %v8821_v45 = vld [vmem:[#allocation119_spill] sm:$0xff] }
 0x679   : > { %v3501_v38 = vmax.f32 %v3469_v6, 0.0  ;;  %v3160_v57 = vsel %vm1532_vm8, %v3128_v4, %v2764_v35  ;;  %v8820_v35 = vld [vmem:[#allocation27_spill] sm:$0xff]  ;;  %v3719_v6 = vld [vmem:[%s3807_s24 + $0xb0] sm:$0xff] }
 0x67a   : > { %v3484_v27 = vmax.f32 %v3452_v25, 0.0  ;;  %v3034_v18 = vsel %vm1401_vm6, %v3004_v0, %v8820_v35 }
 0x67b   : > { %3533 = vst.msk [vmem:[%s7435_s30 + $0xa8] sm:$0xff] %vm1369_vm4, %v3501_v38  ;;  %v3066_v19 = vsel %vm1433_vm5, %v3034_v18, %v8821_v45 }
 0x67c   : > { %3516 = vst.msk [vmem:[%s7435_s30 + $0x20] sm:$0xff] %vm1369_vm4, %v3484_v27  ;;  %v3098_v38 = vsel %vm1466_vm7, %v3066_v19, %v8822_v52  ;;  %v8823_v27 = vld [vmem:[#allocation39_spill] sm:$0xff]  ;;  %v3727_v19 = vld [vmem:[%s3807_s24 + $0xd0] sm:$0xff] }
 0x67e   : > { %v2942_v1 = vpop.permute.xlu1 %2941  ;;  %v2822_v31 = vpop.permute.xlu2 %2821 }
 0x67f   : > { %v2910_v14 = vpop.permute.xlu0 %2909  ;;  %v3367_v10 = vpop.f32.mrf.mxu1  ;;  %v3223_v3 = vsel %vm1598_vm12, %v3191_v37, %v2942_v1  ;;  %v3720_v1 = vld [vmem:[%s3807_s24 + $0x30] sm:$0xff] }
 0x680   : > { %v3368_v41 = vadd.f32 %v7415_v12, %v3367_v10  ;;  %3670 = vmatmul.msk.f32.gmra.mxu3 %vm1640_vm11, %v3223_v3  ;;  %v8825_v3 = vld [vmem:[#allocation49_spill] sm:$0xff] }
 0x682   : > { %v3453_v49 = vadd.f32 %v3718_v17, %v3368_v41 }
 0x684   : > { %v3485_v20 = vmax.f32 %v3453_v49, 0.0 }
 0x686   : > { %3517 = vst.msk [vmem:[%s7435_s30 + $0x28] sm:$0xff] %vm1369_vm4, %v3485_v20  ;;  %v2820_v2 = vpop.permute.xlu1 %2819  ;;  %v2672_v24 = vpop.permute.xlu2 %2671 }
 0x687   : > { %v3175_v13 = vsel %vm1565_vm10, %v3143_v16, %v2820_v2  ;;  %v2732_v22 = vpop.permute.xlu0 %2731 }
 0x688   : > { %v3207_v21 = vsel %vm1598_vm12, %v3175_v13, %v2910_v14  ;;  %v3144_v32 = vsel %vm1532_vm8, %v7069_v40, %v2732_v22  ;;  %v3003_v40 = vsel %vm1369_vm4, %v8744_v54, %v8816_v30  ;;  %v8824_v14 = vld [vmem:[#allocation201_spill] sm:$0xff] }
 0x689   : > { %3654 = vmatmul.msk.f32.gmra.mxu1 %vm1640_vm11, %v3207_v21  ;;  %v3176_v29 = vsel %vm1565_vm10, %v3144_v32, %v2822_v31  ;;  %v3033_v7 = vsel %vm1401_vm6, %v3003_v40, %v8817_v43 }
 0x68a   : > { %v3065_v5 = vsel %vm1433_vm5, %v3033_v7, %v8819_v34  ;;  %v3724_v7 = vld [vmem:[%s3807_s24 + $0x40] sm:$0xff] }
 0x68b   : > { %v3097_v54 = vsel %vm1466_vm7, %v3065_v5, %v6902_v15  ;;  %v3130_v15 = vsel %vm1499_vm9, %v3098_v38, %v2672_v24  ;;  %v3725_v5 = vld [vmem:[%s3807_s24 + $0xc8] sm:$0xff] }
 0x68c   : > { %v3162_v17 = vsel %vm1532_vm8, %v3130_v15, %v8823_v27 }
 0x68d   : > { %v3194_v20 = vsel %vm1565_vm10, %v3162_v17, %v8824_v14 }
 0x68e   : > { %v2854_v39 = vpop.permute.xlu1 %2853  ;;  %v3226_v2 = vsel %vm1598_vm12, %v3194_v20, %v8825_v3  ;;  %v2736_v23 = vpop.permute.xlu2 %2735 }
 0x68f   : > { %v3192_v60 = vsel %vm1565_vm10, %v3160_v57, %v2854_v39  ;;  %v2912_v28 = vpop.permute.xlu0 %2911 }
 0x690   : > { %v3208_v48 = vsel %vm1598_vm12, %v3176_v29, %v2912_v28  ;;  %v3224_v59 = vsel %vm1598_vm12, %v3192_v60, %v2944_v61  ;;  %v3722_v29 = vld [vmem:[%s3807_s24 + $0x38] sm:$0xff] }
 0x691   : > { %3655 = vmatmul.msk.f32.gmra.mxu1 %vm1640_vm11, %v3208_v48  ;;  %3671 = vmatmul.msk.f32.gmra.mxu3 %vm1640_vm11, %v3224_v59 }
 0x693   : > { %v3418_v44 = vpop.f32.mrf.mxu3 }
 0x694   : > { %v3419_v50 = vadd.f32 %v7415_v12, %v3418_v44 }
 0x696   : > { %v3470_v8 = vadd.f32 %v3719_v6, %v3419_v50  ;;  %v2670_v47 = vpop.permute.xlu1 %2669  ;;  %v3370_v11 = vpop.f32.mrf.mxu1  ;;  %v3726_v6 = vld [vmem:[%s3807_s24 + $0x48] sm:$0xff] }
 0x697   : > { %v3129_v25 = vsel %vm1499_vm9, %v3097_v54, %v2670_v47  ;;  %v3371_v55 = vadd.f32 %v7415_v12, %v3370_v11  ;;  %v2824_v16 = vpop.permute.xlu0 %2823 }
 0x698   : > { %v3502_v53 = vmax.f32 %v3470_v8, 0.0  ;;  %v3161_v9 = vsel %vm1532_vm8, %v3129_v25, %v8823_v27 }
 0x699   : > { %v3454_v37 = vadd.f32 %v3720_v1, %v3371_v55  ;;  %v3193_v10 = vsel %vm1565_vm10, %v3161_v9, %v8824_v14  ;;  %v3728_v9 = vld [vmem:[%s3807_s24 + $0x50] sm:$0xff]  ;;  %v3729_v1 = vld [vmem:[%s3807_s24 + $0xd8] sm:$0xff] }
 0x69a   : > { %3534 = vst.msk [vmem:[%s7435_s30 + $0xb0] sm:$0xff] %vm1369_vm4, %v3502_v53  ;;  %v3225_v41 = vsel %vm1598_vm12, %v3193_v10, %v8825_v3 }
 0x69b   : > { %v3486_v61 = vmax.f32 %v3454_v37, 0.0  ;;  %3672 = vmatmul.msk.f32.gmra.mxu3 %vm1640_vm11, %v3225_v41 }
 0x69d   : > { %3518 = vst.msk [vmem:[%s7435_s30 + $0x30] sm:$0xff] %vm1369_vm4, %v3486_v61  ;;  %v3730_v61 = vld [vmem:[%s3807_s24 + $0x58] sm:$0xff] }
 0x69e   : > { %v2734_v49 = vpop.permute.xlu1 %2733 }
 0x69f   : > { %v3145_v63 = vsel %vm1532_vm8, %v6957_v26, %v2734_v49  ;;  %v2826_v42 = vpop.permute.xlu0 %2825  ;;  %v3146_v26 = vsel %vm1532_vm8, %v7048_v46, %v2736_v23  ;;  %v3723_v46 = vld [vmem:[%s3807_s24 + $0xc0] sm:$0xff]  ;;  %v3733_v23 = vld [vmem:[%s3807_s24 + $0x68] sm:$0xff] }
 0x6a0   : > { %v3177_v56 = vsel %vm1565_vm10, %v3145_v63, %v2824_v16  ;;  %v3178_v31 = vsel %vm1565_vm10, %v3146_v26, %v2826_v42 }
 0x6a3   : > { %3673 = vmatmul.msk.f32.gmra.mxu3 %vm1640_vm11, %v3226_v2  ;;  %v3731_v2 = vld [vmem:[%s3807_s24 + $0xe0] sm:$0xff] }
 0x6a4   : > { %v3421_v62 = vpop.f32.mrf.mxu3 }
 0x6a5   : > { %v3422_v13 = vadd.f32 %v7415_v12, %v3421_v62 }
 0x6a6   : > { %v2914_v22 = vpop.permute.xlu1 %2913 }
 0x6a7   : > { %v3471_v21 = vadd.f32 %v3721_v36, %v3422_v13  ;;  %v3209_v51 = vsel %vm1598_vm12, %v3177_v56, %v2914_v22  ;;  %v3732_v56 = vld [vmem:[%s3807_s24 + $0x60] sm:$0xff] }
 0x6a8   : > { %3656 = vmatmul.msk.f32.gmra.mxu1 %vm1640_vm11, %v3209_v51 }
 0x6a9   : > { %v3503_v33 = vmax.f32 %v3471_v21, 0.0 }
 0x6ab   : > { %3535 = vst.msk [vmem:[%s7435_s30 + $0xb8] sm:$0xff] %vm1369_vm4, %v3503_v33 }
 0x6ad   : > { %v3373_v4 = vpop.f32.mrf.mxu1 }
 0x6ae   : > { %v3374_v32 = vadd.f32 %v7415_v12, %v3373_v4  ;;  %v2916_v39 = vpop.permute.xlu1 %2915  ;;  %v3424_v57 = vpop.f32.mrf.mxu3 }
 0x6af   : > { %v3425_v60 = vadd.f32 %v7415_v12, %v3424_v57  ;;  %v3210_v28 = vsel %vm1598_vm12, %v3178_v31, %v2916_v39 }
 0x6b0   : > { %v3455_v48 = vadd.f32 %v3722_v29, %v3374_v32  ;;  %3657 = vmatmul.msk.f32.gmra.mxu1 %vm1640_vm11, %v3210_v28  ;;  %v3734_v32 = vld [vmem:[%s3807_s24 + $0xe8] sm:$0xff]  ;;  %v3735_v29 = vld [vmem:[%s3807_s24 + $0xf0] sm:$0xff] }
 0x6b1   : > { %v3472_v59 = vadd.f32 %v3723_v46, %v3425_v60 }
 0x6b2   : > { %v3487_v30 = vmax.f32 %v3455_v48, 0.0 }
 0x6b3   : > { %v3504_v40 = vmax.f32 %v3472_v59, 0.0 }
 0x6b4   : > { %3519 = vst.msk [vmem:[%s7435_s30 + $0x38] sm:$0xff] %vm1369_vm4, %v3487_v30 }
 0x6b5   : > { %3536 = vst.msk [vmem:[%s7435_s30 + $0xc0] sm:$0xff] %vm1369_vm4, %v3504_v40 }
 0x6b7   : > { %v3376_v44 = vpop.f32.mrf.mxu1 }
 0x6b8   : > { %v3377_v43 = vadd.f32 %v7415_v12, %v3376_v44 }
 0x6ba   : > { %v3456_v50 = vadd.f32 %v3724_v7, %v3377_v43  ;;  %v3736_v43 = vld [vmem:[%s3807_s24 + $0x70] sm:$0xff] }
 0x6bc   : > { %v3488_v58 = vmax.f32 %v3456_v50, 0.0  ;;  %v3737_v50 = vld [vmem:[%s3807_s24 + $0xf8] sm:$0xff] }
 0x6be   : > { %3520 = vst.msk [vmem:[%s7435_s30 + $0x40] sm:$0xff] %vm1369_vm4, %v3488_v58 }
 0x6cb   : > { %v3427_v0 = vpop.f32.mrf.mxu3 }
 0x6cc   : > { %v3428_v34 = vadd.f32 %v7415_v12, %v3427_v0 }
 0x6ce   : > { %v3473_v24 = vadd.f32 %v3725_v5, %v3428_v34  ;;  %v3379_v35 = vpop.f32.mrf.mxu1 }
 0x6cf   : > { %v3380_v18 = vadd.f32 %v7415_v12, %v3379_v35  ;;  %v3738_v35 = vld [vmem:[%s3807_s24 + $0x78] sm:$0xff] }
 0x6d0   : > { %v3505_v54 = vmax.f32 %v3473_v24, 0.0 }
 0x6d1   : > { %v3457_v8 = vadd.f32 %v3726_v6, %v3380_v18 }
 0x6d2   : > { %3537 = vst.msk [vmem:[%s7435_s30 + $0xc8] sm:$0xff] %vm1369_vm4, %v3505_v54 }
 0x6d3   : > { %v3489_v47 = vmax.f32 %v3457_v8, 0.0 }
 0x6d5   : > { %3521 = vst.msk [vmem:[%s7435_s30 + $0x48] sm:$0xff] %vm1369_vm4, %v3489_v47 }
 0x6dc   : > { %v3430_v11 = vpop.f32.mrf.mxu3 }
 0x6dd   : > { %v3431_v45 = vadd.f32 %v7415_v12, %v3430_v11 }
 0x6df   : > { %v3474_v25 = vadd.f32 %v3727_v19, %v3431_v45 }
 0x6e1   : > { %v3506_v55 = vmax.f32 %v3474_v25, 0.0 }
 0x6e3   : > { %3538 = vst.msk [vmem:[%s7435_s30 + $0xd0] sm:$0xff] %vm1369_vm4, %v3506_v55 }
 0x6e5   : > { %v3382_v52 = vpop.f32.mrf.mxu1 }
 0x6e6   : > { %v3383_v38 = vadd.f32 %v7415_v12, %v3382_v52  ;;  %v3433_v53 = vpop.f32.mrf.mxu3 }
 0x6e7   : > { %v3434_v27 = vadd.f32 %v7415_v12, %v3433_v53 }
 0x6e8   : > { %v3458_v15 = vadd.f32 %v3728_v9, %v3383_v38 }
 0x6e9   : > { %v3475_v37 = vadd.f32 %v3729_v1, %v3434_v27 }
 0x6ea   : > { %v3490_v14 = vmax.f32 %v3458_v15, 0.0 }
 0x6eb   : > { %v3507_v10 = vmax.f32 %v3475_v37, 0.0 }
 0x6ec   : > { %3522 = vst.msk [vmem:[%s7435_s30 + $0x50] sm:$0xff] %vm1369_vm4, %v3490_v14 }
 0x6ed   : > { %3539 = vst.msk [vmem:[%s7435_s30 + $0xd8] sm:$0xff] %vm1369_vm4, %v3507_v10 }
 0x6ef   : > { %v3385_v3 = vpop.f32.mrf.mxu1 }
 0x6f0   : > { %v3386_v41 = vadd.f32 %v7415_v12, %v3385_v3 }
 0x6f2   : > { %v3459_v17 = vadd.f32 %v3730_v61, %v3386_v41 }
 0x6f4   : > { %v3491_v49 = vmax.f32 %v3459_v17, 0.0 }
 0x6f6   : > { %3523 = vst.msk [vmem:[%s7435_s30 + $0x58] sm:$0xff] %vm1369_vm4, %v3491_v49 }
 0x703   : > { %v3436_v20 = vpop.f32.mrf.mxu3 }
 0x704   : > { %v3437_v16 = vadd.f32 %v7415_v12, %v3436_v20 }
 0x706   : > { %v3476_v63 = vadd.f32 %v3731_v2, %v3437_v16  ;;  %v3388_v62 = vpop.f32.mrf.mxu1 }
 0x707   : > { %v3389_v13 = vadd.f32 %v7415_v12, %v3388_v62 }
 0x708   : > { %v3508_v22 = vmax.f32 %v3476_v63, 0.0 }
 0x709   : > { %v3460_v36 = vadd.f32 %v3732_v56, %v3389_v13 }
 0x70a   : > { %3540 = vst.msk [vmem:[%s7435_s30 + $0xe0] sm:$0xff] %vm1369_vm4, %v3508_v22 }
 0x70b   : > { %v3492_v21 = vmax.f32 %v3460_v36, 0.0 }
 0x70d   : > { %3524 = vst.msk [vmem:[%s7435_s30 + $0x60] sm:$0xff] %vm1369_vm4, %v3492_v21 }
 0x70e   : > { %v3391_v51 = vpop.f32.mrf.mxu1 }
 0x70f   : > { %v3392_v33 = vadd.f32 %v7415_v12, %v3391_v51 }
 0x711   : > { %v3461_v42 = vadd.f32 %v3733_v23, %v3392_v33 }
 0x713   : > { %v3493_v26 = vmax.f32 %v3461_v42, 0.0 }
 0x714   : > { %v3439_v4 = vpop.f32.mrf.mxu3 }
 0x715   : > { %3525 = vst.msk [vmem:[%s7435_s30 + $0x68] sm:$0xff] %vm1369_vm4, %v3493_v26  ;;  %v3440_v31 = vadd.f32 %v7415_v12, %v3439_v4 }
 0x717   : > { %v3477_v39 = vadd.f32 %v3734_v32, %v3440_v31 }
 0x719   : > { %v3509_v57 = vmax.f32 %v3477_v39, 0.0 }
 0x71b   : > { %3541 = vst.msk [vmem:[%s7435_s30 + $0xe8] sm:$0xff] %vm1369_vm4, %v3509_v57 }
 0x71e   : > { %v3442_v60 = vpop.f32.mrf.mxu3 }
 0x71f   : > { %v3443_v28 = vadd.f32 %v7415_v12, %v3442_v60 }
 0x721   : > { %v3478_v48 = vadd.f32 %v3735_v29, %v3443_v28 }
 0x723   : > { %v3510_v46 = vmax.f32 %v3478_v48, 0.0 }
 0x725   : > { %3542 = vst.msk [vmem:[%s7435_s30 + $0xf0] sm:$0xff] %vm1369_vm4, %v3510_v46  ;;  %v3394_v59 = vpop.f32.mrf.mxu1 }
 0x726   : > { %v3395_v30 = vadd.f32 %v7415_v12, %v3394_v59  ;;  %v3445_v40 = vpop.f32.mrf.mxu3 }
 0x727   : > { %v3446_v44 = vadd.f32 %v7415_v12, %v3445_v40 }
 0x728   : > { %v3462_v7 = vadd.f32 %v3736_v43, %v3395_v30 }
 0x729   : > { %v3479_v58 = vadd.f32 %v3737_v50, %v3446_v44 }
 0x72a   : > { %v3494_v0 = vmax.f32 %v3462_v7, 0.0 }
 0x72b   : > { %v3511_v34 = vmax.f32 %v3479_v58, 0.0 }
 0x72c   : > { %3526 = vst.msk [vmem:[%s7435_s30 + $0x70] sm:$0xff] %vm1369_vm4, %v3494_v0 }
 0x72d   : > { %3543 = vst.msk [vmem:[%s7435_s30 + $0xf8] sm:$0xff] %vm1369_vm4, %v3511_v34  ;;  %v3397_v5 = vpop.f32.mrf.mxu1 }
 0x72e   : > { %v3398_v24 = vadd.f32 %v7415_v12, %v3397_v5 }
 0x730   : > { %v3463_v18 = vadd.f32 %v3738_v35, %v3398_v24 }
 0x732   : > { %v3495_v54 = vmax.f32 %v3463_v18, 0.0 }
 0x734   : > { %3527 = vst.msk [vmem:[%s7435_s30 + $0x78] sm:$0xff] %vm1369_vm4, %v3495_v54 }
 0x735 PF: > { %s15_s18 = sadd.s32 1, %s3745_s18  }
 0x736   : > { %p12_p4 = scmp.ge.s32.totalorder %s15_s18, 4  }
 0x738   :  { %14 = sbr.rel (!%p12_p4) target bundleno = 1 (0x1), region = 70 }

</bundles_post_ra>
